<compile_context>
chip_gen: v6e
topology: v6e:2x2x1
jax: 0.10.0
libtpu: 0.0.40
codegen_flags: <defaults>
</compile_context>

<pallas_src>
import functools

import jax
import jax.numpy as jnp
from jax import lax
from jax.experimental import pallas as pl
from jax.experimental.pallas import tpu as pltpu


def _trident_kernel(*refs, nb, N, K, W, P, S, C_in, C_out, paddings, dilations):
    """One grid step = one branch, all N images.

    refs layout: [x_0, ..., x_{nb-1}, w, out, xz_scratch]
      x_i : (N, C_in, P)        branch-i input, P = H*W (flat spatial)   [VMEM, resident]
      w   : (K, K, C_out, C_in) shared conv weight                       [VMEM, resident]
      out : (N, C_out, P)       this branch's output tile (lane-dense, P mult. of 128 here)
      xz  : (C_in, 2*S + P)     VMEM strip: [zero slack | image | zero slack]
    """
    x_refs = refs[:nb]
    w_ref = refs[nb]
    o_ref = refs[nb + 1]
    xz_ref = refs[nb + 2]

    b = pl.program_id(0)

    # Zero only the halo (slack) each step -- two aligned stores; the interior is always
    # overwritten below (never double-stored).  Re-establishing this every step keeps it
    # correct under v7x megacore grid sharding (each core owns its own scratch instance).
    if S > 0:
        zeros_slack = jnp.zeros((C_in, S), xz_ref.dtype)
        xz_ref[:, 0:S] = zeros_slack
        xz_ref[:, S + P:S + P + S] = zeros_slack

    # Column index modulo W for the horizontal-wrap masks (static pattern, hoisted once).
    colmod = lax.broadcasted_iota(jnp.int32, (C_in, P), 1) % W

    for i in range(nb):
        @pl.when(b == i)
        def _branch(i=i):
            p = paddings[i]          # Python ints -> every offset/mask below is static
            d = dilations[i]
            x_ref = x_refs[i]
            for n in range(N):                           # N folded into the block
                xz_ref[:, S:S + P] = x_ref[n]            # aligned interior copy
                acc = jnp.zeros((C_out, P), jnp.float32)  # 2 vregs, never spills
                for kh in range(K):
                    for kw in range(K):
                        dr = kh * d - p                  # static row shift
                        dc = kw * d - p                  # static col shift
                        off = S + dr * W + dc
                        rhs = xz_ref[:, off:off + P]     # contiguous (C_in, P) lane slice
                        # Horizontal wrap: a source column c+dc outside [0, W) is padding.
                        # (Vertically out-of-range rows land in the zero slack -> already 0.)
                        if dc > 0:
                            rhs = jnp.where(colmod < W - dc, rhs, 0.0)
                        elif dc < 0:
                            rhs = jnp.where(colmod >= -dc, rhs, 0.0)
                        # Back-to-back MXU accumulation into the same acc (MRB-friendly on
                        # v7x); no elementwise work touches acc between the 9 tap matmuls
                        # other than the adds themselves.
                        acc = acc + jnp.dot(w_ref[kh, kw], rhs,
                                            preferred_element_type=jnp.float32)
                o_ref[n] = acc.astype(o_ref.dtype)


def trident_conv_forward(inputs_nchw, weight_oihw, paddings, dilations):
    """TridentConv.forward (training / test_branch_idx == -1 path).

    inputs_nchw : list (len == num_branch) of NCHW arrays.
    weight_oihw : (C_out, C_in, K, K) shared weight (PyTorch layout).
    Returns a list of NCHW outputs, one per branch.
    """
    nb = len(inputs_nchw)
    assert nb == len(paddings) == len(dilations) and nb >= 1
    C_out, C_in, K, K2 = weight_oihw.shape
    assert K == K2
    N, C, H, W = inputs_nchw[0].shape
    assert C == C_in
    for x in inputs_nchw:
        assert x.shape == (N, C_in, H, W)
    # Fused fast path requires "same-size" branches (2p == d*(K-1)), which is exactly the
    # TridentConv configuration (paddings == dilations with a 3x3 kernel).
    for p, d in zip(paddings, dilations):
        assert 2 * p == d * (K - 1), (
            "fused trident kernel needs 2*padding == dilation*(kernel_size-1) per branch")
    # TODO(synk): general shrinking-output (padding, dilation) combos would need a padded
    # 2-D scratch variant; not required for TridentConv configs.

    H_out, W_out = H, W
    P = H * W
    S_raw = max(p * W + p for p in paddings)                 # max |tap shift| in flat space
    S = ((S_raw + 127) // 128) * 128 if S_raw > 0 else 0     # lane-aligned slack
    dtype = inputs_nchw[0].dtype

    # Free row-major reshapes: no stack, no transpose, no extra HBM read/write of inputs.
    xs_flat = [x.reshape(N, C_in, P) for x in inputs_nchw]
    # Tiny (K*K*C_out*C_in) relayout so w_ref[kh, kw] is the (C_out, C_in) tap matrix.
    w = jnp.transpose(weight_oihw, (2, 3, 0, 1))

    kernel = functools.partial(
        _trident_kernel, nb=nb, N=N, K=K, W=W, P=P, S=S,
        C_in=C_in, C_out=C_out,
        paddings=tuple(int(p) for p in paddings),
        dilations=tuple(int(d) for d in dilations))

    # Every branch input + the shared weight use constant index_maps, so each is DMA'd into
    # VMEM once and stays resident for the whole grid (no re-fetch per step).
    in_specs = [pl.BlockSpec((N, C_in, P), lambda b: (0, 0, 0)) for _ in range(nb)]
    in_specs.append(pl.BlockSpec((K, K, C_out, C_in), lambda b: (0, 0, 0, 0)))
    # TODO(synk): production sizes -> pl.Buffered(1) on the weight spec, bf16 MXU operands
    # (v6e/v7x, f32 elementwise kept for v5e), grid=(nb, N) for even v7x core balance at
    # large N, and H-tiling with a (K-1)*dilation halo + vmem_limit_bytes for v7x's 64 MiB.

    out = pl.pallas_call(
        kernel,
        out_shape=jax.ShapeDtypeStruct((nb * N, C_out, P), dtype),
        grid_spec=pltpu.PrefetchScalarGridSpec(
            num_scalar_prefetch=0,
            grid=(nb,),                                  # one step per branch (N folded in)
            in_specs=in_specs,
            out_specs=pl.BlockSpec((N, C_out, P), lambda b: (b, 0, 0)),
            scratch_shapes=[pltpu.VMEM((C_in, 2 * S + P), dtype)],
        ),
        compiler_params=pltpu.CompilerParams(
            dimension_semantics=("parallel",),
        ),
    )(*xs_flat, w)

    # (nb*N, C_out, H*W) -> per-branch NCHW: pure reshape, no transpose, lane-dense stores.
    out = out.reshape(nb, N, C_out, H_out, W_out)
    return [out[i] for i in range(nb)]


def kaiming_uniform_relu(key, shape):
    """torch.nn.init.kaiming_uniform_(w, nonlinearity='relu') for OIHW weight."""
    c_out, c_in, kh, kw = shape
    fan_in = c_in * kh * kw
    gain = jnp.sqrt(2.0)  # relu gain
    bound = gain * jnp.sqrt(3.0 / fan_in)
    return jax.random.uniform(key, shape, jnp.float32, -bound, bound)


def _reference_branch(x_nchw, w_oihw, padding, dilation):
    """Plain-JAX reference (lax conv) for sanity checking."""
    return lax.conv_general_dilated(
        x_nchw, w_oihw,
        window_strides=(1, 1),
        padding=((padding, padding), (padding, padding)),
        rhs_dilation=(dilation, dilation),
        dimension_numbers=("NCHW", "OIHW", "NCHW"),
    )


if __name__ == "__main__":
    # Module config (trident-style): shared 3x3 conv, 3 branches, dilations 1/2/3 with
    # matching paddings (same-size conv per branch); stride=1, groups=1, bias=False.
    in_channels, out_channels, kernel_size = 4, 8, 3
    num_branch = 3
    paddings = [1, 2, 3]
    dilations = [1, 2, 3]

    key = jax.random.PRNGKey(0)
    k_w, *k_xs = jax.random.split(key, 1 + num_branch)

    weight = kaiming_uniform_relu(
        k_w, (out_channels, in_channels, kernel_size, kernel_size))

    # One NCHW input per branch (the module's forward takes a list of inputs).
    N, H, W = 2, 16, 16
    inputs = [jax.random.normal(k, (N, in_channels, H, W), jnp.float32) for k in k_xs]

    outs = trident_conv_forward(inputs, weight, paddings, dilations)
    outs = [jax.block_until_ready(o) for o in outs]

    # Correctness check against XLA's conv.
    for x, o, p, d in zip(inputs, outs, paddings, dilations):
        ref = _reference_branch(x, weight, p, d)
        assert o.shape == ref.shape, (o.shape, ref.shape)
        assert jnp.allclose(o, ref, atol=1e-4, rtol=1e-4), \
            float(jnp.max(jnp.abs(o - ref)))

    # TODO(synk): empty-input (_NewEmptyTensorOp) path and optional norm/activation hooks
    # are not implemented (both inactive in the default TridentConv config).
    print("KERNEL_OK")
</pallas_src>

<mosaic_0001>
module attributes {stable_mosaic.version = 11 : i64} {
  func.func @_trident_kernel(%arg0: i32, %arg1: memref<2x4x256xf32, #tpu.memory_space<vmem>>, %arg2: memref<2x4x256xf32, #tpu.memory_space<vmem>>, %arg3: memref<2x4x256xf32, #tpu.memory_space<vmem>>, %arg4: memref<3x3x8x4xf32, #tpu.memory_space<vmem>>, %arg5: memref<2x8x256xf32, #tpu.memory_space<vmem>>, %arg6: memref<4x512xf32, #tpu.memory_space<vmem>>) attributes {dimension_semantics = [#tpu.dimension_semantics<parallel>], iteration_bounds = array<i64: 3>, scalar_prefetch = 0 : i64, scratch_operands = 1 : i64, tpu.core_type = #tpu.core_type<tc>, window_params = [{pipeline_mode = #tpu.pipeline_mode<synchronous>, transform_indices = @transform_0, window_bounds = array<i64: 2, 4, 256>}, {pipeline_mode = #tpu.pipeline_mode<synchronous>, transform_indices = @transform_1, window_bounds = array<i64: 2, 4, 256>}, {pipeline_mode = #tpu.pipeline_mode<synchronous>, transform_indices = @transform_2, window_bounds = array<i64: 2, 4, 256>}, {pipeline_mode = #tpu.pipeline_mode<synchronous>, transform_indices = @transform_3, window_bounds = array<i64: 3, 3, 8, 4>}, {transform_indices = @transform_4, window_bounds = array<i64: 2, 8, 256>}]} {
    %cst = arith.constant 0.000000e+00 : f32
    %0 = vector.broadcast %cst : f32 to vector<4x128xf32>
    %c0 = arith.constant 0 : index
    %c0_0 = arith.constant 0 : index
    %1 = vector.load %arg6[%c0, %c0_0] : memref<4x512xf32, #tpu.memory_space<vmem>>, vector<4x128xf32>
    tpu.vector_store %arg6[%c0, %c0_0], %0 {strides = array<i32>} : memref<4x512xf32, #tpu.memory_space<vmem>>, vector<4x128xf32>,
    %c0_1 = arith.constant 0 : index
    %c384 = arith.constant 384 : index
    %2 = vector.load %arg6[%c0_1, %c384] : memref<4x512xf32, #tpu.memory_space<vmem>>, vector<4x128xf32>
    tpu.vector_store %arg6[%c0_1, %c384], %0 {strides = array<i32>} : memref<4x512xf32, #tpu.memory_space<vmem>>, vector<4x128xf32>,
    %3 = tpu.iota {dimensions = array<i32: 1>} : vector<4x256xi32>
    %c16_i32 = arith.constant 16 : i32
    %c0_i32 = arith.constant 0 : i32
    %4 = arith.cmpi eq, %c16_i32, %c0_i32 : i32
    %c1_i32 = arith.constant 1 : i32
    %5 = arith.select %4, %c1_i32, %c16_i32 : i32
    %6 = vector.broadcast %5 : i32 to vector<4x256xi32>
    %7 = arith.remsi %3, %6 : vector<4x256xi32>
    %c0_i32_2 = arith.constant 0 : i32
    %8 = vector.broadcast %c0_i32_2 : i32 to vector<4x256xi32>
    %9 = arith.cmpi ne, %7, %8 : vector<4x256xi32>
    %c0_i32_3 = arith.constant 0 : i32
    %10 = vector.broadcast %c0_i32_3 : i32 to vector<4x256xi32>
    %11 = arith.cmpi slt, %7, %10 : vector<4x256xi32>
    %c0_i32_4 = arith.constant 0 : i32
    %12 = arith.cmpi slt, %5, %c0_i32_4 : i32
    %13 = vector.broadcast %12 : i1 to vector<4x256xi1>
    %14 = vector.broadcast %13 : vector<4x256xi1> to vector<4x256xi1>
    %15 = arith.xori %11, %14 : vector<4x256xi1>
    %16 = arith.andi %15, %9 : vector<4x256xi1>
    %17 = vector.broadcast %5 : i32 to vector<4x256xi32>
    %18 = arith.addi %7, %17 : vector<4x256xi32>
    %19 = arith.select %16, %18, %7 : vector<4x256xi1>, vector<4x256xi32>
    %c0_i32_5 = arith.constant 0 : i32
    %20 = arith.cmpi eq, %arg0, %c0_i32_5 : i32
    %21 = arith.extui %20 : i1 to i32
    %c0_i32_6 = arith.constant 0 : i32
    %22 = arith.cmpi ne, %21, %c0_i32_6 : i32
    scf.if %22 {
      %c0_10 = arith.constant 0 : index
      %c0_11 = arith.constant 0 : index
      %c0_12 = arith.constant 0 : index
      %29 = vector.load %arg1[%c0_10, %c0_11, %c0_12] : memref<2x4x256xf32, #tpu.memory_space<vmem>>, vector<1x4x256xf32>
      %30 = vector.shape_cast %29 : vector<1x4x256xf32> to vector<4x256xf32>
      %c0_13 = arith.constant 0 : index
      %c128 = arith.constant 128 : index
      %31 = vector.load %arg6[%c0_13, %c128] : memref<4x512xf32, #tpu.memory_space<vmem>>, vector<4x256xf32>
      tpu.vector_store %arg6[%c0_13, %c128], %30 {strides = array<i32>} : memref<4x512xf32, #tpu.memory_space<vmem>>, vector<4x256xf32>,
      %cst_14 = arith.constant 0.000000e+00 : f32
      %32 = vector.broadcast %cst_14 : f32 to vector<8x256xf32>
      %c0_15 = arith.constant 0 : index
      %c111 = arith.constant 111 : index
      %33 = vector.load %arg6[%c0_15, %c111] : memref<4x512xf32, #tpu.memory_space<vmem>>, vector<4x256xf32>
      %c1_i32_16 = arith.constant 1 : i32
      %34 = vector.broadcast %c1_i32_16 : i32 to vector<4x256xi32>
      %35 = arith.cmpi sge, %19, %34 : vector<4x256xi32>
      %cst_17 = arith.constant 0.000000e+00 : f32
      %36 = vector.broadcast %cst_17 : f32 to vector<4x256xf32>
      %37 = arith.select %35, %33, %36 : vector<4x256xi1>, vector<4x256xf32>
      %c0_18 = arith.constant 0 : index
      %c0_19 = arith.constant 0 : index
      %c0_20 = arith.constant 0 : index
      %c0_21 = arith.constant 0 : index
      %38 = vector.load %arg4[%c0_18, %c0_19, %c0_20, %c0_21] : memref<3x3x8x4xf32, #tpu.memory_space<vmem>>, vector<1x1x8x4xf32>
      %39 = vector.shape_cast %38 : vector<1x1x8x4xf32> to vector<8x4xf32>
      %cst_22 = arith.constant dense<0.000000e+00> : vector<8x256xf32>
      %40 = tpu.matmul %39, %37, %cst_22 {dimension_numbers = #tpu.dot_dimension_numbers<[1], [0], [0], [1], [0, 0, 1, 1], [], []>} : vector<8x4xf32>, vector<4x256xf32>, vector<8x256xf32> -> vector<8x256xf32>
      %41 = arith.addf %32, %40 : vector<8x256xf32>
      %c0_23 = arith.constant 0 : index
      %c112 = arith.constant 112 : index
      %42 = vector.load %arg6[%c0_23, %c112] : memref<4x512xf32, #tpu.memory_space<vmem>>, vector<4x256xf32>
      %c0_24 = arith.constant 0 : index
      %c1 = arith.constant 1 : index
      %c0_25 = arith.constant 0 : index
      %c0_26 = arith.constant 0 : index
      %43 = vector.load %arg4[%c0_24, %c1, %c0_25, %c0_26] : memref<3x3x8x4xf32, #tpu.memory_space<vmem>>, vector<1x1x8x4xf32>
      %44 = vector.shape_cast %43 : vector<1x1x8x4xf32> to vector<8x4xf32>
      %cst_27 = arith.constant dense<0.000000e+00> : vector<8x256xf32>
      %45 = tpu.matmul %44, %42, %cst_27 {dimension_numbers = #tpu.dot_dimension_numbers<[1], [0], [0], [1], [0, 0, 1, 1], [], []>} : vector<8x4xf32>, vector<4x256xf32>, vector<8x256xf32> -> vector<8x256xf32>
      %46 = arith.addf %41, %45 : vector<8x256xf32>
      %c0_28 = arith.constant 0 : index
      %c113 = arith.constant 113 : index
      %47 = vector.load %arg6[%c0_28, %c113] : memref<4x512xf32, #tpu.memory_space<vmem>>, vector<4x256xf32>
      %c15_i32 = arith.constant 15 : i32
      %48 = vector.broadcast %c15_i32 : i32 to vector<4x256xi32>
      %49 = arith.cmpi slt, %19, %48 : vector<4x256xi32>
      %cst_29 = arith.constant 0.000000e+00 : f32
      %50 = vector.broadcast %cst_29 : f32 to vector<4x256xf32>
      %51 = arith.select %49, %47, %50 : vector<4x256xi1>, vector<4x256xf32>
      %c0_30 = arith.constant 0 : index
      %c2 = arith.constant 2 : index
      %c0_31 = arith.constant 0 : index
      %c0_32 = arith.constant 0 : index
      %52 = vector.load %arg4[%c0_30, %c2, %c0_31, %c0_32] : memref<3x3x8x4xf32, #tpu.memory_space<vmem>>, vector<1x1x8x4xf32>
      %53 = vector.shape_cast %52 : vector<1x1x8x4xf32> to vector<8x4xf32>
      %cst_33 = arith.constant dense<0.000000e+00> : vector<8x256xf32>
      %54 = tpu.matmul %53, %51, %cst_33 {dimension_numbers = #tpu.dot_dimension_numbers<[1], [0], [0], [1], [0, 0, 1, 1], [], []>} : vector<8x4xf32>, vector<4x256xf32>, vector<8x256xf32> -> vector<8x256xf32>
      %55 = arith.addf %46, %54 : vector<8x256xf32>
      %c0_34 = arith.constant 0 : index
      %c127 = arith.constant 127 : index
      %56 = vector.load %arg6[%c0_34, %c127] : memref<4x512xf32, #tpu.memory_space<vmem>>, vector<4x256xf32>
      %c1_i32_35 = arith.constant 1 : i32
      %57 = vector.broadcast %c1_i32_35 : i32 to vector<4x256xi32>
      %58 = arith.cmpi sge, %19, %57 : vector<4x256xi32>
      %cst_36 = arith.constant 0.000000e+00 : f32
      %59 = vector.broadcast %cst_36 : f32 to vector<4x256xf32>
      %60 = arith.select %58, %56, %59 : vector<4x256xi1>, vector<4x256xf32>
      %c1_37 = arith.constant 1 : index
      %c0_38 = arith.constant 0 : index
      %c0_39 = arith.constant 0 : index
      %c0_40 = arith.constant 0 : index
      %61 = vector.load %arg4[%c1_37, %c0_38, %c0_39, %c0_40] : memref<3x3x8x4xf32, #tpu.memory_space<vmem>>, vector<1x1x8x4xf32>
      %62 = vector.shape_cast %61 : vector<1x1x8x4xf32> to vector<8x4xf32>
      %cst_41 = arith.constant dense<0.000000e+00> : vector<8x256xf32>
      %63 = tpu.matmul %62, %60, %cst_41 {dimension_numbers = #tpu.dot_dimension_numbers<[1], [0], [0], [1], [0, 0, 1, 1], [], []>} : vector<8x4xf32>, vector<4x256xf32>, vector<8x256xf32> -> vector<8x256xf32>
      %64 = arith.addf %55, %63 : vector<8x256xf32>
      %c0_42 = arith.constant 0 : index
      %c128_43 = arith.constant 128 : index
      %65 = vector.load %arg6[%c0_42, %c128_43] : memref<4x512xf32, #tpu.memory_space<vmem>>, vector<4x256xf32>
      %c1_44 = arith.constant 1 : index
      %c1_45 = arith.constant 1 : index
      %c0_46 = arith.constant 0 : index
      %c0_47 = arith.constant 0 : index
      %66 = vector.load %arg4[%c1_44, %c1_45, %c0_46, %c0_47] : memref<3x3x8x4xf32, #tpu.memory_space<vmem>>, vector<1x1x8x4xf32>
      %67 = vector.shape_cast %66 : vector<1x1x8x4xf32> to vector<8x4xf32>
      %cst_48 = arith.constant dense<0.000000e+00> : vector<8x256xf32>
      %68 = tpu.matmul %67, %65, %cst_48 {dimension_numbers = #tpu.dot_dimension_numbers<[1], [0], [0], [1], [0, 0, 1, 1], [], []>} : vector<8x4xf32>, vector<4x256xf32>, vector<8x256xf32> -> vector<8x256xf32>
      %69 = arith.addf %64, %68 : vector<8x256xf32>
      %c0_49 = arith.constant 0 : index
      %c129 = arith.constant 129 : index
      %70 = vector.load %arg6[%c0_49, %c129] : memref<4x512xf32, #tpu.memory_space<vmem>>, vector<4x256xf32>
      %c15_i32_50 = arith.constant 15 : i32
      %71 = vector.broadcast %c15_i32_50 : i32 to vector<4x256xi32>
      %72 = arith.cmpi slt, %19, %71 : vector<4x256xi32>
      %cst_51 = arith.constant 0.000000e+00 : f32
      %73 = vector.broadcast %cst_51 : f32 to vector<4x256xf32>
      %74 = arith.select %72, %70, %73 : vector<4x256xi1>, vector<4x256xf32>
      %c1_52 = arith.constant 1 : index
      %c2_53 = arith.constant 2 : index
      %c0_54 = arith.constant 0 : index
      %c0_55 = arith.constant 0 : index
      %75 = vector.load %arg4[%c1_52, %c2_53, %c0_54, %c0_55] : memref<3x3x8x4xf32, #tpu.memory_space<vmem>>, vector<1x1x8x4xf32>
      %76 = vector.shape_cast %75 : vector<1x1x8x4xf32> to vector<8x4xf32>
      %cst_56 = arith.constant dense<0.000000e+00> : vector<8x256xf32>
      %77 = tpu.matmul %76, %74, %cst_56 {dimension_numbers = #tpu.dot_dimension_numbers<[1], [0], [0], [1], [0, 0, 1, 1], [], []>} : vector<8x4xf32>, vector<4x256xf32>, vector<8x256xf32> -> vector<8x256xf32>
      %78 = arith.addf %69, %77 : vector<8x256xf32>
      %c0_57 = arith.constant 0 : index
      %c143 = arith.constant 143 : index
      %79 = vector.load %arg6[%c0_57, %c143] : memref<4x512xf32, #tpu.memory_space<vmem>>, vector<4x256xf32>
      %c1_i32_58 = arith.constant 1 : i32
      %80 = vector.broadcast %c1_i32_58 : i32 to vector<4x256xi32>
      %81 = arith.cmpi sge, %19, %80 : vector<4x256xi32>
      %cst_59 = arith.constant 0.000000e+00 : f32
      %82 = vector.broadcast %cst_59 : f32 to vector<4x256xf32>
      %83 = arith.select %81, %79, %82 : vector<4x256xi1>, vector<4x256xf32>
      %c2_60 = arith.constant 2 : index
      %c0_61 = arith.constant 0 : index
      %c0_62 = arith.constant 0 : index
      %c0_63 = arith.constant 0 : index
      %84 = vector.load %arg4[%c2_60, %c0_61, %c0_62, %c0_63] : memref<3x3x8x4xf32, #tpu.memory_space<vmem>>, vector<1x1x8x4xf32>
      %85 = vector.shape_cast %84 : vector<1x1x8x4xf32> to vector<8x4xf32>
      %cst_64 = arith.constant dense<0.000000e+00> : vector<8x256xf32>
      %86 = tpu.matmul %85, %83, %cst_64 {dimension_numbers = #tpu.dot_dimension_numbers<[1], [0], [0], [1], [0, 0, 1, 1], [], []>} : vector<8x4xf32>, vector<4x256xf32>, vector<8x256xf32> -> vector<8x256xf32>
      %87 = arith.addf %78, %86 : vector<8x256xf32>
      %c0_65 = arith.constant 0 : index
      %c144 = arith.constant 144 : index
      %88 = vector.load %arg6[%c0_65, %c144] : memref<4x512xf32, #tpu.memory_space<vmem>>, vector<4x256xf32>
      %c2_66 = arith.constant 2 : index
      %c1_67 = arith.constant 1 : index
      %c0_68 = arith.constant 0 : index
      %c0_69 = arith.constant 0 : index
      %89 = vector.load %arg4[%c2_66, %c1_67, %c0_68, %c0_69] : memref<3x3x8x4xf32, #tpu.memory_space<vmem>>, vector<1x1x8x4xf32>
      %90 = vector.shape_cast %89 : vector<1x1x8x4xf32> to vector<8x4xf32>
      %cst_70 = arith.constant dense<0.000000e+00> : vector<8x256xf32>
      %91 = tpu.matmul %90, %88, %cst_70 {dimension_numbers = #tpu.dot_dimension_numbers<[1], [0], [0], [1], [0, 0, 1, 1], [], []>} : vector<8x4xf32>, vector<4x256xf32>, vector<8x256xf32> -> vector<8x256xf32>
      %92 = arith.addf %87, %91 : vector<8x256xf32>
      %c0_71 = arith.constant 0 : index
      %c145 = arith.constant 145 : index
      %93 = vector.load %arg6[%c0_71, %c145] : memref<4x512xf32, #tpu.memory_space<vmem>>, vector<4x256xf32>
      %c15_i32_72 = arith.constant 15 : i32
      %94 = vector.broadcast %c15_i32_72 : i32 to vector<4x256xi32>
      %95 = arith.cmpi slt, %19, %94 : vector<4x256xi32>
      %cst_73 = arith.constant 0.000000e+00 : f32
      %96 = vector.broadcast %cst_73 : f32 to vector<4x256xf32>
      %97 = arith.select %95, %93, %96 : vector<4x256xi1>, vector<4x256xf32>
      %c2_74 = arith.constant 2 : index
      %c2_75 = arith.constant 2 : index
      %c0_76 = arith.constant 0 : index
      %c0_77 = arith.constant 0 : index
      %98 = vector.load %arg4[%c2_74, %c2_75, %c0_76, %c0_77] : memref<3x3x8x4xf32, #tpu.memory_space<vmem>>, vector<1x1x8x4xf32>
      %99 = vector.shape_cast %98 : vector<1x1x8x4xf32> to vector<8x4xf32>
      %cst_78 = arith.constant dense<0.000000e+00> : vector<8x256xf32>
      %100 = tpu.matmul %99, %97, %cst_78 {dimension_numbers = #tpu.dot_dimension_numbers<[1], [0], [0], [1], [0, 0, 1, 1], [], []>} : vector<8x4xf32>, vector<4x256xf32>, vector<8x256xf32> -> vector<8x256xf32>
      %101 = arith.addf %92, %100 : vector<8x256xf32>
      %c0_79 = arith.constant 0 : index
      %c0_80 = arith.constant 0 : index
      %c0_81 = arith.constant 0 : index
      %102 = vector.load %arg5[%c0_79, %c0_80, %c0_81] : memref<2x8x256xf32, #tpu.memory_space<vmem>>, vector<1x8x256xf32>
      %103 = vector.shape_cast %102 : vector<1x8x256xf32> to vector<8x256xf32>
      %104 = vector.shape_cast %101 : vector<8x256xf32> to vector<1x8x256xf32>
      tpu.vector_store %arg5[%c0_79, %c0_80, %c0_81], %104 {strides = array<i32>} : memref<2x8x256xf32, #tpu.memory_space<vmem>>, vector<1x8x256xf32>,
      %c1_82 = arith.constant 1 : index
      %c0_83 = arith.constant 0 : index
      %c0_84 = arith.constant 0 : index
      %105 = vector.load %arg1[%c1_82, %c0_83, %c0_84] : memref<2x4x256xf32, #tpu.memory_space<vmem>>, vector<1x4x256xf32>
      %106 = vector.shape_cast %105 : vector<1x4x256xf32> to vector<4x256xf32>
      %c0_85 = arith.constant 0 : index
      %c128_86 = arith.constant 128 : index
      %107 = vector.load %arg6[%c0_85, %c128_86] : memref<4x512xf32, #tpu.memory_space<vmem>>, vector<4x256xf32>
      tpu.vector_store %arg6[%c0_85, %c128_86], %106 {strides = array<i32>} : memref<4x512xf32, #tpu.memory_space<vmem>>, vector<4x256xf32>,
      %cst_87 = arith.constant 0.000000e+00 : f32
      %108 = vector.broadcast %cst_87 : f32 to vector<8x256xf32>
      %c0_88 = arith.constant 0 : index
      %c111_89 = arith.constant 111 : index
      %109 = vector.load %arg6[%c0_88, %c111_89] : memref<4x512xf32, #tpu.memory_space<vmem>>, vector<4x256xf32>
      %c1_i32_90 = arith.constant 1 : i32
      %110 = vector.broadcast %c1_i32_90 : i32 to vector<4x256xi32>
      %111 = arith.cmpi sge, %19, %110 : vector<4x256xi32>
      %cst_91 = arith.constant 0.000000e+00 : f32
      %112 = vector.broadcast %cst_91 : f32 to vector<4x256xf32>
      %113 = arith.select %111, %109, %112 : vector<4x256xi1>, vector<4x256xf32>
      %c0_92 = arith.constant 0 : index
      %c0_93 = arith.constant 0 : index
      %c0_94 = arith.constant 0 : index
      %c0_95 = arith.constant 0 : index
      %114 = vector.load %arg4[%c0_92, %c0_93, %c0_94, %c0_95] : memref<3x3x8x4xf32, #tpu.memory_space<vmem>>, vector<1x1x8x4xf32>
      %115 = vector.shape_cast %114 : vector<1x1x8x4xf32> to vector<8x4xf32>
      %cst_96 = arith.constant dense<0.000000e+00> : vector<8x256xf32>
      %116 = tpu.matmul %115, %113, %cst_96 {dimension_numbers = #tpu.dot_dimension_numbers<[1], [0], [0], [1], [0, 0, 1, 1], [], []>} : vector<8x4xf32>, vector<4x256xf32>, vector<8x256xf32> -> vector<8x256xf32>
      %117 = arith.addf %108, %116 : vector<8x256xf32>
      %c0_97 = arith.constant 0 : index
      %c112_98 = arith.constant 112 : index
      %118 = vector.load %arg6[%c0_97, %c112_98] : memref<4x512xf32, #tpu.memory_space<vmem>>, vector<4x256xf32>
      %c0_99 = arith.constant 0 : index
      %c1_100 = arith.constant 1 : index
      %c0_101 = arith.constant 0 : index
      %c0_102 = arith.constant 0 : index
      %119 = vector.load %arg4[%c0_99, %c1_100, %c0_101, %c0_102] : memref<3x3x8x4xf32, #tpu.memory_space<vmem>>, vector<1x1x8x4xf32>
      %120 = vector.shape_cast %119 : vector<1x1x8x4xf32> to vector<8x4xf32>
      %cst_103 = arith.constant dense<0.000000e+00> : vector<8x256xf32>
      %121 = tpu.matmul %120, %118, %cst_103 {dimension_numbers = #tpu.dot_dimension_numbers<[1], [0], [0], [1], [0, 0, 1, 1], [], []>} : vector<8x4xf32>, vector<4x256xf32>, vector<8x256xf32> -> vector<8x256xf32>
      %122 = arith.addf %117, %121 : vector<8x256xf32>
      %c0_104 = arith.constant 0 : index
      %c113_105 = arith.constant 113 : index
      %123 = vector.load %arg6[%c0_104, %c113_105] : memref<4x512xf32, #tpu.memory_space<vmem>>, vector<4x256xf32>
      %c15_i32_106 = arith.constant 15 : i32
      %124 = vector.broadcast %c15_i32_106 : i32 to vector<4x256xi32>
      %125 = arith.cmpi slt, %19, %124 : vector<4x256xi32>
      %cst_107 = arith.constant 0.000000e+00 : f32
      %126 = vector.broadcast %cst_107 : f32 to vector<4x256xf32>
      %127 = arith.select %125, %123, %126 : vector<4x256xi1>, vector<4x256xf32>
      %c0_108 = arith.constant 0 : index
      %c2_109 = arith.constant 2 : index
      %c0_110 = arith.constant 0 : index
      %c0_111 = arith.constant 0 : index
      %128 = vector.load %arg4[%c0_108, %c2_109, %c0_110, %c0_111] : memref<3x3x8x4xf32, #tpu.memory_space<vmem>>, vector<1x1x8x4xf32>
      %129 = vector.shape_cast %128 : vector<1x1x8x4xf32> to vector<8x4xf32>
      %cst_112 = arith.constant dense<0.000000e+00> : vector<8x256xf32>
      %130 = tpu.matmul %129, %127, %cst_112 {dimension_numbers = #tpu.dot_dimension_numbers<[1], [0], [0], [1], [0, 0, 1, 1], [], []>} : vector<8x4xf32>, vector<4x256xf32>, vector<8x256xf32> -> vector<8x256xf32>
      %131 = arith.addf %122, %130 : vector<8x256xf32>
      %c0_113 = arith.constant 0 : index
      %c127_114 = arith.constant 127 : index
      %132 = vector.load %arg6[%c0_113, %c127_114] : memref<4x512xf32, #tpu.memory_space<vmem>>, vector<4x256xf32>
      %c1_i32_115 = arith.constant 1 : i32
      %133 = vector.broadcast %c1_i32_115 : i32 to vector<4x256xi32>
      %134 = arith.cmpi sge, %19, %133 : vector<4x256xi32>
      %cst_116 = arith.constant 0.000000e+00 : f32
      %135 = vector.broadcast %cst_116 : f32 to vector<4x256xf32>
      %136 = arith.select %134, %132, %135 : vector<4x256xi1>, vector<4x256xf32>
      %c1_117 = arith.constant 1 : index
      %c0_118 = arith.constant 0 : index
      %c0_119 = arith.constant 0 : index
      %c0_120 = arith.constant 0 : index
      %137 = vector.load %arg4[%c1_117, %c0_118, %c0_119, %c0_120] : memref<3x3x8x4xf32, #tpu.memory_space<vmem>>, vector<1x1x8x4xf32>
      %138 = vector.shape_cast %137 : vector<1x1x8x4xf32> to vector<8x4xf32>
      %cst_121 = arith.constant dense<0.000000e+00> : vector<8x256xf32>
      %139 = tpu.matmul %138, %136, %cst_121 {dimension_numbers = #tpu.dot_dimension_numbers<[1], [0], [0], [1], [0, 0, 1, 1], [], []>} : vector<8x4xf32>, vector<4x256xf32>, vector<8x256xf32> -> vector<8x256xf32>
      %140 = arith.addf %131, %139 : vector<8x256xf32>
      %c0_122 = arith.constant 0 : index
      %c128_123 = arith.constant 128 : index
      %141 = vector.load %arg6[%c0_122, %c128_123] : memref<4x512xf32, #tpu.memory_space<vmem>>, vector<4x256xf32>
      %c1_124 = arith.constant 1 : index
      %c1_125 = arith.constant 1 : index
      %c0_126 = arith.constant 0 : index
      %c0_127 = arith.constant 0 : index
      %142 = vector.load %arg4[%c1_124, %c1_125, %c0_126, %c0_127] : memref<3x3x8x4xf32, #tpu.memory_space<vmem>>, vector<1x1x8x4xf32>
      %143 = vector.shape_cast %142 : vector<1x1x8x4xf32> to vector<8x4xf32>
      %cst_128 = arith.constant dense<0.000000e+00> : vector<8x256xf32>
      %144 = tpu.matmul %143, %141, %cst_128 {dimension_numbers = #tpu.dot_dimension_numbers<[1], [0], [0], [1], [0, 0, 1, 1], [], []>} : vector<8x4xf32>, vector<4x256xf32>, vector<8x256xf32> -> vector<8x256xf32>
      %145 = arith.addf %140, %144 : vector<8x256xf32>
      %c0_129 = arith.constant 0 : index
      %c129_130 = arith.constant 129 : index
      %146 = vector.load %arg6[%c0_129, %c129_130] : memref<4x512xf32, #tpu.memory_space<vmem>>, vector<4x256xf32>
      %c15_i32_131 = arith.constant 15 : i32
      %147 = vector.broadcast %c15_i32_131 : i32 to vector<4x256xi32>
      %148 = arith.cmpi slt, %19, %147 : vector<4x256xi32>
      %cst_132 = arith.constant 0.000000e+00 : f32
      %149 = vector.broadcast %cst_132 : f32 to vector<4x256xf32>
      %150 = arith.select %148, %146, %149 : vector<4x256xi1>, vector<4x256xf32>
      %c1_133 = arith.constant 1 : index
      %c2_134 = arith.constant 2 : index
      %c0_135 = arith.constant 0 : index
      %c0_136 = arith.constant 0 : index
      %151 = vector.load %arg4[%c1_133, %c2_134, %c0_135, %c0_136] : memref<3x3x8x4xf32, #tpu.memory_space<vmem>>, vector<1x1x8x4xf32>
      %152 = vector.shape_cast %151 : vector<1x1x8x4xf32> to vector<8x4xf32>
      %cst_137 = arith.constant dense<0.000000e+00> : vector<8x256xf32>
      %153 = tpu.matmul %152, %150, %cst_137 {dimension_numbers = #tpu.dot_dimension_numbers<[1], [0], [0], [1], [0, 0, 1, 1], [], []>} : vector<8x4xf32>, vector<4x256xf32>, vector<8x256xf32> -> vector<8x256xf32>
      %154 = arith.addf %145, %153 : vector<8x256xf32>
      %c0_138 = arith.constant 0 : index
      %c143_139 = arith.constant 143 : index
      %155 = vector.load %arg6[%c0_138, %c143_139] : memref<4x512xf32, #tpu.memory_space<vmem>>, vector<4x256xf32>
      %c1_i32_140 = arith.constant 1 : i32
      %156 = vector.broadcast %c1_i32_140 : i32 to vector<4x256xi32>
      %157 = arith.cmpi sge, %19, %156 : vector<4x256xi32>
      %cst_141 = arith.constant 0.000000e+00 : f32
      %158 = vector.broadcast %cst_141 : f32 to vector<4x256xf32>
      %159 = arith.select %157, %155, %158 : vector<4x256xi1>, vector<4x256xf32>
      %c2_142 = arith.constant 2 : index
      %c0_143 = arith.constant 0 : index
      %c0_144 = arith.constant 0 : index
      %c0_145 = arith.constant 0 : index
      %160 = vector.load %arg4[%c2_142, %c0_143, %c0_144, %c0_145] : memref<3x3x8x4xf32, #tpu.memory_space<vmem>>, vector<1x1x8x4xf32>
      %161 = vector.shape_cast %160 : vector<1x1x8x4xf32> to vector<8x4xf32>
      %cst_146 = arith.constant dense<0.000000e+00> : vector<8x256xf32>
      %162 = tpu.matmul %161, %159, %cst_146 {dimension_numbers = #tpu.dot_dimension_numbers<[1], [0], [0], [1], [0, 0, 1, 1], [], []>} : vector<8x4xf32>, vector<4x256xf32>, vector<8x256xf32> -> vector<8x256xf32>
      %163 = arith.addf %154, %162 : vector<8x256xf32>
      %c0_147 = arith.constant 0 : index
      %c144_148 = arith.constant 144 : index
      %164 = vector.load %arg6[%c0_147, %c144_148] : memref<4x512xf32, #tpu.memory_space<vmem>>, vector<4x256xf32>
      %c2_149 = arith.constant 2 : index
      %c1_150 = arith.constant 1 : index
      %c0_151 = arith.constant 0 : index
      %c0_152 = arith.constant 0 : index
      %165 = vector.load %arg4[%c2_149, %c1_150, %c0_151, %c0_152] : memref<3x3x8x4xf32, #tpu.memory_space<vmem>>, vector<1x1x8x4xf32>
      %166 = vector.shape_cast %165 : vector<1x1x8x4xf32> to vector<8x4xf32>
      %cst_153 = arith.constant dense<0.000000e+00> : vector<8x256xf32>
      %167 = tpu.matmul %166, %164, %cst_153 {dimension_numbers = #tpu.dot_dimension_numbers<[1], [0], [0], [1], [0, 0, 1, 1], [], []>} : vector<8x4xf32>, vector<4x256xf32>, vector<8x256xf32> -> vector<8x256xf32>
      %168 = arith.addf %163, %167 : vector<8x256xf32>
      %c0_154 = arith.constant 0 : index
      %c145_155 = arith.constant 145 : index
      %169 = vector.load %arg6[%c0_154, %c145_155] : memref<4x512xf32, #tpu.memory_space<vmem>>, vector<4x256xf32>
      %c15_i32_156 = arith.constant 15 : i32
      %170 = vector.broadcast %c15_i32_156 : i32 to vector<4x256xi32>
      %171 = arith.cmpi slt, %19, %170 : vector<4x256xi32>
      %cst_157 = arith.constant 0.000000e+00 : f32
      %172 = vector.broadcast %cst_157 : f32 to vector<4x256xf32>
      %173 = arith.select %171, %169, %172 : vector<4x256xi1>, vector<4x256xf32>
      %c2_158 = arith.constant 2 : index
      %c2_159 = arith.constant 2 : index
      %c0_160 = arith.constant 0 : index
      %c0_161 = arith.constant 0 : index
      %174 = vector.load %arg4[%c2_158, %c2_159, %c0_160, %c0_161] : memref<3x3x8x4xf32, #tpu.memory_space<vmem>>, vector<1x1x8x4xf32>
      %175 = vector.shape_cast %174 : vector<1x1x8x4xf32> to vector<8x4xf32>
      %cst_162 = arith.constant dense<0.000000e+00> : vector<8x256xf32>
      %176 = tpu.matmul %175, %173, %cst_162 {dimension_numbers = #tpu.dot_dimension_numbers<[1], [0], [0], [1], [0, 0, 1, 1], [], []>} : vector<8x4xf32>, vector<4x256xf32>, vector<8x256xf32> -> vector<8x256xf32>
      %177 = arith.addf %168, %176 : vector<8x256xf32>
      %c1_163 = arith.constant 1 : index
      %c0_164 = arith.constant 0 : index
      %c0_165 = arith.constant 0 : index
      %178 = vector.load %arg5[%c1_163, %c0_164, %c0_165] : memref<2x8x256xf32, #tpu.memory_space<vmem>>, vector<1x8x256xf32>
      %179 = vector.shape_cast %178 : vector<1x8x256xf32> to vector<8x256xf32>
      %180 = vector.shape_cast %177 : vector<8x256xf32> to vector<1x8x256xf32>
      tpu.vector_store %arg5[%c1_163, %c0_164, %c0_165], %180 {strides = array<i32>} : memref<2x8x256xf32, #tpu.memory_space<vmem>>, vector<1x8x256xf32>,
    } else {
    }
    %c1_i32_7 = arith.constant 1 : i32
    %23 = arith.cmpi eq, %arg0, %c1_i32_7 : i32
    %24 = arith.extui %23 : i1 to i32
    %c0_i32_8 = arith.constant 0 : i32
    %25 = arith.cmpi ne, %24, %c0_i32_8 : i32
    scf.if %25 {
      %c0_10 = arith.constant 0 : index
      %c0_11 = arith.constant 0 : index
      %c0_12 = arith.constant 0 : index
      %29 = vector.load %arg2[%c0_10, %c0_11, %c0_12] : memref<2x4x256xf32, #tpu.memory_space<vmem>>, vector<1x4x256xf32>
      %30 = vector.shape_cast %29 : vector<1x4x256xf32> to vector<4x256xf32>
      %c0_13 = arith.constant 0 : index
      %c128 = arith.constant 128 : index
      %31 = vector.load %arg6[%c0_13, %c128] : memref<4x512xf32, #tpu.memory_space<vmem>>, vector<4x256xf32>
      tpu.vector_store %arg6[%c0_13, %c128], %30 {strides = array<i32>} : memref<4x512xf32, #tpu.memory_space<vmem>>, vector<4x256xf32>,
      %cst_14 = arith.constant 0.000000e+00 : f32
      %32 = vector.broadcast %cst_14 : f32 to vector<8x256xf32>
      %c0_15 = arith.constant 0 : index
      %c94 = arith.constant 94 : index
      %33 = vector.load %arg6[%c0_15, %c94] : memref<4x512xf32, #tpu.memory_space<vmem>>, vector<4x256xf32>
      %c2_i32_16 = arith.constant 2 : i32
      %34 = vector.broadcast %c2_i32_16 : i32 to vector<4x256xi32>
      %35 = arith.cmpi sge, %19, %34 : vector<4x256xi32>
      %cst_17 = arith.constant 0.000000e+00 : f32
      %36 = vector.broadcast %cst_17 : f32 to vector<4x256xf32>
      %37 = arith.select %35, %33, %36 : vector<4x256xi1>, vector<4x256xf32>
      %c0_18 = arith.constant 0 : index
      %c0_19 = arith.constant 0 : index
      %c0_20 = arith.constant 0 : index
      %c0_21 = arith.constant 0 : index
      %38 = vector.load %arg4[%c0_18, %c0_19, %c0_20, %c0_21] : memref<3x3x8x4xf32, #tpu.memory_space<vmem>>, vector<1x1x8x4xf32>
      %39 = vector.shape_cast %38 : vector<1x1x8x4xf32> to vector<8x4xf32>
      %cst_22 = arith.constant dense<0.000000e+00> : vector<8x256xf32>
      %40 = tpu.matmul %39, %37, %cst_22 {dimension_numbers = #tpu.dot_dimension_numbers<[1], [0], [0], [1], [0, 0, 1, 1], [], []>} : vector<8x4xf32>, vector<4x256xf32>, vector<8x256xf32> -> vector<8x256xf32>
      %41 = arith.addf %32, %40 : vector<8x256xf32>
      %c0_23 = arith.constant 0 : index
      %c96 = arith.constant 96 : index
      %42 = vector.load %arg6[%c0_23, %c96] : memref<4x512xf32, #tpu.memory_space<vmem>>, vector<4x256xf32>
      %c0_24 = arith.constant 0 : index
      %c1 = arith.constant 1 : index
      %c0_25 = arith.constant 0 : index
      %c0_26 = arith.constant 0 : index
      %43 = vector.load %arg4[%c0_24, %c1, %c0_25, %c0_26] : memref<3x3x8x4xf32, #tpu.memory_space<vmem>>, vector<1x1x8x4xf32>
      %44 = vector.shape_cast %43 : vector<1x1x8x4xf32> to vector<8x4xf32>
      %cst_27 = arith.constant dense<0.000000e+00> : vector<8x256xf32>
      %45 = tpu.matmul %44, %42, %cst_27 {dimension_numbers = #tpu.dot_dimension_numbers<[1], [0], [0], [1], [0, 0, 1, 1], [], []>} : vector<8x4xf32>, vector<4x256xf32>, vector<8x256xf32> -> vector<8x256xf32>
      %46 = arith.addf %41, %45 : vector<8x256xf32>
      %c0_28 = arith.constant 0 : index
      %c98 = arith.constant 98 : index
      %47 = vector.load %arg6[%c0_28, %c98] : memref<4x512xf32, #tpu.memory_space<vmem>>, vector<4x256xf32>
      %c14_i32 = arith.constant 14 : i32
      %48 = vector.broadcast %c14_i32 : i32 to vector<4x256xi32>
      %49 = arith.cmpi slt, %19, %48 : vector<4x256xi32>
      %cst_29 = arith.constant 0.000000e+00 : f32
      %50 = vector.broadcast %cst_29 : f32 to vector<4x256xf32>
      %51 = arith.select %49, %47, %50 : vector<4x256xi1>, vector<4x256xf32>
      %c0_30 = arith.constant 0 : index
      %c2 = arith.constant 2 : index
      %c0_31 = arith.constant 0 : index
      %c0_32 = arith.constant 0 : index
      %52 = vector.load %arg4[%c0_30, %c2, %c0_31, %c0_32] : memref<3x3x8x4xf32, #tpu.memory_space<vmem>>, vector<1x1x8x4xf32>
      %53 = vector.shape_cast %52 : vector<1x1x8x4xf32> to vector<8x4xf32>
      %cst_33 = arith.constant dense<0.000000e+00> : vector<8x256xf32>
      %54 = tpu.matmul %53, %51, %cst_33 {dimension_numbers = #tpu.dot_dimension_numbers<[1], [0], [0], [1], [0, 0, 1, 1], [], []>} : vector<8x4xf32>, vector<4x256xf32>, vector<8x256xf32> -> vector<8x256xf32>
      %55 = arith.addf %46, %54 : vector<8x256xf32>
      %c0_34 = arith.constant 0 : index
      %c126 = arith.constant 126 : index
      %56 = vector.load %arg6[%c0_34, %c126] : memref<4x512xf32, #tpu.memory_space<vmem>>, vector<4x256xf32>
      %c2_i32_35 = arith.constant 2 : i32
      %57 = vector.broadcast %c2_i32_35 : i32 to vector<4x256xi32>
      %58 = arith.cmpi sge, %19, %57 : vector<4x256xi32>
      %cst_36 = arith.constant 0.000000e+00 : f32
      %59 = vector.broadcast %cst_36 : f32 to vector<4x256xf32>
      %60 = arith.select %58, %56, %59 : vector<4x256xi1>, vector<4x256xf32>
      %c1_37 = arith.constant 1 : index
      %c0_38 = arith.constant 0 : index
      %c0_39 = arith.constant 0 : index
      %c0_40 = arith.constant 0 : index
      %61 = vector.load %arg4[%c1_37, %c0_38, %c0_39, %c0_40] : memref<3x3x8x4xf32, #tpu.memory_space<vmem>>, vector<1x1x8x4xf32>
      %62 = vector.shape_cast %61 : vector<1x1x8x4xf32> to vector<8x4xf32>
      %cst_41 = arith.constant dense<0.000000e+00> : vector<8x256xf32>
      %63 = tpu.matmul %62, %60, %cst_41 {dimension_numbers = #tpu.dot_dimension_numbers<[1], [0], [0], [1], [0, 0, 1, 1], [], []>} : vector<8x4xf32>, vector<4x256xf32>, vector<8x256xf32> -> vector<8x256xf32>
      %64 = arith.addf %55, %63 : vector<8x256xf32>
      %c0_42 = arith.constant 0 : index
      %c128_43 = arith.constant 128 : index
      %65 = vector.load %arg6[%c0_42, %c128_43] : memref<4x512xf32, #tpu.memory_space<vmem>>, vector<4x256xf32>
      %c1_44 = arith.constant 1 : index
      %c1_45 = arith.constant 1 : index
      %c0_46 = arith.constant 0 : index
      %c0_47 = arith.constant 0 : index
      %66 = vector.load %arg4[%c1_44, %c1_45, %c0_46, %c0_47] : memref<3x3x8x4xf32, #tpu.memory_space<vmem>>, vector<1x1x8x4xf32>
      %67 = vector.shape_cast %66 : vector<1x1x8x4xf32> to vector<8x4xf32>
      %cst_48 = arith.constant dense<0.000000e+00> : vector<8x256xf32>
      %68 = tpu.matmul %67, %65, %cst_48 {dimension_numbers = #tpu.dot_dimension_numbers<[1], [0], [0], [1], [0, 0, 1, 1], [], []>} : vector<8x4xf32>, vector<4x256xf32>, vector<8x256xf32> -> vector<8x256xf32>
      %69 = arith.addf %64, %68 : vector<8x256xf32>
      %c0_49 = arith.constant 0 : index
      %c130 = arith.constant 130 : index
      %70 = vector.load %arg6[%c0_49, %c130] : memref<4x512xf32, #tpu.memory_space<vmem>>, vector<4x256xf32>
      %c14_i32_50 = arith.constant 14 : i32
      %71 = vector.broadcast %c14_i32_50 : i32 to vector<4x256xi32>
      %72 = arith.cmpi slt, %19, %71 : vector<4x256xi32>
      %cst_51 = arith.constant 0.000000e+00 : f32
      %73 = vector.broadcast %cst_51 : f32 to vector<4x256xf32>
      %74 = arith.select %72, %70, %73 : vector<4x256xi1>, vector<4x256xf32>
      %c1_52 = arith.constant 1 : index
      %c2_53 = arith.constant 2 : index
      %c0_54 = arith.constant 0 : index
      %c0_55 = arith.constant 0 : index
      %75 = vector.load %arg4[%c1_52, %c2_53, %c0_54, %c0_55] : memref<3x3x8x4xf32, #tpu.memory_space<vmem>>, vector<1x1x8x4xf32>
      %76 = vector.shape_cast %75 : vector<1x1x8x4xf32> to vector<8x4xf32>
      %cst_56 = arith.constant dense<0.000000e+00> : vector<8x256xf32>
      %77 = tpu.matmul %76, %74, %cst_56 {dimension_numbers = #tpu.dot_dimension_numbers<[1], [0], [0], [1], [0, 0, 1, 1], [], []>} : vector<8x4xf32>, vector<4x256xf32>, vector<8x256xf32> -> vector<8x256xf32>
      %78 = arith.addf %69, %77 : vector<8x256xf32>
      %c0_57 = arith.constant 0 : index
      %c158 = arith.constant 158 : index
      %79 = vector.load %arg6[%c0_57, %c158] : memref<4x512xf32, #tpu.memory_space<vmem>>, vector<4x256xf32>
      %c2_i32_58 = arith.constant 2 : i32
      %80 = vector.broadcast %c2_i32_58 : i32 to vector<4x256xi32>
      %81 = arith.cmpi sge, %19, %80 : vector<4x256xi32>
      %cst_59 = arith.constant 0.000000e+00 : f32
      %82 = vector.broadcast %cst_59 : f32 to vector<4x256xf32>
      %83 = arith.select %81, %79, %82 : vector<4x256xi1>, vector<4x256xf32>
      %c2_60 = arith.constant 2 : index
      %c0_61 = arith.constant 0 : index
      %c0_62 = arith.constant 0 : index
      %c0_63 = arith.constant 0 : index
      %84 = vector.load %arg4[%c2_60, %c0_61, %c0_62, %c0_63] : memref<3x3x8x4xf32, #tpu.memory_space<vmem>>, vector<1x1x8x4xf32>
      %85 = vector.shape_cast %84 : vector<1x1x8x4xf32> to vector<8x4xf32>
      %cst_64 = arith.constant dense<0.000000e+00> : vector<8x256xf32>
      %86 = tpu.matmul %85, %83, %cst_64 {dimension_numbers = #tpu.dot_dimension_numbers<[1], [0], [0], [1], [0, 0, 1, 1], [], []>} : vector<8x4xf32>, vector<4x256xf32>, vector<8x256xf32> -> vector<8x256xf32>
      %87 = arith.addf %78, %86 : vector<8x256xf32>
      %c0_65 = arith.constant 0 : index
      %c160 = arith.constant 160 : index
      %88 = vector.load %arg6[%c0_65, %c160] : memref<4x512xf32, #tpu.memory_space<vmem>>, vector<4x256xf32>
      %c2_66 = arith.constant 2 : index
      %c1_67 = arith.constant 1 : index
      %c0_68 = arith.constant 0 : index
      %c0_69 = arith.constant 0 : index
      %89 = vector.load %arg4[%c2_66, %c1_67, %c0_68, %c0_69] : memref<3x3x8x4xf32, #tpu.memory_space<vmem>>, vector<1x1x8x4xf32>
      %90 = vector.shape_cast %89 : vector<1x1x8x4xf32> to vector<8x4xf32>
      %cst_70 = arith.constant dense<0.000000e+00> : vector<8x256xf32>
      %91 = tpu.matmul %90, %88, %cst_70 {dimension_numbers = #tpu.dot_dimension_numbers<[1], [0], [0], [1], [0, 0, 1, 1], [], []>} : vector<8x4xf32>, vector<4x256xf32>, vector<8x256xf32> -> vector<8x256xf32>
      %92 = arith.addf %87, %91 : vector<8x256xf32>
      %c0_71 = arith.constant 0 : index
      %c162 = arith.constant 162 : index
      %93 = vector.load %arg6[%c0_71, %c162] : memref<4x512xf32, #tpu.memory_space<vmem>>, vector<4x256xf32>
      %c14_i32_72 = arith.constant 14 : i32
      %94 = vector.broadcast %c14_i32_72 : i32 to vector<4x256xi32>
      %95 = arith.cmpi slt, %19, %94 : vector<4x256xi32>
      %cst_73 = arith.constant 0.000000e+00 : f32
      %96 = vector.broadcast %cst_73 : f32 to vector<4x256xf32>
      %97 = arith.select %95, %93, %96 : vector<4x256xi1>, vector<4x256xf32>
      %c2_74 = arith.constant 2 : index
      %c2_75 = arith.constant 2 : index
      %c0_76 = arith.constant 0 : index
      %c0_77 = arith.constant 0 : index
      %98 = vector.load %arg4[%c2_74, %c2_75, %c0_76, %c0_77] : memref<3x3x8x4xf32, #tpu.memory_space<vmem>>, vector<1x1x8x4xf32>
      %99 = vector.shape_cast %98 : vector<1x1x8x4xf32> to vector<8x4xf32>
      %cst_78 = arith.constant dense<0.000000e+00> : vector<8x256xf32>
      %100 = tpu.matmul %99, %97, %cst_78 {dimension_numbers = #tpu.dot_dimension_numbers<[1], [0], [0], [1], [0, 0, 1, 1], [], []>} : vector<8x4xf32>, vector<4x256xf32>, vector<8x256xf32> -> vector<8x256xf32>
      %101 = arith.addf %92, %100 : vector<8x256xf32>
      %c0_79 = arith.constant 0 : index
      %c0_80 = arith.constant 0 : index
      %c0_81 = arith.constant 0 : index
      %102 = vector.load %arg5[%c0_79, %c0_80, %c0_81] : memref<2x8x256xf32, #tpu.memory_space<vmem>>, vector<1x8x256xf32>
      %103 = vector.shape_cast %102 : vector<1x8x256xf32> to vector<8x256xf32>
      %104 = vector.shape_cast %101 : vector<8x256xf32> to vector<1x8x256xf32>
      tpu.vector_store %arg5[%c0_79, %c0_80, %c0_81], %104 {strides = array<i32>} : memref<2x8x256xf32, #tpu.memory_space<vmem>>, vector<1x8x256xf32>,
      %c1_82 = arith.constant 1 : index
      %c0_83 = arith.constant 0 : index
      %c0_84 = arith.constant 0 : index
      %105 = vector.load %arg2[%c1_82, %c0_83, %c0_84] : memref<2x4x256xf32, #tpu.memory_space<vmem>>, vector<1x4x256xf32>
      %106 = vector.shape_cast %105 : vector<1x4x256xf32> to vector<4x256xf32>
      %c0_85 = arith.constant 0 : index
      %c128_86 = arith.constant 128 : index
      %107 = vector.load %arg6[%c0_85, %c128_86] : memref<4x512xf32, #tpu.memory_space<vmem>>, vector<4x256xf32>
      tpu.vector_store %arg6[%c0_85, %c128_86], %106 {strides = array<i32>} : memref<4x512xf32, #tpu.memory_space<vmem>>, vector<4x256xf32>,
      %cst_87 = arith.constant 0.000000e+00 : f32
      %108 = vector.broadcast %cst_87 : f32 to vector<8x256xf32>
      %c0_88 = arith.constant 0 : index
      %c94_89 = arith.constant 94 : index
      %109 = vector.load %arg6[%c0_88, %c94_89] : memref<4x512xf32, #tpu.memory_space<vmem>>, vector<4x256xf32>
      %c2_i32_90 = arith.constant 2 : i32
      %110 = vector.broadcast %c2_i32_90 : i32 to vector<4x256xi32>
      %111 = arith.cmpi sge, %19, %110 : vector<4x256xi32>
      %cst_91 = arith.constant 0.000000e+00 : f32
      %112 = vector.broadcast %cst_91 : f32 to vector<4x256xf32>
      %113 = arith.select %111, %109, %112 : vector<4x256xi1>, vector<4x256xf32>
      %c0_92 = arith.constant 0 : index
      %c0_93 = arith.constant 0 : index
      %c0_94 = arith.constant 0 : index
      %c0_95 = arith.constant 0 : index
      %114 = vector.load %arg4[%c0_92, %c0_93, %c0_94, %c0_95] : memref<3x3x8x4xf32, #tpu.memory_space<vmem>>, vector<1x1x8x4xf32>
      %115 = vector.shape_cast %114 : vector<1x1x8x4xf32> to vector<8x4xf32>
      %cst_96 = arith.constant dense<0.000000e+00> : vector<8x256xf32>
      %116 = tpu.matmul %115, %113, %cst_96 {dimension_numbers = #tpu.dot_dimension_numbers<[1], [0], [0], [1], [0, 0, 1, 1], [], []>} : vector<8x4xf32>, vector<4x256xf32>, vector<8x256xf32> -> vector<8x256xf32>
      %117 = arith.addf %108, %116 : vector<8x256xf32>
      %c0_97 = arith.constant 0 : index
      %c96_98 = arith.constant 96 : index
      %118 = vector.load %arg6[%c0_97, %c96_98] : memref<4x512xf32, #tpu.memory_space<vmem>>, vector<4x256xf32>
      %c0_99 = arith.constant 0 : index
      %c1_100 = arith.constant 1 : index
      %c0_101 = arith.constant 0 : index
      %c0_102 = arith.constant 0 : index
      %119 = vector.load %arg4[%c0_99, %c1_100, %c0_101, %c0_102] : memref<3x3x8x4xf32, #tpu.memory_space<vmem>>, vector<1x1x8x4xf32>
      %120 = vector.shape_cast %119 : vector<1x1x8x4xf32> to vector<8x4xf32>
      %cst_103 = arith.constant dense<0.000000e+00> : vector<8x256xf32>
      %121 = tpu.matmul %120, %118, %cst_103 {dimension_numbers = #tpu.dot_dimension_numbers<[1], [0], [0], [1], [0, 0, 1, 1], [], []>} : vector<8x4xf32>, vector<4x256xf32>, vector<8x256xf32> -> vector<8x256xf32>
      %122 = arith.addf %117, %121 : vector<8x256xf32>
      %c0_104 = arith.constant 0 : index
      %c98_105 = arith.constant 98 : index
      %123 = vector.load %arg6[%c0_104, %c98_105] : memref<4x512xf32, #tpu.memory_space<vmem>>, vector<4x256xf32>
      %c14_i32_106 = arith.constant 14 : i32
      %124 = vector.broadcast %c14_i32_106 : i32 to vector<4x256xi32>
      %125 = arith.cmpi slt, %19, %124 : vector<4x256xi32>
      %cst_107 = arith.constant 0.000000e+00 : f32
      %126 = vector.broadcast %cst_107 : f32 to vector<4x256xf32>
      %127 = arith.select %125, %123, %126 : vector<4x256xi1>, vector<4x256xf32>
      %c0_108 = arith.constant 0 : index
      %c2_109 = arith.constant 2 : index
      %c0_110 = arith.constant 0 : index
      %c0_111 = arith.constant 0 : index
      %128 = vector.load %arg4[%c0_108, %c2_109, %c0_110, %c0_111] : memref<3x3x8x4xf32, #tpu.memory_space<vmem>>, vector<1x1x8x4xf32>
      %129 = vector.shape_cast %128 : vector<1x1x8x4xf32> to vector<8x4xf32>
      %cst_112 = arith.constant dense<0.000000e+00> : vector<8x256xf32>
      %130 = tpu.matmul %129, %127, %cst_112 {dimension_numbers = #tpu.dot_dimension_numbers<[1], [0], [0], [1], [0, 0, 1, 1], [], []>} : vector<8x4xf32>, vector<4x256xf32>, vector<8x256xf32> -> vector<8x256xf32>
      %131 = arith.addf %122, %130 : vector<8x256xf32>
      %c0_113 = arith.constant 0 : index
      %c126_114 = arith.constant 126 : index
      %132 = vector.load %arg6[%c0_113, %c126_114] : memref<4x512xf32, #tpu.memory_space<vmem>>, vector<4x256xf32>
      %c2_i32_115 = arith.constant 2 : i32
      %133 = vector.broadcast %c2_i32_115 : i32 to vector<4x256xi32>
      %134 = arith.cmpi sge, %19, %133 : vector<4x256xi32>
      %cst_116 = arith.constant 0.000000e+00 : f32
      %135 = vector.broadcast %cst_116 : f32 to vector<4x256xf32>
      %136 = arith.select %134, %132, %135 : vector<4x256xi1>, vector<4x256xf32>
      %c1_117 = arith.constant 1 : index
      %c0_118 = arith.constant 0 : index
      %c0_119 = arith.constant 0 : index
      %c0_120 = arith.constant 0 : index
      %137 = vector.load %arg4[%c1_117, %c0_118, %c0_119, %c0_120] : memref<3x3x8x4xf32, #tpu.memory_space<vmem>>, vector<1x1x8x4xf32>
      %138 = vector.shape_cast %137 : vector<1x1x8x4xf32> to vector<8x4xf32>
      %cst_121 = arith.constant dense<0.000000e+00> : vector<8x256xf32>
      %139 = tpu.matmul %138, %136, %cst_121 {dimension_numbers = #tpu.dot_dimension_numbers<[1], [0], [0], [1], [0, 0, 1, 1], [], []>} : vector<8x4xf32>, vector<4x256xf32>, vector<8x256xf32> -> vector<8x256xf32>
      %140 = arith.addf %131, %139 : vector<8x256xf32>
      %c0_122 = arith.constant 0 : index
      %c128_123 = arith.constant 128 : index
      %141 = vector.load %arg6[%c0_122, %c128_123] : memref<4x512xf32, #tpu.memory_space<vmem>>, vector<4x256xf32>
      %c1_124 = arith.constant 1 : index
      %c1_125 = arith.constant 1 : index
      %c0_126 = arith.constant 0 : index
      %c0_127 = arith.constant 0 : index
      %142 = vector.load %arg4[%c1_124, %c1_125, %c0_126, %c0_127] : memref<3x3x8x4xf32, #tpu.memory_space<vmem>>, vector<1x1x8x4xf32>
      %143 = vector.shape_cast %142 : vector<1x1x8x4xf32> to vector<8x4xf32>
      %cst_128 = arith.constant dense<0.000000e+00> : vector<8x256xf32>
      %144 = tpu.matmul %143, %141, %cst_128 {dimension_numbers = #tpu.dot_dimension_numbers<[1], [0], [0], [1], [0, 0, 1, 1], [], []>} : vector<8x4xf32>, vector<4x256xf32>, vector<8x256xf32> -> vector<8x256xf32>
      %145 = arith.addf %140, %144 : vector<8x256xf32>
      %c0_129 = arith.constant 0 : index
      %c130_130 = arith.constant 130 : index
      %146 = vector.load %arg6[%c0_129, %c130_130] : memref<4x512xf32, #tpu.memory_space<vmem>>, vector<4x256xf32>
      %c14_i32_131 = arith.constant 14 : i32
      %147 = vector.broadcast %c14_i32_131 : i32 to vector<4x256xi32>
      %148 = arith.cmpi slt, %19, %147 : vector<4x256xi32>
      %cst_132 = arith.constant 0.000000e+00 : f32
      %149 = vector.broadcast %cst_132 : f32 to vector<4x256xf32>
      %150 = arith.select %148, %146, %149 : vector<4x256xi1>, vector<4x256xf32>
      %c1_133 = arith.constant 1 : index
      %c2_134 = arith.constant 2 : index
      %c0_135 = arith.constant 0 : index
      %c0_136 = arith.constant 0 : index
      %151 = vector.load %arg4[%c1_133, %c2_134, %c0_135, %c0_136] : memref<3x3x8x4xf32, #tpu.memory_space<vmem>>, vector<1x1x8x4xf32>
      %152 = vector.shape_cast %151 : vector<1x1x8x4xf32> to vector<8x4xf32>
      %cst_137 = arith.constant dense<0.000000e+00> : vector<8x256xf32>
      %153 = tpu.matmul %152, %150, %cst_137 {dimension_numbers = #tpu.dot_dimension_numbers<[1], [0], [0], [1], [0, 0, 1, 1], [], []>} : vector<8x4xf32>, vector<4x256xf32>, vector<8x256xf32> -> vector<8x256xf32>
      %154 = arith.addf %145, %153 : vector<8x256xf32>
      %c0_138 = arith.constant 0 : index
      %c158_139 = arith.constant 158 : index
      %155 = vector.load %arg6[%c0_138, %c158_139] : memref<4x512xf32, #tpu.memory_space<vmem>>, vector<4x256xf32>
      %c2_i32_140 = arith.constant 2 : i32
      %156 = vector.broadcast %c2_i32_140 : i32 to vector<4x256xi32>
      %157 = arith.cmpi sge, %19, %156 : vector<4x256xi32>
      %cst_141 = arith.constant 0.000000e+00 : f32
      %158 = vector.broadcast %cst_141 : f32 to vector<4x256xf32>
      %159 = arith.select %157, %155, %158 : vector<4x256xi1>, vector<4x256xf32>
      %c2_142 = arith.constant 2 : index
      %c0_143 = arith.constant 0 : index
      %c0_144 = arith.constant 0 : index
      %c0_145 = arith.constant 0 : index
      %160 = vector.load %arg4[%c2_142, %c0_143, %c0_144, %c0_145] : memref<3x3x8x4xf32, #tpu.memory_space<vmem>>, vector<1x1x8x4xf32>
      %161 = vector.shape_cast %160 : vector<1x1x8x4xf32> to vector<8x4xf32>
      %cst_146 = arith.constant dense<0.000000e+00> : vector<8x256xf32>
      %162 = tpu.matmul %161, %159, %cst_146 {dimension_numbers = #tpu.dot_dimension_numbers<[1], [0], [0], [1], [0, 0, 1, 1], [], []>} : vector<8x4xf32>, vector<4x256xf32>, vector<8x256xf32> -> vector<8x256xf32>
      %163 = arith.addf %154, %162 : vector<8x256xf32>
      %c0_147 = arith.constant 0 : index
      %c160_148 = arith.constant 160 : index
      %164 = vector.load %arg6[%c0_147, %c160_148] : memref<4x512xf32, #tpu.memory_space<vmem>>, vector<4x256xf32>
      %c2_149 = arith.constant 2 : index
      %c1_150 = arith.constant 1 : index
      %c0_151 = arith.constant 0 : index
      %c0_152 = arith.constant 0 : index
      %165 = vector.load %arg4[%c2_149, %c1_150, %c0_151, %c0_152] : memref<3x3x8x4xf32, #tpu.memory_space<vmem>>, vector<1x1x8x4xf32>
      %166 = vector.shape_cast %165 : vector<1x1x8x4xf32> to vector<8x4xf32>
      %cst_153 = arith.constant dense<0.000000e+00> : vector<8x256xf32>
      %167 = tpu.matmul %166, %164, %cst_153 {dimension_numbers = #tpu.dot_dimension_numbers<[1], [0], [0], [1], [0, 0, 1, 1], [], []>} : vector<8x4xf32>, vector<4x256xf32>, vector<8x256xf32> -> vector<8x256xf32>
      %168 = arith.addf %163, %167 : vector<8x256xf32>
      %c0_154 = arith.constant 0 : index
      %c162_155 = arith.constant 162 : index
      %169 = vector.load %arg6[%c0_154, %c162_155] : memref<4x512xf32, #tpu.memory_space<vmem>>, vector<4x256xf32>
      %c14_i32_156 = arith.constant 14 : i32
      %170 = vector.broadcast %c14_i32_156 : i32 to vector<4x256xi32>
      %171 = arith.cmpi slt, %19, %170 : vector<4x256xi32>
      %cst_157 = arith.constant 0.000000e+00 : f32
      %172 = vector.broadcast %cst_157 : f32 to vector<4x256xf32>
      %173 = arith.select %171, %169, %172 : vector<4x256xi1>, vector<4x256xf32>
      %c2_158 = arith.constant 2 : index
      %c2_159 = arith.constant 2 : index
      %c0_160 = arith.constant 0 : index
      %c0_161 = arith.constant 0 : index
      %174 = vector.load %arg4[%c2_158, %c2_159, %c0_160, %c0_161] : memref<3x3x8x4xf32, #tpu.memory_space<vmem>>, vector<1x1x8x4xf32>
      %175 = vector.shape_cast %174 : vector<1x1x8x4xf32> to vector<8x4xf32>
      %cst_162 = arith.constant dense<0.000000e+00> : vector<8x256xf32>
      %176 = tpu.matmul %175, %173, %cst_162 {dimension_numbers = #tpu.dot_dimension_numbers<[1], [0], [0], [1], [0, 0, 1, 1], [], []>} : vector<8x4xf32>, vector<4x256xf32>, vector<8x256xf32> -> vector<8x256xf32>
      %177 = arith.addf %168, %176 : vector<8x256xf32>
      %c1_163 = arith.constant 1 : index
      %c0_164 = arith.constant 0 : index
      %c0_165 = arith.constant 0 : index
      %178 = vector.load %arg5[%c1_163, %c0_164, %c0_165] : memref<2x8x256xf32, #tpu.memory_space<vmem>>, vector<1x8x256xf32>
      %179 = vector.shape_cast %178 : vector<1x8x256xf32> to vector<8x256xf32>
      %180 = vector.shape_cast %177 : vector<8x256xf32> to vector<1x8x256xf32>
      tpu.vector_store %arg5[%c1_163, %c0_164, %c0_165], %180 {strides = array<i32>} : memref<2x8x256xf32, #tpu.memory_space<vmem>>, vector<1x8x256xf32>,
    } else {
    }
    %c2_i32 = arith.constant 2 : i32
    %26 = arith.cmpi eq, %arg0, %c2_i32 : i32
    %27 = arith.extui %26 : i1 to i32
    %c0_i32_9 = arith.constant 0 : i32
    %28 = arith.cmpi ne, %27, %c0_i32_9 : i32
    scf.if %28 {
      %c0_10 = arith.constant 0 : index
      %c0_11 = arith.constant 0 : index
      %c0_12 = arith.constant 0 : index
      %29 = vector.load %arg3[%c0_10, %c0_11, %c0_12] : memref<2x4x256xf32, #tpu.memory_space<vmem>>, vector<1x4x256xf32>
      %30 = vector.shape_cast %29 : vector<1x4x256xf32> to vector<4x256xf32>
      %c0_13 = arith.constant 0 : index
      %c128 = arith.constant 128 : index
      %31 = vector.load %arg6[%c0_13, %c128] : memref<4x512xf32, #tpu.memory_space<vmem>>, vector<4x256xf32>
      tpu.vector_store %arg6[%c0_13, %c128], %30 {strides = array<i32>} : memref<4x512xf32, #tpu.memory_space<vmem>>, vector<4x256xf32>,
      %cst_14 = arith.constant 0.000000e+00 : f32
      %32 = vector.broadcast %cst_14 : f32 to vector<8x256xf32>
      %c0_15 = arith.constant 0 : index
      %c77 = arith.constant 77 : index
      %33 = vector.load %arg6[%c0_15, %c77] : memref<4x512xf32, #tpu.memory_space<vmem>>, vector<4x256xf32>
      %c3_i32 = arith.constant 3 : i32
      %34 = vector.broadcast %c3_i32 : i32 to vector<4x256xi32>
      %35 = arith.cmpi sge, %19, %34 : vector<4x256xi32>
      %cst_16 = arith.constant 0.000000e+00 : f32
      %36 = vector.broadcast %cst_16 : f32 to vector<4x256xf32>
      %37 = arith.select %35, %33, %36 : vector<4x256xi1>, vector<4x256xf32>
      %c0_17 = arith.constant 0 : index
      %c0_18 = arith.constant 0 : index
      %c0_19 = arith.constant 0 : index
      %c0_20 = arith.constant 0 : index
      %38 = vector.load %arg4[%c0_17, %c0_18, %c0_19, %c0_20] : memref<3x3x8x4xf32, #tpu.memory_space<vmem>>, vector<1x1x8x4xf32>
      %39 = vector.shape_cast %38 : vector<1x1x8x4xf32> to vector<8x4xf32>
      %cst_21 = arith.constant dense<0.000000e+00> : vector<8x256xf32>
      %40 = tpu.matmul %39, %37, %cst_21 {dimension_numbers = #tpu.dot_dimension_numbers<[1], [0], [0], [1], [0, 0, 1, 1], [], []>} : vector<8x4xf32>, vector<4x256xf32>, vector<8x256xf32> -> vector<8x256xf32>
      %41 = arith.addf %32, %40 : vector<8x256xf32>
      %c0_22 = arith.constant 0 : index
      %c80 = arith.constant 80 : index
      %42 = vector.load %arg6[%c0_22, %c80] : memref<4x512xf32, #tpu.memory_space<vmem>>, vector<4x256xf32>
      %c0_23 = arith.constant 0 : index
      %c1 = arith.constant 1 : index
      %c0_24 = arith.constant 0 : index
      %c0_25 = arith.constant 0 : index
      %43 = vector.load %arg4[%c0_23, %c1, %c0_24, %c0_25] : memref<3x3x8x4xf32, #tpu.memory_space<vmem>>, vector<1x1x8x4xf32>
      %44 = vector.shape_cast %43 : vector<1x1x8x4xf32> to vector<8x4xf32>
      %cst_26 = arith.constant dense<0.000000e+00> : vector<8x256xf32>
      %45 = tpu.matmul %44, %42, %cst_26 {dimension_numbers = #tpu.dot_dimension_numbers<[1], [0], [0], [1], [0, 0, 1, 1], [], []>} : vector<8x4xf32>, vector<4x256xf32>, vector<8x256xf32> -> vector<8x256xf32>
      %46 = arith.addf %41, %45 : vector<8x256xf32>
      %c0_27 = arith.constant 0 : index
      %c83 = arith.constant 83 : index
      %47 = vector.load %arg6[%c0_27, %c83] : memref<4x512xf32, #tpu.memory_space<vmem>>, vector<4x256xf32>
      %c13_i32 = arith.constant 13 : i32
      %48 = vector.broadcast %c13_i32 : i32 to vector<4x256xi32>
      %49 = arith.cmpi slt, %19, %48 : vector<4x256xi32>
      %cst_28 = arith.constant 0.000000e+00 : f32
      %50 = vector.broadcast %cst_28 : f32 to vector<4x256xf32>
      %51 = arith.select %49, %47, %50 : vector<4x256xi1>, vector<4x256xf32>
      %c0_29 = arith.constant 0 : index
      %c2 = arith.constant 2 : index
      %c0_30 = arith.constant 0 : index
      %c0_31 = arith.constant 0 : index
      %52 = vector.load %arg4[%c0_29, %c2, %c0_30, %c0_31] : memref<3x3x8x4xf32, #tpu.memory_space<vmem>>, vector<1x1x8x4xf32>
      %53 = vector.shape_cast %52 : vector<1x1x8x4xf32> to vector<8x4xf32>
      %cst_32 = arith.constant dense<0.000000e+00> : vector<8x256xf32>
      %54 = tpu.matmul %53, %51, %cst_32 {dimension_numbers = #tpu.dot_dimension_numbers<[1], [0], [0], [1], [0, 0, 1, 1], [], []>} : vector<8x4xf32>, vector<4x256xf32>, vector<8x256xf32> -> vector<8x256xf32>
      %55 = arith.addf %46, %54 : vector<8x256xf32>
      %c0_33 = arith.constant 0 : index
      %c125 = arith.constant 125 : index
      %56 = vector.load %arg6[%c0_33, %c125] : memref<4x512xf32, #tpu.memory_space<vmem>>, vector<4x256xf32>
      %c3_i32_34 = arith.constant 3 : i32
      %57 = vector.broadcast %c3_i32_34 : i32 to vector<4x256xi32>
      %58 = arith.cmpi sge, %19, %57 : vector<4x256xi32>
      %cst_35 = arith.constant 0.000000e+00 : f32
      %59 = vector.broadcast %cst_35 : f32 to vector<4x256xf32>
      %60 = arith.select %58, %56, %59 : vector<4x256xi1>, vector<4x256xf32>
      %c1_36 = arith.constant 1 : index
      %c0_37 = arith.constant 0 : index
      %c0_38 = arith.constant 0 : index
      %c0_39 = arith.constant 0 : index
      %61 = vector.load %arg4[%c1_36, %c0_37, %c0_38, %c0_39] : memref<3x3x8x4xf32, #tpu.memory_space<vmem>>, vector<1x1x8x4xf32>
      %62 = vector.shape_cast %61 : vector<1x1x8x4xf32> to vector<8x4xf32>
      %cst_40 = arith.constant dense<0.000000e+00> : vector<8x256xf32>
      %63 = tpu.matmul %62, %60, %cst_40 {dimension_numbers = #tpu.dot_dimension_numbers<[1], [0], [0], [1], [0, 0, 1, 1], [], []>} : vector<8x4xf32>, vector<4x256xf32>, vector<8x256xf32> -> vector<8x256xf32>
      %64 = arith.addf %55, %63 : vector<8x256xf32>
      %c0_41 = arith.constant 0 : index
      %c128_42 = arith.constant 128 : index
      %65 = vector.load %arg6[%c0_41, %c128_42] : memref<4x512xf32, #tpu.memory_space<vmem>>, vector<4x256xf32>
      %c1_43 = arith.constant 1 : index
      %c1_44 = arith.constant 1 : index
      %c0_45 = arith.constant 0 : index
      %c0_46 = arith.constant 0 : index
      %66 = vector.load %arg4[%c1_43, %c1_44, %c0_45, %c0_46] : memref<3x3x8x4xf32, #tpu.memory_space<vmem>>, vector<1x1x8x4xf32>
      %67 = vector.shape_cast %66 : vector<1x1x8x4xf32> to vector<8x4xf32>
      %cst_47 = arith.constant dense<0.000000e+00> : vector<8x256xf32>
      %68 = tpu.matmul %67, %65, %cst_47 {dimension_numbers = #tpu.dot_dimension_numbers<[1], [0], [0], [1], [0, 0, 1, 1], [], []>} : vector<8x4xf32>, vector<4x256xf32>, vector<8x256xf32> -> vector<8x256xf32>
      %69 = arith.addf %64, %68 : vector<8x256xf32>
      %c0_48 = arith.constant 0 : index
      %c131 = arith.constant 131 : index
      %70 = vector.load %arg6[%c0_48, %c131] : memref<4x512xf32, #tpu.memory_space<vmem>>, vector<4x256xf32>
      %c13_i32_49 = arith.constant 13 : i32
      %71 = vector.broadcast %c13_i32_49 : i32 to vector<4x256xi32>
      %72 = arith.cmpi slt, %19, %71 : vector<4x256xi32>
      %cst_50 = arith.constant 0.000000e+00 : f32
      %73 = vector.broadcast %cst_50 : f32 to vector<4x256xf32>
      %74 = arith.select %72, %70, %73 : vector<4x256xi1>, vector<4x256xf32>
      %c1_51 = arith.constant 1 : index
      %c2_52 = arith.constant 2 : index
      %c0_53 = arith.constant 0 : index
      %c0_54 = arith.constant 0 : index
      %75 = vector.load %arg4[%c1_51, %c2_52, %c0_53, %c0_54] : memref<3x3x8x4xf32, #tpu.memory_space<vmem>>, vector<1x1x8x4xf32>
      %76 = vector.shape_cast %75 : vector<1x1x8x4xf32> to vector<8x4xf32>
      %cst_55 = arith.constant dense<0.000000e+00> : vector<8x256xf32>
      %77 = tpu.matmul %76, %74, %cst_55 {dimension_numbers = #tpu.dot_dimension_numbers<[1], [0], [0], [1], [0, 0, 1, 1], [], []>} : vector<8x4xf32>, vector<4x256xf32>, vector<8x256xf32> -> vector<8x256xf32>
      %78 = arith.addf %69, %77 : vector<8x256xf32>
      %c0_56 = arith.constant 0 : index
      %c173 = arith.constant 173 : index
      %79 = vector.load %arg6[%c0_56, %c173] : memref<4x512xf32, #tpu.memory_space<vmem>>, vector<4x256xf32>
      %c3_i32_57 = arith.constant 3 : i32
      %80 = vector.broadcast %c3_i32_57 : i32 to vector<4x256xi32>
      %81 = arith.cmpi sge, %19, %80 : vector<4x256xi32>
      %cst_58 = arith.constant 0.000000e+00 : f32
      %82 = vector.broadcast %cst_58 : f32 to vector<4x256xf32>
      %83 = arith.select %81, %79, %82 : vector<4x256xi1>, vector<4x256xf32>
      %c2_59 = arith.constant 2 : index
      %c0_60 = arith.constant 0 : index
      %c0_61 = arith.constant 0 : index
      %c0_62 = arith.constant 0 : index
      %84 = vector.load %arg4[%c2_59, %c0_60, %c0_61, %c0_62] : memref<3x3x8x4xf32, #tpu.memory_space<vmem>>, vector<1x1x8x4xf32>
      %85 = vector.shape_cast %84 : vector<1x1x8x4xf32> to vector<8x4xf32>
      %cst_63 = arith.constant dense<0.000000e+00> : vector<8x256xf32>
      %86 = tpu.matmul %85, %83, %cst_63 {dimension_numbers = #tpu.dot_dimension_numbers<[1], [0], [0], [1], [0, 0, 1, 1], [], []>} : vector<8x4xf32>, vector<4x256xf32>, vector<8x256xf32> -> vector<8x256xf32>
      %87 = arith.addf %78, %86 : vector<8x256xf32>
      %c0_64 = arith.constant 0 : index
      %c176 = arith.constant 176 : index
      %88 = vector.load %arg6[%c0_64, %c176] : memref<4x512xf32, #tpu.memory_space<vmem>>, vector<4x256xf32>
      %c2_65 = arith.constant 2 : index
      %c1_66 = arith.constant 1 : index
      %c0_67 = arith.constant 0 : index
      %c0_68 = arith.constant 0 : index
      %89 = vector.load %arg4[%c2_65, %c1_66, %c0_67, %c0_68] : memref<3x3x8x4xf32, #tpu.memory_space<vmem>>, vector<1x1x8x4xf32>
      %90 = vector.shape_cast %89 : vector<1x1x8x4xf32> to vector<8x4xf32>
      %cst_69 = arith.constant dense<0.000000e+00> : vector<8x256xf32>
      %91 = tpu.matmul %90, %88, %cst_69 {dimension_numbers = #tpu.dot_dimension_numbers<[1], [0], [0], [1], [0, 0, 1, 1], [], []>} : vector<8x4xf32>, vector<4x256xf32>, vector<8x256xf32> -> vector<8x256xf32>
      %92 = arith.addf %87, %91 : vector<8x256xf32>
      %c0_70 = arith.constant 0 : index
      %c179 = arith.constant 179 : index
      %93 = vector.load %arg6[%c0_70, %c179] : memref<4x512xf32, #tpu.memory_space<vmem>>, vector<4x256xf32>
      %c13_i32_71 = arith.constant 13 : i32
      %94 = vector.broadcast %c13_i32_71 : i32 to vector<4x256xi32>
      %95 = arith.cmpi slt, %19, %94 : vector<4x256xi32>
      %cst_72 = arith.constant 0.000000e+00 : f32
      %96 = vector.broadcast %cst_72 : f32 to vector<4x256xf32>
      %97 = arith.select %95, %93, %96 : vector<4x256xi1>, vector<4x256xf32>
      %c2_73 = arith.constant 2 : index
      %c2_74 = arith.constant 2 : index
      %c0_75 = arith.constant 0 : index
      %c0_76 = arith.constant 0 : index
      %98 = vector.load %arg4[%c2_73, %c2_74, %c0_75, %c0_76] : memref<3x3x8x4xf32, #tpu.memory_space<vmem>>, vector<1x1x8x4xf32>
      %99 = vector.shape_cast %98 : vector<1x1x8x4xf32> to vector<8x4xf32>
      %cst_77 = arith.constant dense<0.000000e+00> : vector<8x256xf32>
      %100 = tpu.matmul %99, %97, %cst_77 {dimension_numbers = #tpu.dot_dimension_numbers<[1], [0], [0], [1], [0, 0, 1, 1], [], []>} : vector<8x4xf32>, vector<4x256xf32>, vector<8x256xf32> -> vector<8x256xf32>
      %101 = arith.addf %92, %100 : vector<8x256xf32>
      %c0_78 = arith.constant 0 : index
      %c0_79 = arith.constant 0 : index
      %c0_80 = arith.constant 0 : index
      %102 = vector.load %arg5[%c0_78, %c0_79, %c0_80] : memref<2x8x256xf32, #tpu.memory_space<vmem>>, vector<1x8x256xf32>
      %103 = vector.shape_cast %102 : vector<1x8x256xf32> to vector<8x256xf32>
      %104 = vector.shape_cast %101 : vector<8x256xf32> to vector<1x8x256xf32>
      tpu.vector_store %arg5[%c0_78, %c0_79, %c0_80], %104 {strides = array<i32>} : memref<2x8x256xf32, #tpu.memory_space<vmem>>, vector<1x8x256xf32>,
      %c1_81 = arith.constant 1 : index
      %c0_82 = arith.constant 0 : index
      %c0_83 = arith.constant 0 : index
      %105 = vector.load %arg3[%c1_81, %c0_82, %c0_83] : memref<2x4x256xf32, #tpu.memory_space<vmem>>, vector<1x4x256xf32>
      %106 = vector.shape_cast %105 : vector<1x4x256xf32> to vector<4x256xf32>
      %c0_84 = arith.constant 0 : index
      %c128_85 = arith.constant 128 : index
      %107 = vector.load %arg6[%c0_84, %c128_85] : memref<4x512xf32, #tpu.memory_space<vmem>>, vector<4x256xf32>
      tpu.vector_store %arg6[%c0_84, %c128_85], %106 {strides = array<i32>} : memref<4x512xf32, #tpu.memory_space<vmem>>, vector<4x256xf32>,
      %cst_86 = arith.constant 0.000000e+00 : f32
      %108 = vector.broadcast %cst_86 : f32 to vector<8x256xf32>
      %c0_87 = arith.constant 0 : index
      %c77_88 = arith.constant 77 : index
      %109 = vector.load %arg6[%c0_87, %c77_88] : memref<4x512xf32, #tpu.memory_space<vmem>>, vector<4x256xf32>
      %c3_i32_89 = arith.constant 3 : i32
      %110 = vector.broadcast %c3_i32_89 : i32 to vector<4x256xi32>
      %111 = arith.cmpi sge, %19, %110 : vector<4x256xi32>
      %cst_90 = arith.constant 0.000000e+00 : f32
      %112 = vector.broadcast %cst_90 : f32 to vector<4x256xf32>
      %113 = arith.select %111, %109, %112 : vector<4x256xi1>, vector<4x256xf32>
      %c0_91 = arith.constant 0 : index
      %c0_92 = arith.constant 0 : index
      %c0_93 = arith.constant 0 : index
      %c0_94 = arith.constant 0 : index
      %114 = vector.load %arg4[%c0_91, %c0_92, %c0_93, %c0_94] : memref<3x3x8x4xf32, #tpu.memory_space<vmem>>, vector<1x1x8x4xf32>
      %115 = vector.shape_cast %114 : vector<1x1x8x4xf32> to vector<8x4xf32>
      %cst_95 = arith.constant dense<0.000000e+00> : vector<8x256xf32>
      %116 = tpu.matmul %115, %113, %cst_95 {dimension_numbers = #tpu.dot_dimension_numbers<[1], [0], [0], [1], [0, 0, 1, 1], [], []>} : vector<8x4xf32>, vector<4x256xf32>, vector<8x256xf32> -> vector<8x256xf32>
      %117 = arith.addf %108, %116 : vector<8x256xf32>
      %c0_96 = arith.constant 0 : index
      %c80_97 = arith.constant 80 : index
      %118 = vector.load %arg6[%c0_96, %c80_97] : memref<4x512xf32, #tpu.memory_space<vmem>>, vector<4x256xf32>
      %c0_98 = arith.constant 0 : index
      %c1_99 = arith.constant 1 : index
      %c0_100 = arith.constant 0 : index
      %c0_101 = arith.constant 0 : index
      %119 = vector.load %arg4[%c0_98, %c1_99, %c0_100, %c0_101] : memref<3x3x8x4xf32, #tpu.memory_space<vmem>>, vector<1x1x8x4xf32>
      %120 = vector.shape_cast %119 : vector<1x1x8x4xf32> to vector<8x4xf32>
      %cst_102 = arith.constant dense<0.000000e+00> : vector<8x256xf32>
      %121 = tpu.matmul %120, %118, %cst_102 {dimension_numbers = #tpu.dot_dimension_numbers<[1], [0], [0], [1], [0, 0, 1, 1], [], []>} : vector<8x4xf32>, vector<4x256xf32>, vector<8x256xf32> -> vector<8x256xf32>
      %122 = arith.addf %117, %121 : vector<8x256xf32>
      %c0_103 = arith.constant 0 : index
      %c83_104 = arith.constant 83 : index
      %123 = vector.load %arg6[%c0_103, %c83_104] : memref<4x512xf32, #tpu.memory_space<vmem>>, vector<4x256xf32>
      %c13_i32_105 = arith.constant 13 : i32
      %124 = vector.broadcast %c13_i32_105 : i32 to vector<4x256xi32>
      %125 = arith.cmpi slt, %19, %124 : vector<4x256xi32>
      %cst_106 = arith.constant 0.000000e+00 : f32
      %126 = vector.broadcast %cst_106 : f32 to vector<4x256xf32>
      %127 = arith.select %125, %123, %126 : vector<4x256xi1>, vector<4x256xf32>
      %c0_107 = arith.constant 0 : index
      %c2_108 = arith.constant 2 : index
      %c0_109 = arith.constant 0 : index
      %c0_110 = arith.constant 0 : index
      %128 = vector.load %arg4[%c0_107, %c2_108, %c0_109, %c0_110] : memref<3x3x8x4xf32, #tpu.memory_space<vmem>>, vector<1x1x8x4xf32>
      %129 = vector.shape_cast %128 : vector<1x1x8x4xf32> to vector<8x4xf32>
      %cst_111 = arith.constant dense<0.000000e+00> : vector<8x256xf32>
      %130 = tpu.matmul %129, %127, %cst_111 {dimension_numbers = #tpu.dot_dimension_numbers<[1], [0], [0], [1], [0, 0, 1, 1], [], []>} : vector<8x4xf32>, vector<4x256xf32>, vector<8x256xf32> -> vector<8x256xf32>
      %131 = arith.addf %122, %130 : vector<8x256xf32>
      %c0_112 = arith.constant 0 : index
      %c125_113 = arith.constant 125 : index
      %132 = vector.load %arg6[%c0_112, %c125_113] : memref<4x512xf32, #tpu.memory_space<vmem>>, vector<4x256xf32>
      %c3_i32_114 = arith.constant 3 : i32
      %133 = vector.broadcast %c3_i32_114 : i32 to vector<4x256xi32>
      %134 = arith.cmpi sge, %19, %133 : vector<4x256xi32>
      %cst_115 = arith.constant 0.000000e+00 : f32
      %135 = vector.broadcast %cst_115 : f32 to vector<4x256xf32>
      %136 = arith.select %134, %132, %135 : vector<4x256xi1>, vector<4x256xf32>
      %c1_116 = arith.constant 1 : index
      %c0_117 = arith.constant 0 : index
      %c0_118 = arith.constant 0 : index
      %c0_119 = arith.constant 0 : index
      %137 = vector.load %arg4[%c1_116, %c0_117, %c0_118, %c0_119] : memref<3x3x8x4xf32, #tpu.memory_space<vmem>>, vector<1x1x8x4xf32>
      %138 = vector.shape_cast %137 : vector<1x1x8x4xf32> to vector<8x4xf32>
      %cst_120 = arith.constant dense<0.000000e+00> : vector<8x256xf32>
      %139 = tpu.matmul %138, %136, %cst_120 {dimension_numbers = #tpu.dot_dimension_numbers<[1], [0], [0], [1], [0, 0, 1, 1], [], []>} : vector<8x4xf32>, vector<4x256xf32>, vector<8x256xf32> -> vector<8x256xf32>
      %140 = arith.addf %131, %139 : vector<8x256xf32>
      %c0_121 = arith.constant 0 : index
      %c128_122 = arith.constant 128 : index
      %141 = vector.load %arg6[%c0_121, %c128_122] : memref<4x512xf32, #tpu.memory_space<vmem>>, vector<4x256xf32>
      %c1_123 = arith.constant 1 : index
      %c1_124 = arith.constant 1 : index
      %c0_125 = arith.constant 0 : index
      %c0_126 = arith.constant 0 : index
      %142 = vector.load %arg4[%c1_123, %c1_124, %c0_125, %c0_126] : memref<3x3x8x4xf32, #tpu.memory_space<vmem>>, vector<1x1x8x4xf32>
      %143 = vector.shape_cast %142 : vector<1x1x8x4xf32> to vector<8x4xf32>
      %cst_127 = arith.constant dense<0.000000e+00> : vector<8x256xf32>
      %144 = tpu.matmul %143, %141, %cst_127 {dimension_numbers = #tpu.dot_dimension_numbers<[1], [0], [0], [1], [0, 0, 1, 1], [], []>} : vector<8x4xf32>, vector<4x256xf32>, vector<8x256xf32> -> vector<8x256xf32>
      %145 = arith.addf %140, %144 : vector<8x256xf32>
      %c0_128 = arith.constant 0 : index
      %c131_129 = arith.constant 131 : index
      %146 = vector.load %arg6[%c0_128, %c131_129] : memref<4x512xf32, #tpu.memory_space<vmem>>, vector<4x256xf32>
      %c13_i32_130 = arith.constant 13 : i32
      %147 = vector.broadcast %c13_i32_130 : i32 to vector<4x256xi32>
      %148 = arith.cmpi slt, %19, %147 : vector<4x256xi32>
      %cst_131 = arith.constant 0.000000e+00 : f32
      %149 = vector.broadcast %cst_131 : f32 to vector<4x256xf32>
      %150 = arith.select %148, %146, %149 : vector<4x256xi1>, vector<4x256xf32>
      %c1_132 = arith.constant 1 : index
      %c2_133 = arith.constant 2 : index
      %c0_134 = arith.constant 0 : index
      %c0_135 = arith.constant 0 : index
      %151 = vector.load %arg4[%c1_132, %c2_133, %c0_134, %c0_135] : memref<3x3x8x4xf32, #tpu.memory_space<vmem>>, vector<1x1x8x4xf32>
      %152 = vector.shape_cast %151 : vector<1x1x8x4xf32> to vector<8x4xf32>
      %cst_136 = arith.constant dense<0.000000e+00> : vector<8x256xf32>
      %153 = tpu.matmul %152, %150, %cst_136 {dimension_numbers = #tpu.dot_dimension_numbers<[1], [0], [0], [1], [0, 0, 1, 1], [], []>} : vector<8x4xf32>, vector<4x256xf32>, vector<8x256xf32> -> vector<8x256xf32>
      %154 = arith.addf %145, %153 : vector<8x256xf32>
      %c0_137 = arith.constant 0 : index
      %c173_138 = arith.constant 173 : index
      %155 = vector.load %arg6[%c0_137, %c173_138] : memref<4x512xf32, #tpu.memory_space<vmem>>, vector<4x256xf32>
      %c3_i32_139 = arith.constant 3 : i32
      %156 = vector.broadcast %c3_i32_139 : i32 to vector<4x256xi32>
      %157 = arith.cmpi sge, %19, %156 : vector<4x256xi32>
      %cst_140 = arith.constant 0.000000e+00 : f32
      %158 = vector.broadcast %cst_140 : f32 to vector<4x256xf32>
      %159 = arith.select %157, %155, %158 : vector<4x256xi1>, vector<4x256xf32>
      %c2_141 = arith.constant 2 : index
      %c0_142 = arith.constant 0 : index
      %c0_143 = arith.constant 0 : index
      %c0_144 = arith.constant 0 : index
      %160 = vector.load %arg4[%c2_141, %c0_142, %c0_143, %c0_144] : memref<3x3x8x4xf32, #tpu.memory_space<vmem>>, vector<1x1x8x4xf32>
      %161 = vector.shape_cast %160 : vector<1x1x8x4xf32> to vector<8x4xf32>
      %cst_145 = arith.constant dense<0.000000e+00> : vector<8x256xf32>
      %162 = tpu.matmul %161, %159, %cst_145 {dimension_numbers = #tpu.dot_dimension_numbers<[1], [0], [0], [1], [0, 0, 1, 1], [], []>} : vector<8x4xf32>, vector<4x256xf32>, vector<8x256xf32> -> vector<8x256xf32>
      %163 = arith.addf %154, %162 : vector<8x256xf32>
      %c0_146 = arith.constant 0 : index
      %c176_147 = arith.constant 176 : index
      %164 = vector.load %arg6[%c0_146, %c176_147] : memref<4x512xf32, #tpu.memory_space<vmem>>, vector<4x256xf32>
      %c2_148 = arith.constant 2 : index
      %c1_149 = arith.constant 1 : index
      %c0_150 = arith.constant 0 : index
      %c0_151 = arith.constant 0 : index
      %165 = vector.load %arg4[%c2_148, %c1_149, %c0_150, %c0_151] : memref<3x3x8x4xf32, #tpu.memory_space<vmem>>, vector<1x1x8x4xf32>
      %166 = vector.shape_cast %165 : vector<1x1x8x4xf32> to vector<8x4xf32>
      %cst_152 = arith.constant dense<0.000000e+00> : vector<8x256xf32>
      %167 = tpu.matmul %166, %164, %cst_152 {dimension_numbers = #tpu.dot_dimension_numbers<[1], [0], [0], [1], [0, 0, 1, 1], [], []>} : vector<8x4xf32>, vector<4x256xf32>, vector<8x256xf32> -> vector<8x256xf32>
      %168 = arith.addf %163, %167 : vector<8x256xf32>
      %c0_153 = arith.constant 0 : index
      %c179_154 = arith.constant 179 : index
      %169 = vector.load %arg6[%c0_153, %c179_154] : memref<4x512xf32, #tpu.memory_space<vmem>>, vector<4x256xf32>
      %c13_i32_155 = arith.constant 13 : i32
      %170 = vector.broadcast %c13_i32_155 : i32 to vector<4x256xi32>
      %171 = arith.cmpi slt, %19, %170 : vector<4x256xi32>
      %cst_156 = arith.constant 0.000000e+00 : f32
      %172 = vector.broadcast %cst_156 : f32 to vector<4x256xf32>
      %173 = arith.select %171, %169, %172 : vector<4x256xi1>, vector<4x256xf32>
      %c2_157 = arith.constant 2 : index
      %c2_158 = arith.constant 2 : index
      %c0_159 = arith.constant 0 : index
      %c0_160 = arith.constant 0 : index
      %174 = vector.load %arg4[%c2_157, %c2_158, %c0_159, %c0_160] : memref<3x3x8x4xf32, #tpu.memory_space<vmem>>, vector<1x1x8x4xf32>
      %175 = vector.shape_cast %174 : vector<1x1x8x4xf32> to vector<8x4xf32>
      %cst_161 = arith.constant dense<0.000000e+00> : vector<8x256xf32>
      %176 = tpu.matmul %175, %173, %cst_161 {dimension_numbers = #tpu.dot_dimension_numbers<[1], [0], [0], [1], [0, 0, 1, 1], [], []>} : vector<8x4xf32>, vector<4x256xf32>, vector<8x256xf32> -> vector<8x256xf32>
      %177 = arith.addf %168, %176 : vector<8x256xf32>
      %c1_162 = arith.constant 1 : index
      %c0_163 = arith.constant 0 : index
      %c0_164 = arith.constant 0 : index
      %178 = vector.load %arg5[%c1_162, %c0_163, %c0_164] : memref<2x8x256xf32, #tpu.memory_space<vmem>>, vector<1x8x256xf32>
      %179 = vector.shape_cast %178 : vector<1x8x256xf32> to vector<8x256xf32>
      %180 = vector.shape_cast %177 : vector<8x256xf32> to vector<1x8x256xf32>
      tpu.vector_store %arg5[%c1_162, %c0_163, %c0_164], %180 {strides = array<i32>} : memref<2x8x256xf32, #tpu.memory_space<vmem>>, vector<1x8x256xf32>,
    } else {
    }
    return
  }
  func.func @transform_0(%arg0: i32) -> (i32, i32, i32) {
    %c0_i32 = arith.constant 0 : i32
    %c0_i32_0 = arith.constant 0 : i32
    %c0_i32_1 = arith.constant 0 : i32
    %c0_i32_2 = arith.constant 0 : i32
    return %c0_i32, %c0_i32_0, %c0_i32_1 : i32, i32, i32
  }
  func.func @transform_1(%arg0: i32) -> (i32, i32, i32) {
    %c0_i32 = arith.constant 0 : i32
    %c0_i32_0 = arith.constant 0 : i32
    %c0_i32_1 = arith.constant 0 : i32
    %c0_i32_2 = arith.constant 0 : i32
    return %c0_i32, %c0_i32_0, %c0_i32_1 : i32, i32, i32
  }
  func.func @transform_2(%arg0: i32) -> (i32, i32, i32) {
    %c0_i32 = arith.constant 0 : i32
    %c0_i32_0 = arith.constant 0 : i32
    %c0_i32_1 = arith.constant 0 : i32
    %c0_i32_2 = arith.constant 0 : i32
    return %c0_i32, %c0_i32_0, %c0_i32_1 : i32, i32, i32
  }
  func.func @transform_3(%arg0: i32) -> (i32, i32, i32, i32) {
    %c0_i32 = arith.constant 0 : i32
    %c0_i32_0 = arith.constant 0 : i32
    %c0_i32_1 = arith.constant 0 : i32
    %c0_i32_2 = arith.constant 0 : i32
    %c0_i32_3 = arith.constant 0 : i32
    return %c0_i32, %c0_i32_0, %c0_i32_1, %c0_i32_2 : i32, i32, i32, i32
  }
  func.func @transform_4(%arg0: i32) -> (i32, i32, i32) {
    %c0_i32 = arith.constant 0 : i32
    %c0_i32_0 = arith.constant 0 : i32
    %c0_i32_1 = arith.constant 0 : i32
    return %arg0, %c0_i32, %c0_i32_0 : i32, i32, i32
  }
}

</mosaic_0001>

<bundles_post_ra>
// kernel: tpu_custom_call.1
= control target key start
LH: loop header
LB: loop body
LE: loop exit
PB: predicated region body
PF: predicated region fallthrough
CT: control target
= control target key end

     0   :  { %9 = vsyncpa [#allocation4], 0  ;;  %s7034_s0 = inlined_call_operand.vmem [shape: f32[2,4,256], index: 0, kind: input, shape index: {}]   ;;  %s7035_s1 = inlined_call_operand.vmem [shape: f32[2,4,256], index: 1, kind: input, shape index: {}]   ;;  %s7036_s2 = inlined_call_operand.vmem [shape: f32[2,4,256], index: 2, kind: input, shape index: {}]   ;;  %s7037_s3 = inlined_call_operand.vmem [shape: f32[3,3,8,4], index: 3, kind: input, shape index: {}]   ;;  %s7038_s4 = inlined_call_operand.hbm [shape: f32[6,8,256], index: 4, kind: output, shape index: {}]  }
   0x1   :  { %11 = vsyncpa [#allocation4 + $0x1], 0  ;;  %s5990_s15 = smov 0   ;;  %s5992_s16 = smov 0  }
   0x2   :  { %s5994_s17 = smov 0   ;;  %s5996_s18 = smov 0  }
   0x3 LB: > { %s6011_s19 = sadd.s32 4294967295, %s5932_s18   ;;  %s5557_s20 = sadd.s32 4294967294, %s5932_s18   ;;  %s5932_s18 = sphi %s5996_s18, %s7044_s18   ;;  %s5928_s17 = sphi %s5994_s17, %s7043_s17   ;;  %s5924_s16 = sphi %s5992_s16, %s7042_s16   ;;  %s5920_s15 = sphi %s5990_s15, %s7041_s15  }
   0x4   : > { %s6015_s21 = sadd.s32 1, %s5932_s18   ;;  %s108_s22 = sadd.s32 1, %s5928_s17 }
   0x5   : > { %s105_s23 = ssub.s32 %s5932_s18, %s6015_s21  ;;  %p118_p0 = scmp.ne.s32.totalorder %s5928_s17, %s5924_s16 }
   0x6   : > { %p106_p1 = scmp.eq.s32.totalorder %s105_s23, 0  ;;  %p119_p2 = scmp.eq.s32.totalorder %s6011_s19, 2 }
   0x7   : > { %p124_p3 = scmp.ne.s32.totalorder %s5924_s16, %s5920_s15  ;;  %p125_p4 = scmp.eq.s32.totalorder %s5557_s20, 2 }
   0x8   : > { %s6026_s24 = scalar_select %p106_p1, %s5928_s17, %s108_s22  }
   0x9   : > { %p6028_p5 = por %p119_p2, %p118_p0  ;;  %p6032_p6 = por %p125_p4, %p124_p3 }
   0xa   : > { %p5559_p7 = scmp.ge.s32.totalorder %s5932_s18, 1  ;;  %p155_p8 = scmp.lt.s32.totalorder %s5932_s18, 4 }
   0xc   : > { %p156_p9 = pnand %p5559_p7, %p155_p8 }
   0xd   : > { %s173_s27 = sand.u32 (!%p156_p9), 1, %s5924_s16   ;;  %p5561_p10 = scmp.ne.s32.totalorder (!%p156_p9), %s6011_s19, 0 }
   0xe   : > { %159 = sbr.rel (%p156_p9) target bundleno = 1318 (0x526), region = 36  ;;  %s5560_s28 = sshll.u32 (!%p156_p9), %s173_s27, 5 }
   0xf   : > { %s6045_s29 = scalar_lea.vmem (!%p156_p9), [#allocation3], %s5560_s28 }
  0x13   : > { %v179_v0 = vlaneseq  ;;  %v5934_v1 = vmov 0.0   ;;  %s5935_s8 = smov (!%p5561_p10), 17   ;;  %s5936_s9 = smov (!%p5561_p10), 16  }
  0x14   : > { %177 = vst [vmem:[#allocation2] sm:$0xf] %v5934_v1  ;;  %178 = vst [vmem:[#allocation2 + $0xc] sm:$0xf] %v5934_v1  ;;  %s5938_s10 = smov (!%p5561_p10), 15   ;;  %s5939_s11 = smov (!%p5561_p10), 1  }
  0x15   : > { %v180_v2 = vand.u32 127, %v179_v0  ;;  %209 = sbr.rel (%p5561_p10) target bundleno = 444 (0x1bc), region = 40  ;;  %s5940_s12 = smov (!%p5561_p10), 127  }
  0x16   : > { %s5941_s13 = smov (!%p5561_p10), 113   ;;  %s5942_s14 = smov (!%p5561_p10), 112  }
  0x17   : > { %v181_v3 = vadd.s32 128, %v180_v2  ;;  %v6041_v4 = vand.u32 15, %v180_v2  ;;  %s5943_s20 = smov (!%p5561_p10), 111  }
  0x19   : > { %v6043_v5 = vand.u32 15, %v181_v3 }
  0x1a   : > { %v6051_v6 = vld [vmem:[%s7034_s0] sm:$0xff]  ;;  %v6057_v7 = vld [vmem:[%s7034_s0 + $0x8] sm:$0xff]  ;;  %v5937_v13 = vmov 0.0   ;;  %vm225_vm0 = vcmask 138240   ;;  %vm241_vm1 = vcmask 130048   ;;  %vm248_vm2 = vcmask 1043456  }
  0x1b   : > { %211 = vst [vmem:[#allocation2 + $0x4] sm:$0xff] %v6051_v6  ;;  %317 = vmatprep.mubr.f32.mxu0 %v5937_v13  ;;  %397 = vmatprep.mubr.f32.mxu1 %v5937_v13  ;;  %v6076_v14 = vcombine.high %v6051_v6, %v6051_v6  ;;  %v696_v15 = vld [vmem:[#allocation2 + $0xc] sm:$0xf]  ;;  %v6112_v24 = vcombine.high %v6057_v7, %v6057_v7  ;;  %vm215_vm3 = vcmp.ge.s32.totalorder %v6043_v5, 1  ;;  %vm214_vm4 = vcmp.ge.s32.totalorder %v6041_v4, 1  ;;  %v6153_v42 = vld [vmem:[%s7037_s3] sm:$0xff] }
  0x1c   : > { %v798_v16 = vld [vmem:[#allocation2 + $0xc] sm:$0xf]  ;;  %vm244_vm5 = vcmask 31744   ;;  %vm417_vm6 = vcmask 121856   ;;  %vm407_vm7 = vcmp.lt.s32.totalorder %v6043_v5, 15  ;;  %vm406_vm8 = vcmp.lt.s32.totalorder %v6041_v4, 15 }
  0x1d   : > { %v900_v17 = vld [vmem:[#allocation2 + $0xc] sm:$0xf]  ;;  %v6174_v50 = vld [vmem:[%s7037_s3 + $0x10] sm:$0xff]  ;;  %vm519_vm9 = vcmask 7168   ;;  %v6191_v56 = vld [vmem:[%s7037_s3 + $0x20] sm:$0xff]  ;;  %vm706_vm10 = vcmask 1039360  }
  0x1e   : > { %v996_v18 = vld [vmem:[#allocation2 + $0xc] sm:$0xf]  ;;  %v6200_v59 = vld [vmem:[%s7037_s3 + $0x18] sm:$0xff]  ;;  %vm808_vm11 = vcmask 924672   ;;  %vm912_vm12 = vcmask 916480   ;;  %vm1006_vm13 = vcmask 908288  }
  0x1f   : > { %v1572_v25 = vld [vmem:[#allocation2 + $0xc] sm:$0xf] }
  0x20   : > { %v1672_v26 = vld [vmem:[#allocation2 + $0xc] sm:$0xf] }
  0x21   : > { %v1772_v27 = vld [vmem:[#allocation2 + $0xc] sm:$0xf] }
  0x22   : > { %v213_v8 = vld [vmem:[#allocation2 + $0x8] sm:$0xf]  ;;  %v212_v9 = vld [vmem:[#allocation2] sm:$0xff]  ;;  %v1866_v28 = vld [vmem:[#allocation2 + $0xc] sm:$0xf] }
  0x23   : > { %223 = vrot.lane.b32.xlu1 %v213_v8, %s5935_s8  ;;  %239 = vrot.lane.b32.xlu0 %v213_v8, %s5936_s9  ;;  %v405_v10 = vld [vmem:[#allocation2 + $0x8] sm:$0xf]  ;;  %v218_v12 = vcombine.high %v212_v9, %v212_v9 }
  0x24   : > { %v509_v11 = vld [vmem:[#allocation2 + $0x8] sm:$0xf] }
  0x25   : > { %1101 = vst [vmem:[#allocation2 + $0x4] sm:$0xff] %v6057_v7  ;;  %v6143_v39 = vld [vmem:[%s7037_s3 + $0x8] sm:$0xff] }
  0x26   : > { %v6218_v3 = vld [vmem:[%s7037_s3 + $0x28] sm:$0xff] }
  0x27   : > { %219 = vrot.lane.b32.xlu1 %v212_v9, %s5935_s8  ;;  %235 = vrot.lane.b32.xlu0 %v212_v9, %s5936_s9 }
  0x2b   : > { %221 = vrot.lane.b32.xlu1 %v218_v12, %s5935_s8  ;;  %237 = vrot.lane.b32.xlu0 %v218_v12, %s5936_s9 }
  0x2c   : > { %v1102_v19 = vld [vmem:[#allocation2] sm:$0xff]  ;;  %v1103_v21 = vld [vmem:[#allocation2 + $0x8] sm:$0xf] }
  0x2d   : > { %v1106_v20 = vcombine.high %v1102_v19, %v1102_v19  ;;  %v1288_v22 = vld [vmem:[#allocation2 + $0x8] sm:$0xf] }
  0x2e   : > { %v1388_v23 = vld [vmem:[#allocation2 + $0x8] sm:$0xf] }
  0x2f   : > { %415 = vrot.lane.b32.xlu1 %v405_v10, %s5938_s10  ;;  %413 = vrot.lane.b32.xlu0 %v218_v12, %s5938_s10 }
  0x33   : > { %515 = vrot.lane.b32.xlu1 %v218_v12, %s5939_s11  ;;  %411 = vrot.lane.b32.xlu0 %v212_v9, %s5938_s10 }
  0x37   : > { %513 = vrot.lane.b32.xlu1 %v212_v9, %s5939_s11  ;;  %517 = vrot.lane.b32.xlu0 %v509_v11, %s5939_s11 }
  0x3b   : > { %704 = vrot.lane.b32.xlu1 %v696_v15, %s5940_s12  ;;  %702 = vrot.lane.b32.xlu0 %v6076_v14, %s5940_s12  ;;  %v6235_v15 = vld [vmem:[%s7037_s3 + $0x30] sm:$0xff] }
  0x3f   : > { %804 = vrot.lane.b32.xlu1 %v6076_v14, %s5941_s13  ;;  %700 = vrot.lane.b32.xlu0 %v6051_v6, %s5940_s12 }
  0x43   : > { %802 = vrot.lane.b32.xlu1 %v6051_v6, %s5941_s13  ;;  %806 = vrot.lane.b32.xlu0 %v798_v16, %s5941_s13 }
  0x47   : > { %910 = vrot.lane.b32.xlu1 %v900_v17, %s5942_s14  ;;  %908 = vrot.lane.b32.xlu0 %v6076_v14, %s5942_s14 }
  0x4b   : > { %1002 = vrot.lane.b32.xlu1 %v6076_v14, %s5943_s20  ;;  %906 = vrot.lane.b32.xlu0 %v6051_v6, %s5942_s14 }
  0x4f   : > { %1000 = vrot.lane.b32.xlu1 %v6051_v6, %s5943_s20  ;;  %1004 = vrot.lane.b32.xlu0 %v996_v18, %s5943_s20 }
  0x53   : > { %1125 = vrot.lane.b32.xlu1 %v1103_v21, %s5936_s9  ;;  %1123 = vrot.lane.b32.xlu0 %v1106_v20, %s5936_s9 }
  0x57   : > { %1111 = vrot.lane.b32.xlu1 %v1103_v21, %s5935_s8  ;;  %1109 = vrot.lane.b32.xlu0 %v1106_v20, %s5935_s8  ;;  %v6247_v21 = vld [vmem:[%s7037_s3 + $0x38] sm:$0xff] }
  0x5b   : > { %1107 = vrot.lane.b32.xlu1 %v1102_v19, %s5935_s8  ;;  %1121 = vrot.lane.b32.xlu0 %v1102_v19, %s5936_s9 }
  0x5f   : > { %1296 = vrot.lane.b32.xlu1 %v1288_v22, %s5938_s10  ;;  %1294 = vrot.lane.b32.xlu0 %v1106_v20, %s5938_s10 }
  0x63   : > { %1394 = vrot.lane.b32.xlu1 %v1106_v20, %s5939_s11  ;;  %1292 = vrot.lane.b32.xlu0 %v1102_v19, %s5938_s10 }
  0x67   : > { %1392 = vrot.lane.b32.xlu1 %v1102_v19, %s5939_s11  ;;  %1396 = vrot.lane.b32.xlu0 %v1388_v23, %s5939_s11 }
  0x6b   : > { %1580 = vrot.lane.b32.xlu1 %v1572_v25, %s5940_s12  ;;  %1578 = vrot.lane.b32.xlu0 %v6112_v24, %s5940_s12 }
  0x6f   : > { %1678 = vrot.lane.b32.xlu1 %v6112_v24, %s5941_s13  ;;  %1576 = vrot.lane.b32.xlu0 %v6057_v7, %s5940_s12 }
  0x73   : > { %1676 = vrot.lane.b32.xlu1 %v6057_v7, %s5941_s13  ;;  %1680 = vrot.lane.b32.xlu0 %v1672_v26, %s5941_s13 }
  0x77   : > { %1781 = vrot.lane.b32.xlu1 %v1772_v27, %s5942_s14  ;;  %1779 = vrot.lane.b32.xlu0 %v6112_v24, %s5942_s14 }
  0x7b   : > { %1872 = vrot.lane.b32.xlu1 %v6112_v24, %s5943_s20  ;;  %1777 = vrot.lane.b32.xlu0 %v6057_v7, %s5942_s14 }
  0x7f   : > { %1870 = vrot.lane.b32.xlu1 %v6057_v7, %s5943_s20  ;;  %1874 = vrot.lane.b32.xlu0 %v1866_v28, %s5943_s20 }
  0x95   : > { %v224_v29 = vpop.permute.xlu1 %223  ;;  %v240_v30 = vpop.permute.xlu0 %239 }
  0x99   : > { %v220_v31 = vpop.permute.xlu1 %219  ;;  %v236_v32 = vpop.permute.xlu0 %235 }
  0x9d   : > { %v222_v33 = vpop.permute.xlu1 %221  ;;  %v238_v34 = vpop.permute.xlu0 %237 }
  0x9e   : > { %v226_v35 = vsel %vm225_vm0, %v220_v31, %v222_v33  ;;  %v243_v36 = vsel %vm241_vm1, %v238_v34, %v240_v30  ;;  %v242_v37 = vsel %vm241_vm1, %v236_v32, %v238_v34  ;;  %v227_v38 = vsel %vm225_vm0, %v222_v33, %v224_v29  ;;  %v6263_v30 = vld [vmem:[%s7037_s3 + $0x40] sm:$0xff] }
  0x9f   : > { %5563 = vmatprep.subr.msk.mxu0 %vm248_vm2, %v243_v36  ;;  %v231_v40 = vsel %vm215_vm3, %v227_v38, 0.0  ;;  %v230_v41 = vsel %vm214_vm4, %v226_v35, 0.0 }
  0xa0   : > { %5564 = vmatpush1.msk.msra.mxu0 %vm248_vm2, %v242_v37  ;;  %5566 = vmatprep.subr.msk.mxu1 %vm248_vm2, %v231_v40 }
  0xa1   : > { %5567 = vmatpush1.msk.msra.mxu1 %vm248_vm2, %v230_v41  ;;  %v416_v43 = vpop.permute.xlu1 %415  ;;  %v414_v44 = vpop.permute.xlu0 %413  ;;  %5565 = vmatmul.mubr.msk.f32.vlgmr.msra.gmra.mxu0 %vm244_vm5, %v6143_v39 }
  0xa2   : > { %v419_v45 = vsel %vm417_vm6, %v414_v44, %v416_v43  ;;  %5568 = vmatmul.mubr.msk.f32.vlgmr.msra.gmra.mxu1 %vm244_vm5, %v6153_v42  ;;  %499 = vmatprep.mubr.f32.mxu0 %v5937_v13 }
  0xa3   : > { %v423_v46 = vsel %vm407_vm7, %v419_v45, 0.0  ;;  %601 = vmatprep.mubr.f32.mxu1 %v5937_v13 }
  0xa4   : > { %5570 = vmatprep.subr.msk.mxu0 %vm248_vm2, %v423_v46 }
  0xa5   : > { %v516_v47 = vpop.permute.xlu1 %515  ;;  %v412_v48 = vpop.permute.xlu0 %411 }
  0xa6   : > { %v418_v49 = vsel %vm417_vm6, %v412_v48, %v414_v44 }
  0xa7   : > { %v422_v51 = vsel %vm406_vm8, %v418_v49, 0.0 }
  0xa8   : > { %5571 = vmatpush1.msk.msra.mxu0 %vm248_vm2, %v422_v51 }
  0xa9   : > { %v514_v52 = vpop.permute.xlu1 %513  ;;  %v518_v53 = vpop.permute.xlu0 %517  ;;  %5572 = vmatmul.mubr.msk.f32.vlgmr.msra.gmra.mxu0 %vm244_vm5, %v6174_v50  ;;  %5578 = vmatprep.subr.msk.mxu0 %vm248_vm2, %v6076_v14 }
  0xaa   : > { %v520_v54 = vsel %vm519_vm9, %v514_v52, %v516_v47  ;;  %v521_v55 = vsel %vm519_vm9, %v516_v47, %v518_v53  ;;  %5579 = vmatpush1.msk.msra.mxu0 %vm248_vm2, %v6051_v6  ;;  %686 = vmatprep.mubr.f32.mxu0 %v5937_v13 }
  0xab   : > { %v524_v57 = vsel %vm214_vm4, %v520_v54, 0.0  ;;  %v525_v58 = vsel %vm215_vm3, %v521_v55, 0.0 }
  0xac   : > { %5574 = vmatprep.subr.msk.mxu1 %vm248_vm2, %v525_v58 }
  0xad   : > { %v705_v60 = vpop.permute.xlu1 %704  ;;  %5575 = vmatpush1.msk.msra.mxu1 %vm248_vm2, %v524_v57  ;;  %v703_v61 = vpop.permute.xlu0 %702  ;;  %5580 = vmatmul.mubr.msk.f32.vlgmr.msra.gmra.mxu0 %vm244_vm5, %v6191_v56 }
  0xae   : > { %v708_v62 = vsel %vm706_vm10, %v703_v61, %v705_v60  ;;  %5576 = vmatmul.mubr.msk.f32.vlgmr.msra.gmra.mxu1 %vm244_vm5, %v6200_v59  ;;  %890 = vmatprep.mubr.f32.mxu0 %v5937_v13 }
  0xaf   : > { %v712_v63 = vsel %vm407_vm7, %v708_v62, 0.0  ;;  %788 = vmatprep.mubr.f32.mxu1 %v5937_v13 }
  0xb0   : > { %5582 = vmatprep.subr.msk.mxu1 %vm248_vm2, %v712_v63 }
  0xb1   : > { %v805_v0 = vpop.permute.xlu1 %804  ;;  %v701_v1 = vpop.permute.xlu0 %700 }
  0xb2   : > { %v707_v2 = vsel %vm706_vm10, %v701_v1, %v703_v61 }
  0xb3   : > { %v711_v6 = vsel %vm406_vm8, %v707_v2, 0.0 }
  0xb4   : > { %5583 = vmatpush1.msk.msra.mxu1 %vm248_vm2, %v711_v6 }
  0xb5   : > { %v803_v8 = vpop.permute.xlu1 %802  ;;  %v807_v9 = vpop.permute.xlu0 %806  ;;  %5584 = vmatmul.mubr.msk.f32.vlgmr.msra.gmra.mxu1 %vm244_vm5, %v6218_v3 }
  0xb6   : > { %v809_v10 = vsel %vm808_vm11, %v803_v8, %v805_v0  ;;  %v810_v11 = vsel %vm808_vm11, %v805_v0, %v807_v9  ;;  %986 = vmatprep.mubr.f32.mxu1 %v5937_v13 }
  0xb7   : > { %v813_v12 = vsel %vm214_vm4, %v809_v10, 0.0  ;;  %v814_v14 = vsel %vm215_vm3, %v810_v11, 0.0 }
  0xb8   : > { %5586 = vmatprep.subr.msk.mxu0 %vm248_vm2, %v814_v14 }
  0xb9   : > { %v911_v16 = vpop.permute.xlu1 %910  ;;  %5587 = vmatpush1.msk.msra.mxu0 %vm248_vm2, %v813_v12  ;;  %v909_v17 = vpop.permute.xlu0 %908 }
  0xba   : > { %v914_v18 = vsel %vm912_vm12, %v909_v17, %v911_v16  ;;  %5588 = vmatmul.mubr.msk.f32.vlgmr.msra.gmra.mxu0 %vm244_vm5, %v6235_v15 }
  0xbb   : > { %5590 = vmatprep.subr.msk.mxu1 %vm248_vm2, %v914_v18  ;;  %1088 = vmatprep.mubr.f32.mxu0 %v5937_v13 }
  0xbd   : > { %v1003_v19 = vpop.permute.xlu1 %1002  ;;  %v907_v20 = vpop.permute.xlu0 %906 }
  0xbe   : > { %v913_v22 = vsel %vm912_vm12, %v907_v20, %v909_v17 }
  0xbf   : > { %5591 = vmatpush1.msk.msra.mxu1 %vm248_vm2, %v913_v22 }
  0xc0   : > { %5592 = vmatmul.mubr.msk.f32.vlgmr.msra.gmra.mxu1 %vm244_vm5, %v6247_v21 }
  0xc1   : > { %v1001_v23 = vpop.permute.xlu1 %1000  ;;  %v1005_v25 = vpop.permute.xlu0 %1004  ;;  %1200 = vmatprep.mubr.f32.mxu1 %v5937_v13 }
  0xc2   : > { %v1007_v26 = vsel %vm1006_vm13, %v1001_v23, %v1003_v19  ;;  %v1008_v27 = vsel %vm1006_vm13, %v1003_v19, %v1005_v25 }
  0xc3   : > { %v1011_v28 = vsel %vm406_vm8, %v1007_v26, 0.0  ;;  %v1012_v29 = vsel %vm407_vm7, %v1008_v27, 0.0 }
  0xc4   : > { %5594 = vmatprep.subr.msk.mxu0 %vm248_vm2, %v1012_v29 }
  0xc5   : > { %v1126_v31 = vpop.permute.xlu1 %1125  ;;  %5595 = vmatpush1.msk.msra.mxu0 %vm248_vm2, %v1011_v28  ;;  %v1124_v32 = vpop.permute.xlu0 %1123 }
  0xc6   : > { %v1128_v33 = vsel %vm241_vm1, %v1124_v32, %v1126_v31  ;;  %5596 = vmatmul.mubr.msk.f32.vlgmr.msra.gmra.mxu0 %vm244_vm5, %v6263_v30 }
  0xc7   : > { %5599 = vmatprep.subr.msk.mxu1 %vm248_vm2, %v1128_v33  ;;  %1280 = vmatprep.mubr.f32.mxu0 %v5937_v13 }
  0xc9   : > { %v1112_v34 = vpop.permute.xlu1 %1111  ;;  %v1110_v35 = vpop.permute.xlu0 %1109 }
  0xca   : > { %v1114_v36 = vsel %vm225_vm0, %v1110_v35, %v1112_v34 }
  0xcb   : > { %v1118_v37 = vsel %vm215_vm3, %v1114_v36, 0.0 }
  0xcc   : > { %5602 = vmatprep.subr.msk.mxu0 %vm248_vm2, %v1118_v37 }
  0xcd   : > { %v1108_v38 = vpop.permute.xlu1 %1107  ;;  %v1122_v40 = vpop.permute.xlu0 %1121 }
  0xce   : > { %v1113_v41 = vsel %vm225_vm0, %v1108_v38, %v1110_v35  ;;  %v1127_v43 = vsel %vm241_vm1, %v1122_v40, %v1124_v32 }
  0xcf   : > { %v1117_v44 = vsel %vm214_vm4, %v1113_v41, 0.0  ;;  %5600 = vmatpush1.msk.msra.mxu1 %vm248_vm2, %v1127_v43 }
  0xd0   : > { %5603 = vmatpush1.msk.msra.mxu0 %vm248_vm2, %v1117_v44  ;;  %5601 = vmatmul.mubr.msk.f32.vlgmr.msra.gmra.mxu1 %vm244_vm5, %v6143_v39 }
  0xd1   : > { %v1297_v45 = vpop.permute.xlu1 %1296  ;;  %v1295_v46 = vpop.permute.xlu0 %1294  ;;  %5604 = vmatmul.mubr.msk.f32.vlgmr.msra.gmra.mxu0 %vm244_vm5, %v6153_v42  ;;  %1378 = vmatprep.mubr.f32.mxu1 %v5937_v13 }
  0xd2   : > { %v1299_v47 = vsel %vm417_vm6, %v1295_v46, %v1297_v45  ;;  %1478 = vmatprep.mubr.f32.mxu0 %v5937_v13 }
  0xd3   : > { %v1303_v48 = vsel %vm407_vm7, %v1299_v47, 0.0 }
  0xd4   : > { %5606 = vmatprep.subr.msk.mxu1 %vm248_vm2, %v1303_v48 }
  0xd5   : > { %v1395_v49 = vpop.permute.xlu1 %1394  ;;  %v1293_v51 = vpop.permute.xlu0 %1292 }
  0xd6   : > { %v1298_v39 = vsel %vm417_vm6, %v1293_v51, %v1295_v46 }
  0xd7   : > { %v1302_v52 = vsel %vm406_vm8, %v1298_v39, 0.0 }
  0xd8   : > { %5607 = vmatpush1.msk.msra.mxu1 %vm248_vm2, %v1302_v52 }
  0xd9   : > { %v1393_v42 = vpop.permute.xlu1 %1392  ;;  %v1397_v53 = vpop.permute.xlu0 %1396  ;;  %5608 = vmatmul.mubr.msk.f32.vlgmr.msra.gmra.mxu1 %vm244_vm5, %v6174_v50  ;;  %5614 = vmatprep.subr.msk.mxu1 %vm248_vm2, %v6112_v24 }
  0xda   : > { %v1398_v54 = vsel %vm519_vm9, %v1393_v42, %v1395_v49  ;;  %v1399_v55 = vsel %vm519_vm9, %v1395_v49, %v1397_v53  ;;  %5615 = vmatpush1.msk.msra.mxu1 %vm248_vm2, %v6057_v7  ;;  %1562 = vmatprep.mubr.f32.mxu1 %v5937_v13 }
  0xdb   : > { %v1402_v57 = vsel %vm214_vm4, %v1398_v54, 0.0  ;;  %v1403_v58 = vsel %vm215_vm3, %v1399_v55, 0.0 }
  0xdc   : > { %5610 = vmatprep.subr.msk.mxu0 %vm248_vm2, %v1403_v58 }
  0xdd   : > { %v1581_v50 = vpop.permute.xlu1 %1580  ;;  %5611 = vmatpush1.msk.msra.mxu0 %vm248_vm2, %v1402_v57  ;;  %v1579_v24 = vpop.permute.xlu0 %1578  ;;  %5616 = vmatmul.mubr.msk.f32.vlgmr.msra.gmra.mxu1 %vm244_vm5, %v6191_v56 }
  0xde   : > { %v1583_v60 = vsel %vm706_vm10, %v1579_v24, %v1581_v50  ;;  %5612 = vmatmul.mubr.msk.f32.vlgmr.msra.gmra.mxu0 %vm244_vm5, %v6200_v59  ;;  %1762 = vmatprep.mubr.f32.mxu1 %v5937_v13 }
  0xdf   : > { %v1587_v7 = vsel %vm407_vm7, %v1583_v60, 0.0  ;;  %1662 = vmatprep.mubr.f32.mxu0 %v5937_v13 }
  0xe0   : > { %5618 = vmatprep.subr.msk.mxu0 %vm248_vm2, %v1587_v7 }
  0xe1   : > { %v1679_v61 = vpop.permute.xlu1 %1678  ;;  %v1577_v62 = vpop.permute.xlu0 %1576 }
  0xe2   : > { %v1582_v63 = vsel %vm706_vm10, %v1577_v62, %v1579_v24 }
  0xe3   : > { %v1586_v56 = vsel %vm406_vm8, %v1582_v63, 0.0 }
  0xe4   : > { %5619 = vmatpush1.msk.msra.mxu0 %vm248_vm2, %v1586_v56 }
  0xe5   : > { %v1677_v0 = vpop.permute.xlu1 %1676  ;;  %v1681_v59 = vpop.permute.xlu0 %1680  ;;  %5620 = vmatmul.mubr.msk.f32.vlgmr.msra.gmra.mxu0 %vm244_vm5, %v6218_v3 }
  0xe6   : > { %v1682_v1 = vsel %vm808_vm11, %v1677_v0, %v1679_v61  ;;  %v1683_v2 = vsel %vm808_vm11, %v1679_v61, %v1681_v59  ;;  %1856 = vmatprep.mubr.f32.mxu0 %v5937_v13 }
  0xe7   : > { %v1686_v6 = vsel %vm214_vm4, %v1682_v1, 0.0  ;;  %v1687_v8 = vsel %vm215_vm3, %v1683_v2, 0.0 }
  0xe8   : > { %5622 = vmatprep.subr.msk.mxu1 %vm248_vm2, %v1687_v8 }
  0xe9   : > { %v1782_v9 = vpop.permute.xlu1 %1781  ;;  %5623 = vmatpush1.msk.msra.mxu1 %vm248_vm2, %v1686_v6  ;;  %v1780_v10 = vpop.permute.xlu0 %1779 }
  0xea   : > { %v1784_v3 = vsel %vm912_vm12, %v1780_v10, %v1782_v9  ;;  %5624 = vmatmul.mubr.msk.f32.vlgmr.msra.gmra.mxu1 %vm244_vm5, %v6235_v15 }
  0xeb   : > { %5626 = vmatprep.subr.msk.mxu0 %vm248_vm2, %v1784_v3  ;;  %1956 = vmatprep.mubr.f32.mxu1 %v5937_v13 }
  0xed   : > { %v1873_v11 = vpop.permute.xlu1 %1872  ;;  %v1778_v12 = vpop.permute.xlu0 %1777 }
  0xee   : > { %v1783_v14 = vsel %vm912_vm12, %v1778_v12, %v1780_v10 }
  0xef   : > { %5627 = vmatpush1.msk.msra.mxu0 %vm248_vm2, %v1783_v14 }
  0xf0   : > { %5628 = vmatmul.mubr.msk.f32.vlgmr.msra.gmra.mxu0 %vm244_vm5, %v6247_v21 }
  0xf1   : > { %v1871_v16 = vpop.permute.xlu1 %1870  ;;  %v1875_v17 = vpop.permute.xlu0 %1874 }
  0xf2   : > { %v1876_v18 = vsel %vm1006_vm13, %v1871_v16, %v1873_v11  ;;  %v1877_v19 = vsel %vm1006_vm13, %v1873_v11, %v1875_v17 }
  0xf3   : > { %v1880_v15 = vsel %vm406_vm8, %v1876_v18, 0.0  ;;  %v1881_v13 = vsel %vm407_vm7, %v1877_v19, 0.0 }
  0xf4   : > { %5630 = vmatprep.subr.msk.mxu1 %vm248_vm2, %v1881_v13 }
  0xf5   : > { %5631 = vmatpush1.msk.msra.mxu1 %vm248_vm2, %v1880_v15 }
  0xf6   : > { %5632 = vmatmul.mubr.msk.f32.vlgmr.msra.gmra.mxu1 %vm244_vm5, %v6263_v30 }
 0x161   : > { %v319_v20 = vpop.f32.mrf.mxu0 }
 0x162   : > { %v399_v22 = vpop.f32.mrf.mxu1 }
 0x163   : > { %v321_v21 = vpop.f32.mrf.mxu0  ;;  %v400_v26 = vadd.f32 %v399_v22, %v319_v20 }
 0x164   : > { %v401_v23 = vpop.f32.mrf.mxu1 }
 0x165   : > { %v402_v27 = vadd.f32 %v401_v23, %v321_v21 }
 0x169   : > { %v501_v25 = vpop.f32.mrf.mxu0 }
 0x16a   : > { %v506_v31 = vadd.f32 %v501_v25, %v400_v26 }
 0x16b   : > { %v503_v28 = vpop.f32.mrf.mxu0 }
 0x16c   : > { %v507_v32 = vadd.f32 %v503_v28, %v402_v27 }
 0x16d   : > { %v688_v34 = vpop.f32.mrf.mxu0 }
 0x16e   : > { %v603_v29 = vpop.f32.mrf.mxu1 }
 0x16f   : > { %v608_v35 = vadd.f32 %v603_v29, %v506_v31  ;;  %v690_v37 = vpop.f32.mrf.mxu0 }
 0x170   : > { %v605_v33 = vpop.f32.mrf.mxu1 }
 0x171   : > { %v609_v36 = vadd.f32 %v605_v33, %v507_v32  ;;  %v693_v40 = vadd.f32 %v688_v34, %v608_v35 }
 0x173   : > { %v694_v30 = vadd.f32 %v690_v37, %v609_v36 }
 0x175   : > { %v790_v38 = vpop.f32.mrf.mxu1 }
 0x176   : > { %v795_v44 = vadd.f32 %v790_v38, %v693_v40 }
 0x177   : > { %v792_v41 = vpop.f32.mrf.mxu1 }
 0x178   : > { %v796_v45 = vadd.f32 %v792_v41, %v694_v30 }
 0x17a   : > { %v892_v43 = vpop.f32.mrf.mxu0 }
 0x17b   : > { %v897_v47 = vadd.f32 %v892_v43, %v795_v44 }
 0x17c   : > { %v894_v46 = vpop.f32.mrf.mxu0 }
 0x17d   : > { %v898_v49 = vadd.f32 %v894_v46, %v796_v45 }
 0x180   : > { %v988_v48 = vpop.f32.mrf.mxu1 }
 0x181   : > { %v993_v39 = vadd.f32 %v988_v48, %v897_v47 }
 0x182   : > { %v990_v51 = vpop.f32.mrf.mxu1 }
 0x183   : > { %v994_v52 = vadd.f32 %v990_v51, %v898_v49 }
 0x186   : > { %v1090_v42 = vpop.f32.mrf.mxu0 }
 0x187   : > { %v1095_v53 = vadd.f32 %v1090_v42, %v993_v39 }
 0x188   : > { %v1092_v54 = vpop.f32.mrf.mxu0 }
 0x189   : > { %1097 = vst [vmem:[%s6045_s29] sm:$0xff] %v1095_v53  ;;  %v1096_v55 = vadd.f32 %v1092_v54, %v994_v52 }
 0x18b   : > { %1098 = vst [vmem:[%s6045_s29 + $0x8] sm:$0xff] %v1096_v55 }
 0x190   : > { %v1202_v57 = vpop.f32.mrf.mxu1 }
 0x191   : > { %v1282_v50 = vpop.f32.mrf.mxu0 }
 0x192   : > { %v1204_v58 = vpop.f32.mrf.mxu1  ;;  %v1283_v7 = vadd.f32 %v1282_v50, %v1202_v57 }
 0x193   : > { %v1284_v24 = vpop.f32.mrf.mxu0 }
 0x194   : > { %v1285_v61 = vadd.f32 %v1284_v24, %v1204_v58 }
 0x199   : > { %v1380_v60 = vpop.f32.mrf.mxu1 }
 0x19a   : > { %v1385_v56 = vadd.f32 %v1380_v60, %v1283_v7 }
 0x19b   : > { %v1382_v62 = vpop.f32.mrf.mxu1 }
 0x19c   : > { %v1386_v0 = vadd.f32 %v1382_v62, %v1285_v61 }
 0x19d   : > { %v1564_v1 = vpop.f32.mrf.mxu1 }
 0x19e   : > { %v1480_v63 = vpop.f32.mrf.mxu0 }
 0x19f   : > { %v1485_v2 = vadd.f32 %v1480_v63, %v1385_v56  ;;  %v1566_v8 = vpop.f32.mrf.mxu1 }
 0x1a0   : > { %v1482_v59 = vpop.f32.mrf.mxu0 }
 0x1a1   : > { %v1486_v6 = vadd.f32 %v1482_v59, %v1386_v0  ;;  %v1569_v10 = vadd.f32 %v1564_v1, %v1485_v2 }
 0x1a3   : > { %v1570_v3 = vadd.f32 %v1566_v8, %v1486_v6 }
 0x1a5   : > { %v1664_v9 = vpop.f32.mrf.mxu0 }
 0x1a6   : > { %v1669_v14 = vadd.f32 %v1664_v9, %v1569_v10 }
 0x1a7   : > { %v1666_v11 = vpop.f32.mrf.mxu0 }
 0x1a8   : > { %v1670_v16 = vadd.f32 %v1666_v11, %v1570_v3 }
 0x1aa   : > { %v1764_v12 = vpop.f32.mrf.mxu1 }
 0x1ab   : > { %v1769_v19 = vadd.f32 %v1764_v12, %v1669_v14 }
 0x1ac   : > { %v1766_v17 = vpop.f32.mrf.mxu1 }
 0x1ad   : > { %v1770_v15 = vadd.f32 %v1766_v17, %v1670_v16 }
 0x1b0   : > { %v1858_v18 = vpop.f32.mrf.mxu0 }
 0x1b1   : > { %v1863_v20 = vadd.f32 %v1858_v18, %v1769_v19 }
 0x1b2   : > { %v1860_v13 = vpop.f32.mrf.mxu0 }
 0x1b3   : > { %v1864_v22 = vadd.f32 %v1860_v13, %v1770_v15 }
 0x1b6   : > { %v1958_v21 = vpop.f32.mrf.mxu1 }
 0x1b7   : > { %v1963_v23 = vadd.f32 %v1958_v21, %v1863_v20 }
 0x1b8   : > { %v1960_v25 = vpop.f32.mrf.mxu1 }
 0x1b9   : > { %5633 = vst [vmem:[%s6045_s29 + $0x10] sm:$0xff] %v1963_v23  ;;  %v1964_v26 = vadd.f32 %v1960_v25, %v1864_v22 }
 0x1bb   : > { %5634 = vst [vmem:[%s6045_s29 + $0x18] sm:$0xff] %v1964_v26 }
 0x1bc PF: > { %p5635_p11 = scmp.ne.s32.totalorder %s6011_s19, 1 }
 0x1bd   : > { %s5944_s8 = smov (!%p5635_p11), 34   ;;  %s5945_s9 = smov (!%p5635_p11), 32  }
 0x1be   : > { %1971 = sbr.rel (%p5635_p11) target bundleno = 869 (0x365), region = 44  ;;  %s5947_s10 = smov (!%p5635_p11), 30  }
 0x1bf   : > { %s5948_s11 = smov (!%p5635_p11), 2   ;;  %s5949_s12 = smov (!%p5635_p11), 126  }
 0x1c0   : > { %s5950_s13 = smov (!%p5635_p11), 98   ;;  %s5951_s14 = smov (!%p5635_p11), 96  }
 0x1c1   : > { %s5952_s20 = smov (!%p5635_p11), 94  }
 0x1c3   : > { %v6363_v27 = vld [vmem:[%s7035_s1] sm:$0xff]  ;;  %v6369_v28 = vld [vmem:[%s7035_s1 + $0x8] sm:$0xff]  ;;  %v5946_v35 = vmov 0.0   ;;  %vm1987_vm14 = vcmask 277504   ;;  %vm2003_vm15 = vcmask 261120   ;;  %vm2010_vm0 = vcmask 1043456  }
 0x1c4   : > { %1973 = vst [vmem:[#allocation2 + $0x4] sm:$0xff] %v6363_v27  ;;  %2079 = vmatprep.mubr.f32.mxu0 %v5946_v35  ;;  %2159 = vmatprep.mubr.f32.mxu1 %v5946_v35  ;;  %v6388_v36 = vcombine.high %v6363_v27, %v6363_v27  ;;  %v2458_v37 = vld [vmem:[#allocation2 + $0xc] sm:$0xf]  ;;  %v6424_v47 = vcombine.high %v6369_v28, %v6369_v28  ;;  %vm1977_vm1 = vcmp.ge.s32.totalorder %v6043_v5, 2  ;;  %vm1976_vm2 = vcmp.ge.s32.totalorder %v6041_v4, 2  ;;  %v6465_v63 = vld [vmem:[%s7037_s3] sm:$0xff] }
 0x1c5   : > { %v2560_v38 = vld [vmem:[#allocation2 + $0xc] sm:$0xf]  ;;  %vm2006_vm3 = vcmask 31744   ;;  %vm2179_vm4 = vcmask 244736   ;;  %vm2169_vm5 = vcmp.lt.s32.totalorder %v6043_v5, 14  ;;  %vm2168_vm6 = vcmp.lt.s32.totalorder %v6041_v4, 14 }
 0x1c6   : > { %v2662_v40 = vld [vmem:[#allocation2 + $0xc] sm:$0xf]  ;;  %v6486_v9 = vld [vmem:[%s7037_s3 + $0x10] sm:$0xff]  ;;  %vm2281_vm7 = vcmask 15360   ;;  %v6503_v16 = vld [vmem:[%s7037_s3 + $0x20] sm:$0xff]  ;;  %vm2468_vm8 = vcmask 1031168  }
 0x1c7   : > { %v2758_v30 = vld [vmem:[#allocation2 + $0xc] sm:$0xf]  ;;  %v6512_v19 = vld [vmem:[%s7037_s3 + $0x18] sm:$0xff]  ;;  %vm2570_vm9 = vcmask 801792   ;;  %vm2674_vm10 = vcmask 785408   ;;  %vm2768_vm11 = vcmask 769024  }
 0x1c8   : > { %v3334_v48 = vld [vmem:[#allocation2 + $0xc] sm:$0xf] }
 0x1c9   : > { %v3434_v49 = vld [vmem:[#allocation2 + $0xc] sm:$0xf] }
 0x1ca   : > { %v3534_v51 = vld [vmem:[#allocation2 + $0xc] sm:$0xf] }
 0x1cb   : > { %v1975_v29 = vld [vmem:[#allocation2 + $0x8] sm:$0xf]  ;;  %v1974_v31 = vld [vmem:[#allocation2] sm:$0xff]  ;;  %v3628_v39 = vld [vmem:[#allocation2 + $0xc] sm:$0xf] }
 0x1cc   : > { %1985 = vrot.lane.b32.xlu1 %v1975_v29, %s5944_s8  ;;  %2001 = vrot.lane.b32.xlu0 %v1975_v29, %s5945_s9  ;;  %v2167_v32 = vld [vmem:[#allocation2 + $0x8] sm:$0xf]  ;;  %v1980_v34 = vcombine.high %v1974_v31, %v1974_v31 }
 0x1cd   : > { %v2271_v33 = vld [vmem:[#allocation2 + $0x8] sm:$0xf] }
 0x1ce   : > { %2863 = vst [vmem:[#allocation2 + $0x4] sm:$0xff] %v6369_v28  ;;  %v6455_v7 = vld [vmem:[%s7037_s3 + $0x8] sm:$0xff] }
 0x1cf   : > { %v6530_v26 = vld [vmem:[%s7037_s3 + $0x28] sm:$0xff] }
 0x1d0   : > { %1981 = vrot.lane.b32.xlu1 %v1974_v31, %s5944_s8  ;;  %1997 = vrot.lane.b32.xlu0 %v1974_v31, %s5945_s9 }
 0x1d4   : > { %1983 = vrot.lane.b32.xlu1 %v1980_v34, %s5944_s8  ;;  %1999 = vrot.lane.b32.xlu0 %v1980_v34, %s5945_s9 }
 0x1d5   : > { %v2864_v41 = vld [vmem:[#allocation2] sm:$0xff]  ;;  %v2865_v44 = vld [vmem:[#allocation2 + $0x8] sm:$0xf] }
 0x1d6   : > { %v2868_v43 = vcombine.high %v2864_v41, %v2864_v41  ;;  %v3050_v45 = vld [vmem:[#allocation2 + $0x8] sm:$0xf] }
 0x1d7   : > { %v3150_v46 = vld [vmem:[#allocation2 + $0x8] sm:$0xf] }
 0x1d8   : > { %2177 = vrot.lane.b32.xlu1 %v2167_v32, %s5947_s10  ;;  %2175 = vrot.lane.b32.xlu0 %v1980_v34, %s5947_s10 }
 0x1dc   : > { %2277 = vrot.lane.b32.xlu1 %v1980_v34, %s5948_s11  ;;  %2173 = vrot.lane.b32.xlu0 %v1974_v31, %s5947_s10 }
 0x1e0   : > { %2275 = vrot.lane.b32.xlu1 %v1974_v31, %s5948_s11  ;;  %2279 = vrot.lane.b32.xlu0 %v2271_v33, %s5948_s11 }
 0x1e4   : > { %2466 = vrot.lane.b32.xlu1 %v2458_v37, %s5949_s12  ;;  %2464 = vrot.lane.b32.xlu0 %v6388_v36, %s5949_s12  ;;  %v6547_v37 = vld [vmem:[%s7037_s3 + $0x30] sm:$0xff] }
 0x1e8   : > { %2566 = vrot.lane.b32.xlu1 %v6388_v36, %s5950_s13  ;;  %2462 = vrot.lane.b32.xlu0 %v6363_v27, %s5949_s12 }
 0x1ec   : > { %2564 = vrot.lane.b32.xlu1 %v6363_v27, %s5950_s13  ;;  %2568 = vrot.lane.b32.xlu0 %v2560_v38, %s5950_s13 }
 0x1f0   : > { %2672 = vrot.lane.b32.xlu1 %v2662_v40, %s5951_s14  ;;  %2670 = vrot.lane.b32.xlu0 %v6388_v36, %s5951_s14 }
 0x1f4   : > { %2764 = vrot.lane.b32.xlu1 %v6388_v36, %s5952_s20  ;;  %2668 = vrot.lane.b32.xlu0 %v6363_v27, %s5951_s14 }
 0x1f8   : > { %2762 = vrot.lane.b32.xlu1 %v6363_v27, %s5952_s20  ;;  %2766 = vrot.lane.b32.xlu0 %v2758_v30, %s5952_s20 }
 0x1fc   : > { %2887 = vrot.lane.b32.xlu1 %v2865_v44, %s5945_s9  ;;  %2885 = vrot.lane.b32.xlu0 %v2868_v43, %s5945_s9 }
 0x200   : > { %2873 = vrot.lane.b32.xlu1 %v2865_v44, %s5944_s8  ;;  %2871 = vrot.lane.b32.xlu0 %v2868_v43, %s5944_s8  ;;  %v6559_v44 = vld [vmem:[%s7037_s3 + $0x38] sm:$0xff] }
 0x204   : > { %2869 = vrot.lane.b32.xlu1 %v2864_v41, %s5944_s8  ;;  %2883 = vrot.lane.b32.xlu0 %v2864_v41, %s5945_s9 }
 0x208   : > { %3058 = vrot.lane.b32.xlu1 %v3050_v45, %s5947_s10  ;;  %3056 = vrot.lane.b32.xlu0 %v2868_v43, %s5947_s10 }
 0x20c   : > { %3156 = vrot.lane.b32.xlu1 %v2868_v43, %s5948_s11  ;;  %3054 = vrot.lane.b32.xlu0 %v2864_v41, %s5947_s10 }
 0x210   : > { %3154 = vrot.lane.b32.xlu1 %v2864_v41, %s5948_s11  ;;  %3158 = vrot.lane.b32.xlu0 %v3150_v46, %s5948_s11 }
 0x214   : > { %3342 = vrot.lane.b32.xlu1 %v3334_v48, %s5949_s12  ;;  %3340 = vrot.lane.b32.xlu0 %v6424_v47, %s5949_s12 }
 0x218   : > { %3440 = vrot.lane.b32.xlu1 %v6424_v47, %s5950_s13  ;;  %3338 = vrot.lane.b32.xlu0 %v6369_v28, %s5949_s12 }
 0x21c   : > { %3438 = vrot.lane.b32.xlu1 %v6369_v28, %s5950_s13  ;;  %3442 = vrot.lane.b32.xlu0 %v3434_v49, %s5950_s13 }
 0x220   : > { %3543 = vrot.lane.b32.xlu1 %v3534_v51, %s5951_s14  ;;  %3541 = vrot.lane.b32.xlu0 %v6424_v47, %s5951_s14 }
 0x224   : > { %3634 = vrot.lane.b32.xlu1 %v6424_v47, %s5952_s20  ;;  %3539 = vrot.lane.b32.xlu0 %v6369_v28, %s5951_s14 }
 0x228   : > { %3632 = vrot.lane.b32.xlu1 %v6369_v28, %s5952_s20  ;;  %3636 = vrot.lane.b32.xlu0 %v3628_v39, %s5952_s20 }
 0x23e   : > { %v1986_v52 = vpop.permute.xlu1 %1985  ;;  %v2002_v42 = vpop.permute.xlu0 %2001 }
 0x242   : > { %v1982_v53 = vpop.permute.xlu1 %1981  ;;  %v1998_v54 = vpop.permute.xlu0 %1997 }
 0x246   : > { %v1984_v55 = vpop.permute.xlu1 %1983  ;;  %v2000_v57 = vpop.permute.xlu0 %1999 }
 0x247   : > { %v1988_v58 = vsel %vm1987_vm14, %v1982_v53, %v1984_v55  ;;  %v2005_v50 = vsel %vm2003_vm15, %v2000_v57, %v2002_v42  ;;  %v2004_v24 = vsel %vm2003_vm15, %v1998_v54, %v2000_v57  ;;  %v1989_v60 = vsel %vm1987_vm14, %v1984_v55, %v1986_v52  ;;  %v6575_v42 = vld [vmem:[%s7037_s3 + $0x40] sm:$0xff] }
 0x248   : > { %5637 = vmatprep.subr.msk.mxu0 %vm2010_vm0, %v2005_v50  ;;  %v1993_v61 = vsel %vm1977_vm1, %v1989_v60, 0.0  ;;  %v1992_v62 = vsel %vm1976_vm2, %v1988_v58, 0.0 }
 0x249   : > { %5638 = vmatpush1.msk.msra.mxu0 %vm2010_vm0, %v2004_v24  ;;  %5640 = vmatprep.subr.msk.mxu1 %vm2010_vm0, %v1993_v61 }
 0x24a   : > { %5641 = vmatpush1.msk.msra.mxu1 %vm2010_vm0, %v1992_v62  ;;  %v2178_v56 = vpop.permute.xlu1 %2177  ;;  %v2176_v0 = vpop.permute.xlu0 %2175  ;;  %5639 = vmatmul.mubr.msk.f32.vlgmr.msra.gmra.mxu0 %vm2006_vm3, %v6455_v7 }
 0x24b   : > { %v2181_v59 = vsel %vm2179_vm4, %v2176_v0, %v2178_v56  ;;  %5642 = vmatmul.mubr.msk.f32.vlgmr.msra.gmra.mxu1 %vm2006_vm3, %v6465_v63  ;;  %2261 = vmatprep.mubr.f32.mxu0 %v5946_v35 }
 0x24c   : > { %v2185_v1 = vsel %vm2169_vm5, %v2181_v59, 0.0  ;;  %2363 = vmatprep.mubr.f32.mxu1 %v5946_v35 }
 0x24d   : > { %5644 = vmatprep.subr.msk.mxu0 %vm2010_vm0, %v2185_v1 }
 0x24e   : > { %v2278_v2 = vpop.permute.xlu1 %2277  ;;  %v2174_v6 = vpop.permute.xlu0 %2173 }
 0x24f   : > { %v2180_v8 = vsel %vm2179_vm4, %v2174_v6, %v2176_v0 }
 0x250   : > { %v2184_v10 = vsel %vm2168_vm6, %v2180_v8, 0.0 }
 0x251   : > { %5645 = vmatpush1.msk.msra.mxu0 %vm2010_vm0, %v2184_v10 }
 0x252   : > { %v2276_v3 = vpop.permute.xlu1 %2275  ;;  %v2280_v11 = vpop.permute.xlu0 %2279  ;;  %5646 = vmatmul.mubr.msk.f32.vlgmr.msra.gmra.mxu0 %vm2006_vm3, %v6486_v9  ;;  %5652 = vmatprep.subr.msk.mxu0 %vm2010_vm0, %v6388_v36 }
 0x253   : > { %v2282_v12 = vsel %vm2281_vm7, %v2276_v3, %v2278_v2  ;;  %v2283_v14 = vsel %vm2281_vm7, %v2278_v2, %v2280_v11  ;;  %5653 = vmatpush1.msk.msra.mxu0 %vm2010_vm0, %v6363_v27  ;;  %2448 = vmatprep.mubr.f32.mxu0 %v5946_v35 }
 0x254   : > { %v2286_v17 = vsel %vm1976_vm2, %v2282_v12, 0.0  ;;  %v2287_v18 = vsel %vm1977_vm1, %v2283_v14, 0.0 }
 0x255   : > { %5648 = vmatprep.subr.msk.mxu1 %vm2010_vm0, %v2287_v18 }
 0x256   : > { %v2467_v15 = vpop.permute.xlu1 %2466  ;;  %5649 = vmatpush1.msk.msra.mxu1 %vm2010_vm0, %v2286_v17  ;;  %v2465_v13 = vpop.permute.xlu0 %2464  ;;  %5654 = vmatmul.mubr.msk.f32.vlgmr.msra.gmra.mxu0 %vm2006_vm3, %v6503_v16 }
 0x257   : > { %v2470_v20 = vsel %vm2468_vm8, %v2465_v13, %v2467_v15  ;;  %5650 = vmatmul.mubr.msk.f32.vlgmr.msra.gmra.mxu1 %vm2006_vm3, %v6512_v19  ;;  %2652 = vmatprep.mubr.f32.mxu0 %v5946_v35 }
 0x258   : > { %v2474_v21 = vsel %vm2169_vm5, %v2470_v20, 0.0  ;;  %2550 = vmatprep.mubr.f32.mxu1 %v5946_v35 }
 0x259   : > { %5656 = vmatprep.subr.msk.mxu1 %vm2010_vm0, %v2474_v21 }
 0x25a   : > { %v2567_v22 = vpop.permute.xlu1 %2566  ;;  %v2463_v23 = vpop.permute.xlu0 %2462 }
 0x25b   : > { %v2469_v25 = vsel %vm2468_vm8, %v2463_v23, %v2465_v13 }
 0x25c   : > { %v2473_v27 = vsel %vm2168_vm6, %v2469_v25, 0.0 }
 0x25d   : > { %5657 = vmatpush1.msk.msra.mxu1 %vm2010_vm0, %v2473_v27 }
 0x25e   : > { %v2565_v29 = vpop.permute.xlu1 %2564  ;;  %v2569_v31 = vpop.permute.xlu0 %2568  ;;  %5658 = vmatmul.mubr.msk.f32.vlgmr.msra.gmra.mxu1 %vm2006_vm3, %v6530_v26 }
 0x25f   : > { %v2571_v32 = vsel %vm2570_vm9, %v2565_v29, %v2567_v22  ;;  %v2572_v33 = vsel %vm2570_vm9, %v2567_v22, %v2569_v31  ;;  %2748 = vmatprep.mubr.f32.mxu1 %v5946_v35 }
 0x260   : > { %v2575_v34 = vsel %vm1976_vm2, %v2571_v32, 0.0  ;;  %v2576_v36 = vsel %vm1977_vm1, %v2572_v33, 0.0 }
 0x261   : > { %5660 = vmatprep.subr.msk.mxu0 %vm2010_vm0, %v2576_v36 }
 0x262   : > { %v2673_v38 = vpop.permute.xlu1 %2672  ;;  %5661 = vmatpush1.msk.msra.mxu0 %vm2010_vm0, %v2575_v34  ;;  %v2671_v40 = vpop.permute.xlu0 %2670 }
 0x263   : > { %v2676_v30 = vsel %vm2674_vm10, %v2671_v40, %v2673_v38  ;;  %5662 = vmatmul.mubr.msk.f32.vlgmr.msra.gmra.mxu0 %vm2006_vm3, %v6547_v37 }
 0x264   : > { %5664 = vmatprep.subr.msk.mxu1 %vm2010_vm0, %v2676_v30  ;;  %2850 = vmatprep.mubr.f32.mxu0 %v5946_v35 }
 0x266   : > { %v2765_v41 = vpop.permute.xlu1 %2764  ;;  %v2669_v43 = vpop.permute.xlu0 %2668 }
 0x267   : > { %v2675_v45 = vsel %vm2674_vm10, %v2669_v43, %v2671_v40 }
 0x268   : > { %5665 = vmatpush1.msk.msra.mxu1 %vm2010_vm0, %v2675_v45 }
 0x269   : > { %5666 = vmatmul.mubr.msk.f32.vlgmr.msra.gmra.mxu1 %vm2006_vm3, %v6559_v44 }
 0x26a   : > { %v2763_v46 = vpop.permute.xlu1 %2762  ;;  %v2767_v48 = vpop.permute.xlu0 %2766  ;;  %2962 = vmatprep.mubr.f32.mxu1 %v5946_v35 }
 0x26b   : > { %v2769_v49 = vsel %vm2768_vm11, %v2763_v46, %v2765_v41  ;;  %v2770_v51 = vsel %vm2768_vm11, %v2765_v41, %v2767_v48 }
 0x26c   : > { %v2773_v39 = vsel %vm2168_vm6, %v2769_v49, 0.0  ;;  %v2774_v52 = vsel %vm2169_vm5, %v2770_v51, 0.0 }
 0x26d   : > { %5668 = vmatprep.subr.msk.mxu0 %vm2010_vm0, %v2774_v52 }
 0x26e   : > { %v2888_v53 = vpop.permute.xlu1 %2887  ;;  %5669 = vmatpush1.msk.msra.mxu0 %vm2010_vm0, %v2773_v39  ;;  %v2886_v54 = vpop.permute.xlu0 %2885 }
 0x26f   : > { %v2890_v55 = vsel %vm2003_vm15, %v2886_v54, %v2888_v53  ;;  %5670 = vmatmul.mubr.msk.f32.vlgmr.msra.gmra.mxu0 %vm2006_vm3, %v6575_v42 }
 0x270   : > { %5673 = vmatprep.subr.msk.mxu1 %vm2010_vm0, %v2890_v55  ;;  %3042 = vmatprep.mubr.f32.mxu0 %v5946_v35 }
 0x272   : > { %v2874_v57 = vpop.permute.xlu1 %2873  ;;  %v2872_v58 = vpop.permute.xlu0 %2871 }
 0x273   : > { %v2876_v50 = vsel %vm1987_vm14, %v2872_v58, %v2874_v57 }
 0x274   : > { %v2880_v24 = vsel %vm1977_vm1, %v2876_v50, 0.0 }
 0x275   : > { %5676 = vmatprep.subr.msk.mxu0 %vm2010_vm0, %v2880_v24 }
 0x276   : > { %v2870_v60 = vpop.permute.xlu1 %2869  ;;  %v2884_v61 = vpop.permute.xlu0 %2883 }
 0x277   : > { %v2875_v62 = vsel %vm1987_vm14, %v2870_v60, %v2872_v58  ;;  %v2889_v56 = vsel %vm2003_vm15, %v2884_v61, %v2886_v54 }
 0x278   : > { %v2879_v0 = vsel %vm1976_vm2, %v2875_v62, 0.0  ;;  %5674 = vmatpush1.msk.msra.mxu1 %vm2010_vm0, %v2889_v56 }
 0x279   : > { %5677 = vmatpush1.msk.msra.mxu0 %vm2010_vm0, %v2879_v0  ;;  %5675 = vmatmul.mubr.msk.f32.vlgmr.msra.gmra.mxu1 %vm2006_vm3, %v6455_v7 }
 0x27a   : > { %v3059_v59 = vpop.permute.xlu1 %3058  ;;  %v3057_v1 = vpop.permute.xlu0 %3056  ;;  %5678 = vmatmul.mubr.msk.f32.vlgmr.msra.gmra.mxu0 %vm2006_vm3, %v6465_v63  ;;  %3140 = vmatprep.mubr.f32.mxu1 %v5946_v35 }
 0x27b   : > { %v3061_v2 = vsel %vm2179_vm4, %v3057_v1, %v3059_v59  ;;  %3240 = vmatprep.mubr.f32.mxu0 %v5946_v35 }
 0x27c   : > { %v3065_v6 = vsel %vm2169_vm5, %v3061_v2, 0.0 }
 0x27d   : > { %5680 = vmatprep.subr.msk.mxu1 %vm2010_vm0, %v3065_v6 }
 0x27e   : > { %v3157_v8 = vpop.permute.xlu1 %3156  ;;  %v3055_v10 = vpop.permute.xlu0 %3054 }
 0x27f   : > { %v3060_v7 = vsel %vm2179_vm4, %v3055_v10, %v3057_v1 }
 0x280   : > { %v3064_v3 = vsel %vm2168_vm6, %v3060_v7, 0.0 }
 0x281   : > { %5681 = vmatpush1.msk.msra.mxu1 %vm2010_vm0, %v3064_v3 }
 0x282   : > { %v3155_v63 = vpop.permute.xlu1 %3154  ;;  %v3159_v11 = vpop.permute.xlu0 %3158  ;;  %5682 = vmatmul.mubr.msk.f32.vlgmr.msra.gmra.mxu1 %vm2006_vm3, %v6486_v9  ;;  %5688 = vmatprep.subr.msk.mxu1 %vm2010_vm0, %v6424_v47 }
 0x283   : > { %v3160_v12 = vsel %vm2281_vm7, %v3155_v63, %v3157_v8  ;;  %v3161_v14 = vsel %vm2281_vm7, %v3157_v8, %v3159_v11  ;;  %5689 = vmatpush1.msk.msra.mxu1 %vm2010_vm0, %v6369_v28  ;;  %3324 = vmatprep.mubr.f32.mxu1 %v5946_v35 }
 0x284   : > { %v3164_v17 = vsel %vm1976_vm2, %v3160_v12, 0.0  ;;  %v3165_v18 = vsel %vm1977_vm1, %v3161_v14, 0.0 }
 0x285   : > { %5684 = vmatprep.subr.msk.mxu0 %vm2010_vm0, %v3165_v18 }
 0x286   : > { %v3343_v9 = vpop.permute.xlu1 %3342  ;;  %5685 = vmatpush1.msk.msra.mxu0 %vm2010_vm0, %v3164_v17  ;;  %v3341_v47 = vpop.permute.xlu0 %3340  ;;  %5690 = vmatmul.mubr.msk.f32.vlgmr.msra.gmra.mxu1 %vm2006_vm3, %v6503_v16 }
 0x287   : > { %v3345_v15 = vsel %vm2468_vm8, %v3341_v47, %v3343_v9  ;;  %5686 = vmatmul.mubr.msk.f32.vlgmr.msra.gmra.mxu0 %vm2006_vm3, %v6512_v19  ;;  %3524 = vmatprep.mubr.f32.mxu1 %v5946_v35 }
 0x288   : > { %v3349_v28 = vsel %vm2169_vm5, %v3345_v15, 0.0  ;;  %3424 = vmatprep.mubr.f32.mxu0 %v5946_v35 }
 0x289   : > { %5692 = vmatprep.subr.msk.mxu0 %vm2010_vm0, %v3349_v28 }
 0x28a   : > { %v3441_v13 = vpop.permute.xlu1 %3440  ;;  %v3339_v20 = vpop.permute.xlu0 %3338 }
 0x28b   : > { %v3344_v21 = vsel %vm2468_vm8, %v3339_v20, %v3341_v47 }
 0x28c   : > { %v3348_v16 = vsel %vm2168_vm6, %v3344_v21, 0.0 }
 0x28d   : > { %5693 = vmatpush1.msk.msra.mxu0 %vm2010_vm0, %v3348_v16 }
 0x28e   : > { %v3439_v22 = vpop.permute.xlu1 %3438  ;;  %v3443_v19 = vpop.permute.xlu0 %3442  ;;  %5694 = vmatmul.mubr.msk.f32.vlgmr.msra.gmra.mxu0 %vm2006_vm3, %v6530_v26 }
 0x28f   : > { %v3444_v23 = vsel %vm2570_vm9, %v3439_v22, %v3441_v13  ;;  %v3445_v25 = vsel %vm2570_vm9, %v3441_v13, %v3443_v19  ;;  %3618 = vmatprep.mubr.f32.mxu0 %v5946_v35 }
 0x290   : > { %v3448_v27 = vsel %vm1976_vm2, %v3444_v23, 0.0  ;;  %v3449_v29 = vsel %vm1977_vm1, %v3445_v25, 0.0 }
 0x291   : > { %5696 = vmatprep.subr.msk.mxu1 %vm2010_vm0, %v3449_v29 }
 0x292   : > { %v3544_v31 = vpop.permute.xlu1 %3543  ;;  %5697 = vmatpush1.msk.msra.mxu1 %vm2010_vm0, %v3448_v27  ;;  %v3542_v32 = vpop.permute.xlu0 %3541 }
 0x293   : > { %v3546_v26 = vsel %vm2674_vm10, %v3542_v32, %v3544_v31  ;;  %5698 = vmatmul.mubr.msk.f32.vlgmr.msra.gmra.mxu1 %vm2006_vm3, %v6547_v37 }
 0x294   : > { %5700 = vmatprep.subr.msk.mxu0 %vm2010_vm0, %v3546_v26  ;;  %3718 = vmatprep.mubr.f32.mxu1 %v5946_v35 }
 0x296   : > { %v3635_v33 = vpop.permute.xlu1 %3634  ;;  %v3540_v34 = vpop.permute.xlu0 %3539 }
 0x297   : > { %v3545_v36 = vsel %vm2674_vm10, %v3540_v34, %v3542_v32 }
 0x298   : > { %5701 = vmatpush1.msk.msra.mxu0 %vm2010_vm0, %v3545_v36 }
 0x299   : > { %5702 = vmatmul.mubr.msk.f32.vlgmr.msra.gmra.mxu0 %vm2006_vm3, %v6559_v44 }
 0x29a   : > { %v3633_v38 = vpop.permute.xlu1 %3632  ;;  %v3637_v40 = vpop.permute.xlu0 %3636 }
 0x29b   : > { %v3638_v30 = vsel %vm2768_vm11, %v3633_v38, %v3635_v33  ;;  %v3639_v41 = vsel %vm2768_vm11, %v3635_v33, %v3637_v40 }
 0x29c   : > { %v3642_v37 = vsel %vm2168_vm6, %v3638_v30, 0.0  ;;  %v3643_v35 = vsel %vm2169_vm5, %v3639_v41, 0.0 }
 0x29d   : > { %5704 = vmatprep.subr.msk.mxu1 %vm2010_vm0, %v3643_v35 }
 0x29e   : > { %5705 = vmatpush1.msk.msra.mxu1 %vm2010_vm0, %v3642_v37 }
 0x29f   : > { %5706 = vmatmul.mubr.msk.f32.vlgmr.msra.gmra.mxu1 %vm2006_vm3, %v6575_v42 }
 0x30a   : > { %v2081_v43 = vpop.f32.mrf.mxu0 }
 0x30b   : > { %v2161_v45 = vpop.f32.mrf.mxu1 }
 0x30c   : > { %v2083_v44 = vpop.f32.mrf.mxu0  ;;  %v2162_v49 = vadd.f32 %v2161_v45, %v2081_v43 }
 0x30d   : > { %v2163_v46 = vpop.f32.mrf.mxu1 }
 0x30e   : > { %v2164_v51 = vadd.f32 %v2163_v46, %v2083_v44 }
 0x312   : > { %v2263_v48 = vpop.f32.mrf.mxu0 }
 0x313   : > { %v2268_v53 = vadd.f32 %v2263_v48, %v2162_v49 }
 0x314   : > { %v2265_v39 = vpop.f32.mrf.mxu0 }
 0x315   : > { %v2269_v54 = vadd.f32 %v2265_v39, %v2164_v51 }
 0x316   : > { %v2450_v57 = vpop.f32.mrf.mxu0 }
 0x317   : > { %v2365_v52 = vpop.f32.mrf.mxu1 }
 0x318   : > { %v2370_v58 = vadd.f32 %v2365_v52, %v2268_v53  ;;  %v2452_v24 = vpop.f32.mrf.mxu0 }
 0x319   : > { %v2367_v55 = vpop.f32.mrf.mxu1 }
 0x31a   : > { %v2371_v50 = vadd.f32 %v2367_v55, %v2269_v54  ;;  %v2455_v61 = vadd.f32 %v2450_v57, %v2370_v58 }
 0x31c   : > { %v2456_v42 = vadd.f32 %v2452_v24, %v2371_v50 }
 0x31e   : > { %v2552_v60 = vpop.f32.mrf.mxu1 }
 0x31f   : > { %v2557_v0 = vadd.f32 %v2552_v60, %v2455_v61 }
 0x320   : > { %v2554_v62 = vpop.f32.mrf.mxu1 }
 0x321   : > { %v2558_v59 = vadd.f32 %v2554_v62, %v2456_v42 }
 0x323   : > { %v2654_v56 = vpop.f32.mrf.mxu0 }
 0x324   : > { %v2659_v2 = vadd.f32 %v2654_v56, %v2557_v0 }
 0x325   : > { %v2656_v1 = vpop.f32.mrf.mxu0 }
 0x326   : > { %v2660_v8 = vadd.f32 %v2656_v1, %v2558_v59 }
 0x329   : > { %v2750_v6 = vpop.f32.mrf.mxu1 }
 0x32a   : > { %v2755_v7 = vadd.f32 %v2750_v6, %v2659_v2 }
 0x32b   : > { %v2752_v10 = vpop.f32.mrf.mxu1 }
 0x32c   : > { %v2756_v3 = vadd.f32 %v2752_v10, %v2660_v8 }
 0x32f   : > { %v2852_v63 = vpop.f32.mrf.mxu0 }
 0x330   : > { %v2857_v11 = vadd.f32 %v2852_v63, %v2755_v7 }
 0x331   : > { %v2854_v12 = vpop.f32.mrf.mxu0 }
 0x332   : > { %2859 = vst [vmem:[%s6045_s29] sm:$0xff] %v2857_v11  ;;  %v2858_v14 = vadd.f32 %v2854_v12, %v2756_v3 }
 0x334   : > { %2860 = vst [vmem:[%s6045_s29 + $0x8] sm:$0xff] %v2858_v14 }
 0x339   : > { %v2964_v17 = vpop.f32.mrf.mxu1 }
 0x33a   : > { %v3044_v9 = vpop.f32.mrf.mxu0 }
 0x33b   : > { %v2966_v18 = vpop.f32.mrf.mxu1  ;;  %v3045_v28 = vadd.f32 %v3044_v9, %v2964_v17 }
 0x33c   : > { %v3046_v47 = vpop.f32.mrf.mxu0 }
 0x33d   : > { %v3047_v13 = vadd.f32 %v3046_v47, %v2966_v18 }
 0x342   : > { %v3142_v15 = vpop.f32.mrf.mxu1 }
 0x343   : > { %v3147_v16 = vadd.f32 %v3142_v15, %v3045_v28 }
 0x344   : > { %v3144_v20 = vpop.f32.mrf.mxu1 }
 0x345   : > { %v3148_v22 = vadd.f32 %v3144_v20, %v3047_v13 }
 0x346   : > { %v3326_v23 = vpop.f32.mrf.mxu1 }
 0x347   : > { %v3242_v21 = vpop.f32.mrf.mxu0 }
 0x348   : > { %v3247_v25 = vadd.f32 %v3242_v21, %v3147_v16  ;;  %v3328_v29 = vpop.f32.mrf.mxu1 }
 0x349   : > { %v3244_v19 = vpop.f32.mrf.mxu0 }
 0x34a   : > { %v3248_v27 = vadd.f32 %v3244_v19, %v3148_v22  ;;  %v3331_v32 = vadd.f32 %v3326_v23, %v3247_v25 }
 0x34c   : > { %v3332_v26 = vadd.f32 %v3328_v29, %v3248_v27 }
 0x34e   : > { %v3426_v31 = vpop.f32.mrf.mxu0 }
 0x34f   : > { %v3431_v36 = vadd.f32 %v3426_v31, %v3331_v32 }
 0x350   : > { %v3428_v33 = vpop.f32.mrf.mxu0 }
 0x351   : > { %v3432_v38 = vadd.f32 %v3428_v33, %v3332_v26 }
 0x353   : > { %v3526_v34 = vpop.f32.mrf.mxu1 }
 0x354   : > { %v3531_v41 = vadd.f32 %v3526_v34, %v3431_v36 }
 0x355   : > { %v3528_v40 = vpop.f32.mrf.mxu1 }
 0x356   : > { %v3532_v37 = vadd.f32 %v3528_v40, %v3432_v38 }
 0x359   : > { %v3620_v30 = vpop.f32.mrf.mxu0 }
 0x35a   : > { %v3625_v43 = vadd.f32 %v3620_v30, %v3531_v41 }
 0x35b   : > { %v3622_v35 = vpop.f32.mrf.mxu0 }
 0x35c   : > { %v3626_v45 = vadd.f32 %v3622_v35, %v3532_v37 }
 0x35f   : > { %v3720_v44 = vpop.f32.mrf.mxu1 }
 0x360   : > { %v3725_v46 = vadd.f32 %v3720_v44, %v3625_v43 }
 0x361   : > { %v3722_v48 = vpop.f32.mrf.mxu1 }
 0x362   : > { %5707 = vst [vmem:[%s6045_s29 + $0x10] sm:$0xff] %v3725_v46  ;;  %v3726_v49 = vadd.f32 %v3722_v48, %v3626_v45 }
 0x364   : > { %5708 = vst [vmem:[%s6045_s29 + $0x18] sm:$0xff] %v3726_v49 }
 0x365 PF: > { %p5709_p12 = scmp.ne.s32.totalorder %s6011_s19, 2 }
 0x366   : > { %s5953_s8 = smov (!%p5709_p12), 51   ;;  %s5954_s9 = smov (!%p5709_p12), 48  }
 0x367   : > { %3733 = sbr.rel (%p5709_p12) target bundleno = 1294 (0x50e), region = 48  ;;  %s5956_s10 = smov (!%p5709_p12), 45  }
 0x368   : > { %s5957_s11 = smov (!%p5709_p12), 3   ;;  %s5958_s12 = smov (!%p5709_p12), 125  }
 0x369   : > { %s5959_s13 = smov (!%p5709_p12), 83   ;;  %s5960_s14 = smov (!%p5709_p12), 80  }
 0x36a   : > { %s5961_s20 = smov (!%p5709_p12), 77  }
 0x36c   : > { %v6675_v51 = vld [vmem:[%s7036_s2] sm:$0xff]  ;;  %v6681_v39 = vld [vmem:[%s7036_s2 + $0x8] sm:$0xff]  ;;  %v5955_v58 = vmov 0.0   ;;  %vm3749_vm12 = vcmask 416768   ;;  %vm3765_vm13 = vcmask 392192   ;;  %vm3772_vm14 = vcmask 1043456  }
 0x36d   : > { %3735 = vst [vmem:[#allocation2 + $0x4] sm:$0xff] %v6675_v51  ;;  %3841 = vmatprep.mubr.f32.mxu0 %v5955_v58  ;;  %3921 = vmatprep.mubr.f32.mxu1 %v5955_v58  ;;  %v6700_v50 = vcombine.high %v6675_v51, %v6675_v51  ;;  %v4220_v24 = vld [vmem:[#allocation2 + $0xc] sm:$0xf]  ;;  %v6736_v2 = vcombine.high %v6681_v39, %v6681_v39  ;;  %vm3739_vm15 = vcmp.ge.s32.totalorder %v6043_v5, 3  ;;  %vm3738_vm0 = vcmp.ge.s32.totalorder %v6041_v4, 3  ;;  %v6777_v21 = vld [vmem:[%s7037_s3] sm:$0xff] }
 0x36e   : > { %v4322_v60 = vld [vmem:[#allocation2 + $0xc] sm:$0xf]  ;;  %vm3768_vm1 = vcmask 31744   ;;  %vm3941_vm2 = vcmask 367616   ;;  %vm3931_vm3 = vcmp.lt.s32.totalorder %v6043_v5, 13  ;;  %vm3930_vm4 = vcmp.lt.s32.totalorder %v6041_v4, 13 }
 0x36f   : > { %v4424_v61 = vld [vmem:[#allocation2 + $0xc] sm:$0xf]  ;;  %v6798_v31 = vld [vmem:[%s7037_s3 + $0x10] sm:$0xff]  ;;  %vm4043_vm5 = vcmask 23552   ;;  %v6815_v38 = vld [vmem:[%s7037_s3 + $0x20] sm:$0xff]  ;;  %vm4230_vm6 = vcmask 1022976  }
 0x370   : > { %v4520_v42 = vld [vmem:[#allocation2 + $0xc] sm:$0xf]  ;;  %v6824_v41 = vld [vmem:[%s7037_s3 + $0x18] sm:$0xff]  ;;  %vm4332_vm7 = vcmask 678912   ;;  %vm4436_vm8 = vcmask 654336   ;;  %vm4530_vm9 = vcmask 629760  }
 0x371   : > { %v5096_v6 = vld [vmem:[#allocation2 + $0xc] sm:$0xf] }
 0x372   : > { %v5196_v8 = vld [vmem:[#allocation2 + $0xc] sm:$0xf] }
 0x373   : > { %v5296_v10 = vld [vmem:[#allocation2 + $0xc] sm:$0xf] }
 0x374   : > { %v3737_v52 = vld [vmem:[#allocation2 + $0x8] sm:$0xf]  ;;  %v3736_v53 = vld [vmem:[#allocation2] sm:$0xff]  ;;  %v5390_v7 = vld [vmem:[#allocation2 + $0xc] sm:$0xf] }
 0x375   : > { %3747 = vrot.lane.b32.xlu1 %v3737_v52, %s5953_s8  ;;  %3763 = vrot.lane.b32.xlu0 %v3737_v52, %s5954_s9  ;;  %v3929_v54 = vld [vmem:[#allocation2 + $0x8] sm:$0xf]  ;;  %v3742_v57 = vcombine.high %v3736_v53, %v3736_v53 }
 0x376   : > { %v4033_v55 = vld [vmem:[#allocation2 + $0x8] sm:$0xf] }
 0x377   : > { %4625 = vst [vmem:[#allocation2 + $0x4] sm:$0xff] %v6681_v39  ;;  %v6767_v28 = vld [vmem:[%s7037_s3 + $0x8] sm:$0xff] }
 0x378   : > { %v6842_v49 = vld [vmem:[%s7037_s3 + $0x28] sm:$0xff] }
 0x379   : > { %3743 = vrot.lane.b32.xlu1 %v3736_v53, %s5953_s8  ;;  %3759 = vrot.lane.b32.xlu0 %v3736_v53, %s5954_s9 }
 0x37d   : > { %3745 = vrot.lane.b32.xlu1 %v3742_v57, %s5953_s8  ;;  %3761 = vrot.lane.b32.xlu0 %v3742_v57, %s5954_s9 }
 0x37e   : > { %v4626_v62 = vld [vmem:[#allocation2] sm:$0xff]  ;;  %v4627_v0 = vld [vmem:[#allocation2 + $0x8] sm:$0xf] }
 0x37f   : > { %v4630_v56 = vcombine.high %v4626_v62, %v4626_v62  ;;  %v4812_v59 = vld [vmem:[#allocation2 + $0x8] sm:$0xf] }
 0x380   : > { %v4912_v1 = vld [vmem:[#allocation2 + $0x8] sm:$0xf] }
 0x381   : > { %3939 = vrot.lane.b32.xlu1 %v3929_v54, %s5956_s10  ;;  %3937 = vrot.lane.b32.xlu0 %v3742_v57, %s5956_s10 }
 0x385   : > { %4039 = vrot.lane.b32.xlu1 %v3742_v57, %s5957_s11  ;;  %3935 = vrot.lane.b32.xlu0 %v3736_v53, %s5956_s10 }
 0x389   : > { %4037 = vrot.lane.b32.xlu1 %v3736_v53, %s5957_s11  ;;  %4041 = vrot.lane.b32.xlu0 %v4033_v55, %s5957_s11 }
 0x38d   : > { %4228 = vrot.lane.b32.xlu1 %v4220_v24, %s5958_s12  ;;  %4226 = vrot.lane.b32.xlu0 %v6700_v50, %s5958_s12  ;;  %v6859_v24 = vld [vmem:[%s7037_s3 + $0x30] sm:$0xff] }
 0x391   : > { %4328 = vrot.lane.b32.xlu1 %v6700_v50, %s5959_s13  ;;  %4224 = vrot.lane.b32.xlu0 %v6675_v51, %s5958_s12 }
 0x395   : > { %4326 = vrot.lane.b32.xlu1 %v6675_v51, %s5959_s13  ;;  %4330 = vrot.lane.b32.xlu0 %v4322_v60, %s5959_s13 }
 0x399   : > { %4434 = vrot.lane.b32.xlu1 %v4424_v61, %s5960_s14  ;;  %4432 = vrot.lane.b32.xlu0 %v6700_v50, %s5960_s14 }
 0x39d   : > { %4526 = vrot.lane.b32.xlu1 %v6700_v50, %s5961_s20  ;;  %4430 = vrot.lane.b32.xlu0 %v6675_v51, %s5960_s14 }
 0x3a1   : > { %4524 = vrot.lane.b32.xlu1 %v6675_v51, %s5961_s20  ;;  %4528 = vrot.lane.b32.xlu0 %v4520_v42, %s5961_s20 }
 0x3a5   : > { %4649 = vrot.lane.b32.xlu1 %v4627_v0, %s5954_s9  ;;  %4647 = vrot.lane.b32.xlu0 %v4630_v56, %s5954_s9 }
 0x3a9   : > { %4635 = vrot.lane.b32.xlu1 %v4627_v0, %s5953_s8  ;;  %4633 = vrot.lane.b32.xlu0 %v4630_v56, %s5953_s8  ;;  %v6871_v0 = vld [vmem:[%s7037_s3 + $0x38] sm:$0xff] }
 0x3ad   : > { %4631 = vrot.lane.b32.xlu1 %v4626_v62, %s5953_s8  ;;  %4645 = vrot.lane.b32.xlu0 %v4626_v62, %s5954_s9 }
 0x3b1   : > { %4820 = vrot.lane.b32.xlu1 %v4812_v59, %s5956_s10  ;;  %4818 = vrot.lane.b32.xlu0 %v4630_v56, %s5956_s10 }
 0x3b5   : > { %4918 = vrot.lane.b32.xlu1 %v4630_v56, %s5957_s11  ;;  %4816 = vrot.lane.b32.xlu0 %v4626_v62, %s5956_s10 }
 0x3b9   : > { %4916 = vrot.lane.b32.xlu1 %v4626_v62, %s5957_s11  ;;  %4920 = vrot.lane.b32.xlu0 %v4912_v1, %s5957_s11 }
 0x3bd   : > { %5104 = vrot.lane.b32.xlu1 %v5096_v6, %s5958_s12  ;;  %5102 = vrot.lane.b32.xlu0 %v6736_v2, %s5958_s12 }
 0x3c1   : > { %5202 = vrot.lane.b32.xlu1 %v6736_v2, %s5959_s13  ;;  %5100 = vrot.lane.b32.xlu0 %v6681_v39, %s5958_s12 }
 0x3c5   : > { %5200 = vrot.lane.b32.xlu1 %v6681_v39, %s5959_s13  ;;  %5204 = vrot.lane.b32.xlu0 %v5196_v8, %s5959_s13 }
 0x3c9   : > { %5305 = vrot.lane.b32.xlu1 %v5296_v10, %s5960_s14  ;;  %5303 = vrot.lane.b32.xlu0 %v6736_v2, %s5960_s14 }
 0x3cd   : > { %5396 = vrot.lane.b32.xlu1 %v6736_v2, %s5961_s20  ;;  %5301 = vrot.lane.b32.xlu0 %v6681_v39, %s5960_s14 }
 0x3d1   : > { %5394 = vrot.lane.b32.xlu1 %v6681_v39, %s5961_s20  ;;  %5398 = vrot.lane.b32.xlu0 %v5390_v7, %s5961_s20 }
 0x3e7   : > { %v3748_v3 = vpop.permute.xlu1 %3747  ;;  %v3764_v63 = vpop.permute.xlu0 %3763 }
 0x3eb   : > { %v3744_v11 = vpop.permute.xlu1 %3743  ;;  %v3760_v12 = vpop.permute.xlu0 %3759 }
 0x3ef   : > { %v3746_v14 = vpop.permute.xlu1 %3745  ;;  %v3762_v17 = vpop.permute.xlu0 %3761 }
 0x3f0   : > { %v3750_v18 = vsel %vm3749_vm12, %v3744_v11, %v3746_v14  ;;  %v3767_v9 = vsel %vm3765_vm13, %v3762_v17, %v3764_v63  ;;  %v3766_v47 = vsel %vm3765_vm13, %v3760_v12, %v3762_v17  ;;  %v3751_v15 = vsel %vm3749_vm12, %v3746_v14, %v3748_v3  ;;  %v6887_v63 = vld [vmem:[%s7037_s3 + $0x40] sm:$0xff] }
 0x3f1   : > { %5711 = vmatprep.subr.msk.mxu0 %vm3772_vm14, %v3767_v9  ;;  %v3755_v13 = vsel %vm3739_vm15, %v3751_v15, 0.0  ;;  %v3754_v20 = vsel %vm3738_vm0, %v3750_v18, 0.0 }
 0x3f2   : > { %5712 = vmatpush1.msk.msra.mxu0 %vm3772_vm14, %v3766_v47  ;;  %5714 = vmatprep.subr.msk.mxu1 %vm3772_vm14, %v3755_v13 }
 0x3f3   : > { %5715 = vmatpush1.msk.msra.mxu1 %vm3772_vm14, %v3754_v20  ;;  %v3940_v16 = vpop.permute.xlu1 %3939  ;;  %v3938_v22 = vpop.permute.xlu0 %3937  ;;  %5713 = vmatmul.mubr.msk.f32.vlgmr.msra.gmra.mxu0 %vm3768_vm1, %v6767_v28 }
 0x3f4   : > { %v3943_v19 = vsel %vm3941_vm2, %v3938_v22, %v3940_v16  ;;  %5716 = vmatmul.mubr.msk.f32.vlgmr.msra.gmra.mxu1 %vm3768_vm1, %v6777_v21  ;;  %4023 = vmatprep.mubr.f32.mxu0 %v5955_v58 }
 0x3f5   : > { %v3947_v23 = vsel %vm3931_vm3, %v3943_v19, 0.0  ;;  %4125 = vmatprep.mubr.f32.mxu1 %v5955_v58 }
 0x3f6   : > { %5718 = vmatprep.subr.msk.mxu0 %vm3772_vm14, %v3947_v23 }
 0x3f7   : > { %v4040_v25 = vpop.permute.xlu1 %4039  ;;  %v3936_v27 = vpop.permute.xlu0 %3935 }
 0x3f8   : > { %v3942_v29 = vsel %vm3941_vm2, %v3936_v27, %v3938_v22 }
 0x3f9   : > { %v3946_v32 = vsel %vm3930_vm4, %v3942_v29, 0.0 }
 0x3fa   : > { %5719 = vmatpush1.msk.msra.mxu0 %vm3772_vm14, %v3946_v32 }
 0x3fb   : > { %v4038_v26 = vpop.permute.xlu1 %4037  ;;  %v4042_v33 = vpop.permute.xlu0 %4041  ;;  %5720 = vmatmul.mubr.msk.f32.vlgmr.msra.gmra.mxu0 %vm3768_vm1, %v6798_v31  ;;  %5726 = vmatprep.subr.msk.mxu0 %vm3772_vm14, %v6700_v50 }
 0x3fc   : > { %v4044_v34 = vsel %vm4043_vm5, %v4038_v26, %v4040_v25  ;;  %v4045_v36 = vsel %vm4043_vm5, %v4040_v25, %v4042_v33  ;;  %5727 = vmatpush1.msk.msra.mxu0 %vm3772_vm14, %v6675_v51  ;;  %4210 = vmatprep.mubr.f32.mxu0 %v5955_v58 }
 0x3fd   : > { %v4048_v40 = vsel %vm3738_vm0, %v4044_v34, 0.0  ;;  %v4049_v30 = vsel %vm3739_vm15, %v4045_v36, 0.0 }
 0x3fe   : > { %5722 = vmatprep.subr.msk.mxu1 %vm3772_vm14, %v4049_v30 }
 0x3ff   : > { %v4229_v37 = vpop.permute.xlu1 %4228  ;;  %5723 = vmatpush1.msk.msra.mxu1 %vm3772_vm14, %v4048_v40  ;;  %v4227_v35 = vpop.permute.xlu0 %4226  ;;  %5728 = vmatmul.mubr.msk.f32.vlgmr.msra.gmra.mxu0 %vm3768_vm1, %v6815_v38 }
 0x400   : > { %v4232_v43 = vsel %vm4230_vm6, %v4227_v35, %v4229_v37  ;;  %5724 = vmatmul.mubr.msk.f32.vlgmr.msra.gmra.mxu1 %vm3768_vm1, %v6824_v41  ;;  %4414 = vmatprep.mubr.f32.mxu0 %v5955_v58 }
 0x401   : > { %v4236_v44 = vsel %vm3931_vm3, %v4232_v43, 0.0  ;;  %4312 = vmatprep.mubr.f32.mxu1 %v5955_v58 }
 0x402   : > { %5730 = vmatprep.subr.msk.mxu1 %vm3772_vm14, %v4236_v44 }
 0x403   : > { %v4329_v45 = vpop.permute.xlu1 %4328  ;;  %v4225_v46 = vpop.permute.xlu0 %4224 }
 0x404   : > { %v4231_v48 = vsel %vm4230_vm6, %v4225_v46, %v4227_v35 }
 0x405   : > { %v4235_v51 = vsel %vm3930_vm4, %v4231_v48, 0.0 }
 0x406   : > { %5731 = vmatpush1.msk.msra.mxu1 %vm3772_vm14, %v4235_v51 }
 0x407   : > { %v4327_v52 = vpop.permute.xlu1 %4326  ;;  %v4331_v53 = vpop.permute.xlu0 %4330  ;;  %5732 = vmatmul.mubr.msk.f32.vlgmr.msra.gmra.mxu1 %vm3768_vm1, %v6842_v49 }
 0x408   : > { %v4333_v54 = vsel %vm4332_vm7, %v4327_v52, %v4329_v45  ;;  %v4334_v55 = vsel %vm4332_vm7, %v4329_v45, %v4331_v53  ;;  %4510 = vmatprep.mubr.f32.mxu1 %v5955_v58 }
 0x409   : > { %v4337_v57 = vsel %vm3738_vm0, %v4333_v54, 0.0  ;;  %v4338_v50 = vsel %vm3739_vm15, %v4334_v55, 0.0 }
 0x40a   : > { %5734 = vmatprep.subr.msk.mxu0 %vm3772_vm14, %v4338_v50 }
 0x40b   : > { %v4435_v60 = vpop.permute.xlu1 %4434  ;;  %5735 = vmatpush1.msk.msra.mxu0 %vm3772_vm14, %v4337_v57  ;;  %v4433_v61 = vpop.permute.xlu0 %4432 }
 0x40c   : > { %v4438_v42 = vsel %vm4436_vm8, %v4433_v61, %v4435_v60  ;;  %5736 = vmatmul.mubr.msk.f32.vlgmr.msra.gmra.mxu0 %vm3768_vm1, %v6859_v24 }
 0x40d   : > { %5738 = vmatprep.subr.msk.mxu1 %vm3772_vm14, %v4438_v42  ;;  %4612 = vmatprep.mubr.f32.mxu0 %v5955_v58 }
 0x40f   : > { %v4527_v62 = vpop.permute.xlu1 %4526  ;;  %v4431_v56 = vpop.permute.xlu0 %4430 }
 0x410   : > { %v4437_v59 = vsel %vm4436_vm8, %v4431_v56, %v4433_v61 }
 0x411   : > { %5739 = vmatpush1.msk.msra.mxu1 %vm3772_vm14, %v4437_v59 }
 0x412   : > { %5740 = vmatmul.mubr.msk.f32.vlgmr.msra.gmra.mxu1 %vm3768_vm1, %v6871_v0 }
 0x413   : > { %v4525_v1 = vpop.permute.xlu1 %4524  ;;  %v4529_v6 = vpop.permute.xlu0 %4528  ;;  %4724 = vmatprep.mubr.f32.mxu1 %v5955_v58 }
 0x414   : > { %v4531_v8 = vsel %vm4530_vm9, %v4525_v1, %v4527_v62  ;;  %v4532_v10 = vsel %vm4530_vm9, %v4527_v62, %v4529_v6 }
 0x415   : > { %v4535_v7 = vsel %vm3930_vm4, %v4531_v8, 0.0  ;;  %v4536_v3 = vsel %vm3931_vm3, %v4532_v10, 0.0 }
 0x416   : > { %5742 = vmatprep.subr.msk.mxu0 %vm3772_vm14, %v4536_v3 }
 0x417   : > { %v4650_v11 = vpop.permute.xlu1 %4649  ;;  %5743 = vmatpush1.msk.msra.mxu0 %vm3772_vm14, %v4535_v7  ;;  %v4648_v12 = vpop.permute.xlu0 %4647 }
 0x418   : > { %v4652_v14 = vsel %vm3765_vm13, %v4648_v12, %v4650_v11  ;;  %5744 = vmatmul.mubr.msk.f32.vlgmr.msra.gmra.mxu0 %vm3768_vm1, %v6887_v63 }
 0x419   : > { %5747 = vmatprep.subr.msk.mxu1 %vm3772_vm14, %v4652_v14  ;;  %4804 = vmatprep.mubr.f32.mxu0 %v5955_v58 }
 0x41b   : > { %v4636_v17 = vpop.permute.xlu1 %4635  ;;  %v4634_v18 = vpop.permute.xlu0 %4633 }
 0x41c   : > { %v4638_v9 = vsel %vm3749_vm12, %v4634_v18, %v4636_v17 }
 0x41d   : > { %v4642_v47 = vsel %vm3739_vm15, %v4638_v9, 0.0 }
 0x41e   : > { %5750 = vmatprep.subr.msk.mxu0 %vm3772_vm14, %v4642_v47 }
 0x41f   : > { %v4632_v15 = vpop.permute.xlu1 %4631  ;;  %v4646_v13 = vpop.permute.xlu0 %4645 }
 0x420   : > { %v4637_v20 = vsel %vm3749_vm12, %v4632_v15, %v4634_v18  ;;  %v4651_v16 = vsel %vm3765_vm13, %v4646_v13, %v4648_v12 }
 0x421   : > { %v4641_v22 = vsel %vm3738_vm0, %v4637_v20, 0.0  ;;  %5748 = vmatpush1.msk.msra.mxu1 %vm3772_vm14, %v4651_v16 }
 0x422   : > { %5751 = vmatpush1.msk.msra.mxu0 %vm3772_vm14, %v4641_v22  ;;  %5749 = vmatmul.mubr.msk.f32.vlgmr.msra.gmra.mxu1 %vm3768_vm1, %v6767_v28 }
 0x423   : > { %v4821_v19 = vpop.permute.xlu1 %4820  ;;  %v4819_v23 = vpop.permute.xlu0 %4818  ;;  %5752 = vmatmul.mubr.msk.f32.vlgmr.msra.gmra.mxu0 %vm3768_vm1, %v6777_v21  ;;  %4902 = vmatprep.mubr.f32.mxu1 %v5955_v58 }
 0x424   : > { %v4823_v25 = vsel %vm3941_vm2, %v4819_v23, %v4821_v19  ;;  %5002 = vmatprep.mubr.f32.mxu0 %v5955_v58 }
 0x425   : > { %v4827_v27 = vsel %vm3931_vm3, %v4823_v25, 0.0 }
 0x426   : > { %5754 = vmatprep.subr.msk.mxu1 %vm3772_vm14, %v4827_v27 }
 0x427   : > { %v4919_v29 = vpop.permute.xlu1 %4918  ;;  %v4817_v32 = vpop.permute.xlu0 %4816 }
 0x428   : > { %v4822_v28 = vsel %vm3941_vm2, %v4817_v32, %v4819_v23 }
 0x429   : > { %v4826_v26 = vsel %vm3930_vm4, %v4822_v28, 0.0 }
 0x42a   : > { %5755 = vmatpush1.msk.msra.mxu1 %vm3772_vm14, %v4826_v26 }
 0x42b   : > { %v4917_v21 = vpop.permute.xlu1 %4916  ;;  %v4921_v33 = vpop.permute.xlu0 %4920  ;;  %5756 = vmatmul.mubr.msk.f32.vlgmr.msra.gmra.mxu1 %vm3768_vm1, %v6798_v31  ;;  %5762 = vmatprep.subr.msk.mxu1 %vm3772_vm14, %v6736_v2 }
 0x42c   : > { %v4922_v34 = vsel %vm4043_vm5, %v4917_v21, %v4919_v29  ;;  %v4923_v36 = vsel %vm4043_vm5, %v4919_v29, %v4921_v33  ;;  %5763 = vmatpush1.msk.msra.mxu1 %vm3772_vm14, %v6681_v39  ;;  %5086 = vmatprep.mubr.f32.mxu1 %v5955_v58 }
 0x42d   : > { %v4926_v40 = vsel %vm3738_vm0, %v4922_v34, 0.0  ;;  %v4927_v30 = vsel %vm3739_vm15, %v4923_v36, 0.0 }
 0x42e   : > { %5758 = vmatprep.subr.msk.mxu0 %vm3772_vm14, %v4927_v30 }
 0x42f   : > { %v5105_v31 = vpop.permute.xlu1 %5104  ;;  %5759 = vmatpush1.msk.msra.mxu0 %vm3772_vm14, %v4926_v40  ;;  %v5103_v2 = vpop.permute.xlu0 %5102  ;;  %5764 = vmatmul.mubr.msk.f32.vlgmr.msra.gmra.mxu1 %vm3768_vm1, %v6815_v38 }
 0x430   : > { %v5107_v37 = vsel %vm4230_vm6, %v5103_v2, %v5105_v31  ;;  %5760 = vmatmul.mubr.msk.f32.vlgmr.msra.gmra.mxu0 %vm3768_vm1, %v6824_v41  ;;  %5286 = vmatprep.mubr.f32.mxu1 %v5955_v58 }
 0x431   : > { %v5111_v39 = vsel %vm3931_vm3, %v5107_v37, 0.0  ;;  %5186 = vmatprep.mubr.f32.mxu0 %v5955_v58 }
 0x432   : > { %5766 = vmatprep.subr.msk.mxu0 %vm3772_vm14, %v5111_v39 }
 0x433   : > { %v5203_v35 = vpop.permute.xlu1 %5202  ;;  %v5101_v43 = vpop.permute.xlu0 %5100 }
 0x434   : > { %v5106_v44 = vsel %vm4230_vm6, %v5101_v43, %v5103_v2 }
 0x435   : > { %v5110_v38 = vsel %vm3930_vm4, %v5106_v44, 0.0 }
 0x436   : > { %5767 = vmatpush1.msk.msra.mxu0 %vm3772_vm14, %v5110_v38 }
 0x437   : > { %v5201_v45 = vpop.permute.xlu1 %5200  ;;  %v5205_v41 = vpop.permute.xlu0 %5204  ;;  %5768 = vmatmul.mubr.msk.f32.vlgmr.msra.gmra.mxu0 %vm3768_vm1, %v6842_v49 }
 0x438   : > { %v5206_v46 = vsel %vm4332_vm7, %v5201_v45, %v5203_v35  ;;  %v5207_v48 = vsel %vm4332_vm7, %v5203_v35, %v5205_v41  ;;  %5380 = vmatprep.mubr.f32.mxu0 %v5955_v58 }
 0x439   : > { %v5210_v51 = vsel %vm3738_vm0, %v5206_v46, 0.0  ;;  %v5211_v52 = vsel %vm3739_vm15, %v5207_v48, 0.0 }
 0x43a   : > { %5770 = vmatprep.subr.msk.mxu1 %vm3772_vm14, %v5211_v52 }
 0x43b   : > { %v5306_v53 = vpop.permute.xlu1 %5305  ;;  %5771 = vmatpush1.msk.msra.mxu1 %vm3772_vm14, %v5210_v51  ;;  %v5304_v54 = vpop.permute.xlu0 %5303 }
 0x43c   : > { %v5308_v49 = vsel %vm4436_vm8, %v5304_v54, %v5306_v53  ;;  %5772 = vmatmul.mubr.msk.f32.vlgmr.msra.gmra.mxu1 %vm3768_vm1, %v6859_v24 }
 0x43d   : > { %5774 = vmatprep.subr.msk.mxu0 %vm3772_vm14, %v5308_v49  ;;  %5480 = vmatprep.mubr.f32.mxu1 %v5955_v58 }
 0x43f   : > { %v5397_v55 = vpop.permute.xlu1 %5396  ;;  %v5302_v57 = vpop.permute.xlu0 %5301 }
 0x440   : > { %v5307_v50 = vsel %vm4436_vm8, %v5302_v57, %v5304_v54 }
 0x441   : > { %5775 = vmatpush1.msk.msra.mxu0 %vm3772_vm14, %v5307_v50 }
 0x442   : > { %5776 = vmatmul.mubr.msk.f32.vlgmr.msra.gmra.mxu0 %vm3768_vm1, %v6871_v0 }
 0x443   : > { %v5395_v60 = vpop.permute.xlu1 %5394  ;;  %v5399_v61 = vpop.permute.xlu0 %5398 }
 0x444   : > { %v5400_v42 = vsel %vm4530_vm9, %v5395_v60, %v5397_v55  ;;  %v5401_v62 = vsel %vm4530_vm9, %v5397_v55, %v5399_v61 }
 0x445   : > { %v5404_v24 = vsel %vm3930_vm4, %v5400_v42, 0.0  ;;  %v5405_v58 = vsel %vm3931_vm3, %v5401_v62, 0.0 }
 0x446   : > { %5778 = vmatprep.subr.msk.mxu1 %vm3772_vm14, %v5405_v58 }
 0x447   : > { %5779 = vmatpush1.msk.msra.mxu1 %vm3772_vm14, %v5404_v24 }
 0x448   : > { %5780 = vmatmul.mubr.msk.f32.vlgmr.msra.gmra.mxu1 %vm3768_vm1, %v6887_v63 }
 0x4b3   : > { %v3843_v56 = vpop.f32.mrf.mxu0 }
 0x4b4   : > { %v3923_v59 = vpop.f32.mrf.mxu1 }
 0x4b5   : > { %v3845_v0 = vpop.f32.mrf.mxu0  ;;  %v3924_v8 = vadd.f32 %v3923_v59, %v3843_v56 }
 0x4b6   : > { %v3925_v1 = vpop.f32.mrf.mxu1 }
 0x4b7   : > { %v3926_v10 = vadd.f32 %v3925_v1, %v3845_v0 }
 0x4bb   : > { %v4025_v6 = vpop.f32.mrf.mxu0 }
 0x4bc   : > { %v4030_v3 = vadd.f32 %v4025_v6, %v3924_v8 }
 0x4bd   : > { %v4027_v7 = vpop.f32.mrf.mxu0 }
 0x4be   : > { %v4031_v11 = vadd.f32 %v4027_v7, %v3926_v10 }
 0x4bf   : > { %v4212_v12 = vpop.f32.mrf.mxu0 }
 0x4c0   : > { %v4127_v4 = vpop.f32.mrf.mxu1 }
 0x4c1   : > { %v4132_v14 = vadd.f32 %v4127_v4, %v4030_v3  ;;  %v4214_v18 = vpop.f32.mrf.mxu0 }
 0x4c2   : > { %v4129_v5 = vpop.f32.mrf.mxu1 }
 0x4c3   : > { %v4133_v17 = vadd.f32 %v4129_v5, %v4031_v11  ;;  %v4217_v47 = vadd.f32 %v4212_v12, %v4132_v14 }
 0x4c5   : > { %v4218_v63 = vadd.f32 %v4214_v18, %v4133_v17 }
 0x4c7   : > { %v4314_v9 = vpop.f32.mrf.mxu1 }
 0x4c8   : > { %v4319_v20 = vadd.f32 %v4314_v9, %v4217_v47 }
 0x4c9   : > { %v4316_v15 = vpop.f32.mrf.mxu1 }
 0x4ca   : > { %v4320_v16 = vadd.f32 %v4316_v15, %v4218_v63 }
 0x4cc   : > { %v4416_v13 = vpop.f32.mrf.mxu0 }
 0x4cd   : > { %v4421_v19 = vadd.f32 %v4416_v13, %v4319_v20 }
 0x4ce   : > { %v4418_v22 = vpop.f32.mrf.mxu0 }
 0x4cf   : > { %v4422_v25 = vadd.f32 %v4418_v22, %v4320_v16 }
 0x4d2   : > { %v4512_v23 = vpop.f32.mrf.mxu1 }
 0x4d3   : > { %v4517_v29 = vadd.f32 %v4512_v23, %v4421_v19 }
 0x4d4   : > { %v4514_v27 = vpop.f32.mrf.mxu1 }
 0x4d5   : > { %v4518_v32 = vadd.f32 %v4514_v27, %v4422_v25 }
 0x4d8   : > { %v4614_v28 = vpop.f32.mrf.mxu0 }
 0x4d9   : > { %v4619_v26 = vadd.f32 %v4614_v28, %v4517_v29 }
 0x4da   : > { %v4616_v21 = vpop.f32.mrf.mxu0 }
 0x4db   : > { %4621 = vst [vmem:[%s6045_s29] sm:$0xff] %v4619_v26  ;;  %v4620_v33 = vadd.f32 %v4616_v21, %v4518_v32 }
 0x4dd   : > { %4622 = vst [vmem:[%s6045_s29 + $0x8] sm:$0xff] %v4620_v33 }
 0x4e2   : > { %v4726_v34 = vpop.f32.mrf.mxu1 }
 0x4e3   : > { %v4806_v40 = vpop.f32.mrf.mxu0 }
 0x4e4   : > { %v4728_v36 = vpop.f32.mrf.mxu1  ;;  %v4807_v2 = vadd.f32 %v4806_v40, %v4726_v34 }
 0x4e5   : > { %v4808_v30 = vpop.f32.mrf.mxu0 }
 0x4e6   : > { %v4809_v37 = vadd.f32 %v4808_v30, %v4728_v36 }
 0x4eb   : > { %v4904_v31 = vpop.f32.mrf.mxu1 }
 0x4ec   : > { %v4909_v43 = vadd.f32 %v4904_v31, %v4807_v2 }
 0x4ed   : > { %v4906_v39 = vpop.f32.mrf.mxu1 }
 0x4ee   : > { %v4910_v44 = vadd.f32 %v4906_v39, %v4809_v37 }
 0x4ef   : > { %v5088_v45 = vpop.f32.mrf.mxu1 }
 0x4f0   : > { %v5004_v35 = vpop.f32.mrf.mxu0 }
 0x4f1   : > { %v5009_v41 = vadd.f32 %v5004_v35, %v4909_v43  ;;  %v5090_v48 = vpop.f32.mrf.mxu1 }
 0x4f2   : > { %v5006_v38 = vpop.f32.mrf.mxu0 }
 0x4f3   : > { %v5010_v46 = vadd.f32 %v5006_v38, %v4910_v44  ;;  %v5093_v52 = vadd.f32 %v5088_v45, %v5009_v41 }
 0x4f5   : > { %v5094_v53 = vadd.f32 %v5090_v48, %v5010_v46 }
 0x4f7   : > { %v5188_v51 = vpop.f32.mrf.mxu0 }
 0x4f8   : > { %v5193_v55 = vadd.f32 %v5188_v51, %v5093_v52 }
 0x4f9   : > { %v5190_v54 = vpop.f32.mrf.mxu0 }
 0x4fa   : > { %v5194_v57 = vadd.f32 %v5190_v54, %v5094_v53 }
 0x4fc   : > { %v5288_v49 = vpop.f32.mrf.mxu1 }
 0x4fd   : > { %v5293_v61 = vadd.f32 %v5288_v49, %v5193_v55 }
 0x4fe   : > { %v5290_v50 = vpop.f32.mrf.mxu1 }
 0x4ff   : > { %v5294_v42 = vadd.f32 %v5290_v50, %v5194_v57 }
 0x502   : > { %v5382_v60 = vpop.f32.mrf.mxu0 }
 0x503   : > { %v5387_v24 = vadd.f32 %v5382_v60, %v5293_v61 }
 0x504   : > { %v5384_v62 = vpop.f32.mrf.mxu0 }
 0x505   : > { %v5388_v56 = vadd.f32 %v5384_v62, %v5294_v42 }
 0x508   : > { %v5482_v58 = vpop.f32.mrf.mxu1 }
 0x509   : > { %v5487_v0 = vadd.f32 %v5482_v58, %v5387_v24 }
 0x50a   : > { %v5484_v59 = vpop.f32.mrf.mxu1 }
 0x50b   : > { %5781 = vst [vmem:[%s6045_s29 + $0x10] sm:$0xff] %v5487_v0  ;;  %v5488_v1 = vadd.f32 %v5484_v59, %v5388_v56 }
 0x50d   : > { %5782 = vst [vmem:[%s6045_s29 + $0x18] sm:$0xff] %v5488_v1 }
 0x50e PF: > { %s5790_s30 = sshll.u32 %s6011_s19, 9  ;;  %s5507_s8 = sshll.u32 %s6045_s29, 4  ;;  %s6990_s8 = int_to_ptr.vmem [resolvable:$true] %s5507_s8 }
 0x50f   : > { %s6987_s7 = scalar_lea.hbm %s7038_s4, %s5790_s30  ;;  %s6994_s9 = scalar_lea.sflag [#allocation4], %s173_s27 }
 0x510   : > { %s5872_s10 = scalar_lea.vmem %s6990_s8, 512  ;;  %s5962_s19 = smov [#allocation3]  }
 0x511   : > { %p5873_p13 = scmp.ne.s32.totalorder %s6990_s8, %s5872_s10  ;;  %s5876_s11 = sshll.u32 %s5962_s19, 4  ;;  %s5877_s11 = int_to_ptr.vmem [resolvable:$false] %s5876_s11 }
 0x512   : > { %s5878_s12 = scalar_lea.vmem %s5877_s11, 1024  ;;  %p5879_p2 = scmp.lt.s32.totalorder %s6990_s8, %s5877_s11 }
 0x513   : > { %p5874_p0 = pnand %p5873_p13, %p6028_p5  ;;  %p5880_p3 = scmp.lt.s32.totalorder %s5878_s12, %s5872_s10 }
 0x515   : > { %p5875_p1 = pneg %p5874_p0  ;;  %p5881_p4 = por %p5880_p3, %p5879_p2 }
 0x517   : > { %p5882_p7 = pnand %p5881_p4, %p5875_p1 }
 0x519   : > { %5885 = shalt.err (!%p5882_p7)
}
 0x51a   : > { %s5886_s27 = scalar_lea.hbm %s6987_s7, 512  ;;  %s5890_s14 = scalar_lea.hbm %s7038_s4, 1536 }
 0x51b   : > { %p5887_p8 = scmp.ne.s32.totalorder %s6987_s7, %s5886_s27  ;;  %p5891_p11 = scmp.lt.s32.totalorder %s6987_s7, %s7038_s4 }
 0x51c   : > { %p5892_p12 = scmp.lt.s32.totalorder %s5890_s14, %s5886_s27 }
 0x51d   : > { %p5888_p9 = pnand %p5887_p8, %p6028_p5 }
 0x51e   : > { %p5893_p13 = por %p5892_p12, %p5891_p11 }
 0x51f   : > { %p5889_p10 = pneg %p5888_p9 }
 0x521   : > { %p5894_p0 = pnand %p5893_p13, %p5889_p10 }
 0x523   : > { %5897 = shalt.err (!%p5894_p0)
}
 0x524   : > { %s5963_s23 = smov 256   ;;  %s5964_s28 = smov 16  }
 0x525   : > { %5791 = dma.vmem_to_hbm [thread:$0]  (%p6028_p5), %s6990_s8, 512, %s6987_s7, %s6994_s9, %s5963_s23, %s5963_s23, %s5964_s28  }
 0x526 PF: > { %p5797_p1 = scmp.ge.s32.totalorder %s5932_s18, 2  ;;  %s5522_s30 = sand.u32 1, %s5920_s15  }
 0x527   : > { %s5523_s5 = scalar_lea.sflag [#allocation4], %s5522_s30 }
 0x528   : > { %p5794_p2 = pnand %p5797_p1, %p6032_p6 }
 0x52a   : > { %p5795_p3 = pneg %p5794_p2 }
 0x52c   : > { %5915 = dma.done.wait (%p5795_p3), %s5523_s5, 512  }
 0x52d   : > { %5917 = vsyncadd (%p5795_p3), %s5523_s5, 4294966784  ;;  %p14_p4 = scmp.ge.s32.totalorder %s6015_s21, 5   ;;  %s7041_s15 = smov %s5924_s16 }
 0x52e   : > { %s7042_s16 = smov %s5928_s17  ;;  %s7043_s17 = smov %s6026_s24 }
 0x52f   : > { %s7044_s18 = smov %s6015_s21  ;;  %16 = sbr.rel (!%p14_p4) target bundleno = 3 (0x3), region = 110 }
 0x534   :  { %5528 = vsyncpa [#allocation4], 1 }
 0x535   :  { %5530 = vsyncpa [#allocation4 + $0x1], 1 }

</bundles_post_ra>
